<compile_context>
chip_gen: v6e
topology: v6e:2x2x1
jax: 0.10.0
libtpu: 0.0.40
codegen_flags: <defaults>
</compile_context>

<pallas_src>
import functools

import jax
import jax.numpy as jnp
from jax import lax
from jax.experimental import pallas as pl
from jax.experimental.pallas import tpu as pltpu


# ------------------------------ Pallas kernel ------------------------------ #

def _selfattn_kernel(f_ref, g_ref, h_ref, xres_ref, wv_ref, bv_ref, gamma_ref,
                     o_ref, m_s, l_s, acc_s, *, n_valid, mask_last, bf16_exp):
    """One (batch, q_tile, kv_tile) flash-attention grid step.

    Layouts (all matmuls are canonical MXU shapes, no in-kernel transposes):
      f_ref    : (1, TQ, k)   bf16  pre-projected queries  f = x Wf^T + bf
      g_ref    : (1, k, TKV)  bf16  pre-projected keys     g = Wg x + bg
      h_ref    : (1, TKV, ch) bf16  pre-projected values   h = x Wh^T + bh
      xres_ref : (1, TQ, c)   f32   residual rows of x (fetched once per q tile)
      wv_ref   : (ch, c)      bf16  v-projection (transposed 1x1 conv)
      bv_ref   : (1, c)       f32
      gamma_ref: (1,)         f32   SMEM scalar
      scratch  : m_s/l_s (TQ, 1) f32, acc_s (TQ, ch) f32
    """
    f32 = jnp.float32
    bf16 = jnp.bfloat16
    ki = pl.program_id(2)
    nkv = pl.num_programs(2)

    # --- kv step 0: reset the online-softmax state ---------------------------
    @pl.when(ki == 0)
    def _init():
        m_s[...] = jnp.full(m_s.shape, -jnp.inf, f32)
        l_s[...] = jnp.zeros(l_s.shape, f32)
        acc_s[...] = jnp.zeros(acc_s.shape, f32)

    f_q = f_ref[0]                                                  # (TQ, k)
    g_kv = g_ref[0]                                                 # (k, TKV)
    h_kv = h_ref[0]                                                 # (TKV, ch)

    # --- scores: s[i, j] = f_i . g_j  (== torch.bmm(f^T, g)) -----------------
    s = jnp.dot(f_q, g_kv, preferred_element_type=f32)              # (TQ, TKV)

    if mask_last:
        # Padded kv columns (global index >= n_valid) must not enter softmax.
        tkv = s.shape[1]
        col = ki * tkv + lax.broadcasted_iota(jnp.int32, s.shape, 1)
        s = jnp.where(col < n_valid, s, -jnp.inf)

    # --- online softmax (normalization deferred to the epilogue) -------------
    m_prev = m_s[...]
    m_new = jnp.maximum(m_prev, jnp.max(s, axis=-1, keepdims=True))
    alpha = jnp.exp(m_prev - m_new)                                 # (TQ, 1)
    if bf16_exp:
        p_mm = jnp.exp((s - m_new).astype(bf16))                    # bf16 EUP
        p_sum = jnp.sum(p_mm.astype(f32), axis=-1, keepdims=True)
    else:
        p = jnp.exp(s - m_new)                                      # f32 EUP
        p_sum = jnp.sum(p, axis=-1, keepdims=True)
        p_mm = p.astype(bf16)
    l_s[...] = alpha * l_s[...] + p_sum
    # acc[i, :] += sum_j p[i, j] * h[j, :]   -- canonical matmul, no transpose
    acc_s[...] = alpha * acc_s[...] + jnp.dot(p_mm, h_kv,
                                              preferred_element_type=f32)
    m_s[...] = m_new

    # --- last kv step: normalize, v-projection, gamma residual ---------------
    @pl.when(ki == nkv - 1)
    def _finalize():
        inv_l = pl.reciprocal(l_s[...], approx=True)                # EUP slot
        out_half = (acc_s[...] * inv_l).astype(bf16)                # (TQ, ch)
        out_full = jnp.dot(out_half, wv_ref[...],
                           preferred_element_type=f32) + bv_ref[...]  # (TQ, c)
        o_ref[0] = gamma_ref[0] * out_full + xres_ref[0]


# --------------------------------- wrapper --------------------------------- #

def _round_up(a, m):
    return -(-a // m) * m


def _default_bf16_exp():
    """Use bf16 exp only where the EUP has a bf16 path (v6e / v7x)."""
    try:
        kind = jax.devices()[0].device_kind.lower()
    except Exception:
        return False
    if ("tpu" not in kind) and ("v6" not in kind) and ("v7" not in kind):
        return False
    for older in ("v2", "v3", "v4", "v5"):
        if older in kind:
            return False
    return True


def self_attn_forward(x, params, tq=512, tkv=512, bf16_exp=None):
    """x: (b, c, H, W) float32 (NCHW, like PyTorch). Returns (b, c, H, W)."""
    wf, bf, wg, bg, wh, bh, wv, bv, gamma = params
    b, c, H, W = x.shape
    assert c % 8 == 0, "channels must be a multiple of 8"
    N = H * W
    k = c // 8
    ch = c // 2
    f32, bf16 = jnp.float32, jnp.bfloat16
    if bf16_exp is None:
        bf16_exp = _default_bf16_exp()

    # tile sizes: clamp to N then pad; q tiles need x8, kv tiles need x128
    tq = max(8, _round_up(min(tq, N), 8))
    tkv = max(128, _round_up(min(tkv, N), 128))
    n_pad_q = _round_up(N, tq)
    n_pad_kv = _round_up(N, tkv)
    nq, nkv = n_pad_q // tq, n_pad_kv // tkv
    mask_last = (n_pad_kv != N)

    # --- hoisted 1x1 projections (plain XLA matmuls, stored bf16) ------------
    x_nc = jnp.transpose(x.reshape(b, c, N).astype(f32), (0, 2, 1))   # (b,N,c)
    f_all = jnp.einsum('bnc,kc->bnk', x_nc, wf) + bf[:, 0][None, None, :]
    g_all = jnp.einsum('kc,bnc->bkn', wg, x_nc) + bg[:, 0][None, :, None]
    h_all = jnp.einsum('bnc,mc->bnm', x_nc, wh) + bh[:, 0][None, None, :]

    f_p = jnp.pad(f_all.astype(bf16), ((0, 0), (0, n_pad_q - N), (0, 0)))
    g_p = jnp.pad(g_all.astype(bf16), ((0, 0), (0, 0), (0, n_pad_kv - N)))
    h_p = jnp.pad(h_all.astype(bf16), ((0, 0), (0, n_pad_kv - N), (0, 0)))
    x_p = jnp.pad(x_nc, ((0, 0), (0, n_pad_q - N), (0, 0)))           # f32 residual

    wv_t = wv.T.astype(bf16)                                          # (ch, c)
    bv_r = bv[:, 0].reshape(1, c).astype(f32)
    gamma_s = gamma.reshape(1).astype(f32)

    # --- VMEM budget: double-buffered blocks + constants + scratch -----------
    blk = 2 * (tq * k * 2 + k * tkv * 2 + tkv * ch * 2 + 2 * tq * c * 4)
    const = 2 * (ch * c * 2 + c * 4)
    scratch = 2 * tq * 4 + tq * ch * 4
    vmem_limit = int(min(48 * 2**20, max(2 * (blk + const + scratch), 16 * 2**20)))

    kernel = functools.partial(_selfattn_kernel, n_valid=N,
                               mask_last=mask_last, bf16_exp=bf16_exp)

    out = pl.pallas_call(
        kernel,
        out_shape=jax.ShapeDtypeStruct((b, n_pad_q, c), f32),
        grid_spec=pltpu.PrefetchScalarGridSpec(
            num_scalar_prefetch=0,
            grid=(b, nq, nkv),                      # kv axis last ("arbitrary")
            in_specs=[
                pl.BlockSpec((1, tq, k), lambda bi, qi, ki: (bi, qi, 0)),    # f
                pl.BlockSpec((1, k, tkv), lambda bi, qi, ki: (bi, 0, ki)),   # g
                pl.BlockSpec((1, tkv, ch), lambda bi, qi, ki: (bi, ki, 0)),  # h
                pl.BlockSpec((1, tq, c), lambda bi, qi, ki: (bi, qi, 0)),    # x residual
                pl.BlockSpec((ch, c), lambda bi, qi, ki: (0, 0)),            # wv
                pl.BlockSpec((1, c), lambda bi, qi, ki: (0, 0)),             # bv
                pl.BlockSpec(memory_space=pltpu.MemorySpace.SMEM),           # gamma
            ],
            out_specs=pl.BlockSpec((1, tq, c), lambda bi, qi, ki: (bi, qi, 0)),
            scratch_shapes=[
                pltpu.VMEM((tq, 1), f32),            # running max m
                pltpu.VMEM((tq, 1), f32),            # running sum l
                pltpu.VMEM((tq, ch), f32),           # output accumulator
            ],
        ),
        compiler_params=pltpu.CompilerParams(
            # batch & q axes parallel (megacore-shardable on v7x), kv arbitrary
            dimension_semantics=("parallel", "parallel", "arbitrary"),
            vmem_limit_bytes=vmem_limit,
        ),
    )(f_p, g_p, h_p, x_p, wv_t, bv_r, gamma_s)

    out = out[:, :N, :]
    return jnp.transpose(out, (0, 2, 1)).reshape(b, c, H, W)


# ------------------------ deterministic parameter init --------------------- #

def spectral_normalize(w, n_iter=50):
    """Divide (out, in) weight matrix by its largest singular value (power iter)."""
    # TODO(synk): PyTorch spectral_norm uses one power iteration per training
    # step with a persistent u; here it is applied as converged preprocessing.
    u = jnp.full((w.shape[0],), 1.0 / jnp.sqrt(w.shape[0]), jnp.float32)
    for _ in range(n_iter):
        v = w.T @ u
        v = v / (jnp.linalg.norm(v) + 1e-12)
        u = w @ v
        u = u / (jnp.linalg.norm(u) + 1e-12)
    sigma = u @ (w @ v)
    return w / sigma


def init_params(key, c):
    k = c // 8
    ch = c // 2
    ortho = jax.nn.initializers.orthogonal(scale=1.0)
    ks = jax.random.split(key, 8)
    wf = spectral_normalize(ortho(ks[0], (k, c), jnp.float32))
    wg = spectral_normalize(ortho(ks[1], (k, c), jnp.float32))
    wh = spectral_normalize(ortho(ks[2], (ch, c), jnp.float32))
    wv = spectral_normalize(ortho(ks[3], (c, ch), jnp.float32))
    # PyTorch Conv2d default bias init: U(-1/sqrt(fan_in), 1/sqrt(fan_in))
    bf = jax.random.uniform(ks[4], (k, 1), jnp.float32, -1.0, 1.0) / jnp.sqrt(c)
    bg = jax.random.uniform(ks[5], (k, 1), jnp.float32, -1.0, 1.0) / jnp.sqrt(c)
    bh = jax.random.uniform(ks[6], (ch, 1), jnp.float32, -1.0, 1.0) / jnp.sqrt(c)
    bv = jax.random.uniform(ks[7], (c, 1), jnp.float32, -1.0, 1.0) / jnp.sqrt(ch)
    gamma = jnp.zeros((1, 1), jnp.float32)   # nn.Parameter(torch.zeros(1))
    return (wf, bf, wg, bg, wh, bh, wv, bv, gamma)


# ------------------------------ JAX reference ------------------------------ #

def ref_forward(x, params):
    wf, bf, wg, bg, wh, bh, wv, bv, gamma = params
    b, c, H, W = x.shape
    N = H * W
    xf = x.reshape(b, c, N)
    f = jnp.einsum('kc,bcn->bkn', wf, xf) + bf[None]
    g = jnp.einsum('kc,bcn->bkn', wg, xf) + bg[None]
    h = jnp.einsum('kc,bcn->bkn', wh, xf) + bh[None]
    scores = jnp.einsum('bki,bkj->bij', f, g)            # bmm(f^T, g)
    beta = jax.nn.softmax(scores, axis=-1)
    out_half = jnp.einsum('bmj,bij->bmi', h, beta)       # bmm(h, beta^T)
    out = jnp.einsum('cm,bmn->bcn', wv, out_half) + bv[None]
    out = gamma[0, 0] * out + xf
    return out.reshape(b, c, H, W)


# ---------------------------------- main ----------------------------------- #

if __name__ == "__main__":
    key = jax.random.PRNGKey(0)
    b, c = 2, 128
    params = init_params(key, c)

    # 1) Faithful module init (gamma = 0 -> residual path), default tiles
    #    (clamped to N = 256): exact match against the reference.
    H, W = 16, 16
    x = jax.random.normal(jax.random.fold_in(key, 99), (b, c, H, W), jnp.float32)
    out = jax.block_until_ready(self_attn_forward(x, params))
    ref = ref_forward(x, params)
    assert jnp.allclose(out, ref, atol=1e-5, rtol=1e-5), "gamma=0 path mismatch"

    # 2) Non-zero gamma with a tile-indivisible N (16*12 = 192) and 128-tiles:
    #    exercises the online softmax across kv steps, q/kv padding and the
    #    padded-kv -inf mask.  bf16 MXU operands -> relaxed tolerance.
    params_nz = params[:-1] + (jnp.full((1, 1), 0.5, jnp.float32),)
    H2, W2 = 16, 12
    x2 = jax.random.normal(jax.random.fold_in(key, 7), (b, c, H2, W2), jnp.float32)
    out2 = jax.block_until_ready(self_attn_forward(x2, params_nz, tq=128, tkv=128))
    ref2 = ref_forward(x2, params_nz)
    err2 = float(jnp.max(jnp.abs(out2 - ref2)))
    assert jnp.allclose(out2, ref2, atol=5e-2, rtol=5e-2), \
        f"attention path mismatch (max abs err {err2})"

    # 3) Non-zero gamma at the default (large-tile) config.
    out3 = jax.block_until_ready(self_attn_forward(x, params_nz))
    ref3 = ref_forward(x, params_nz)
    err3 = float(jnp.max(jnp.abs(out3 - ref3)))
    assert jnp.allclose(out3, ref3, atol=5e-2, rtol=5e-2), \
        f"attention path mismatch (max abs err {err3})"

    print("KERNEL_OK")
</pallas_src>

<mosaic_0001>
module attributes {stable_mosaic.version = 11 : i64} {
  func.func @_selfattn_kernel(%arg0: i32, %arg1: i32, %arg2: i32, %arg3: memref<1x256x16xbf16, #tpu.memory_space<vmem>>, %arg4: memref<1x16x256xbf16, #tpu.memory_space<vmem>>, %arg5: memref<1x256x64xbf16, #tpu.memory_space<vmem>>, %arg6: memref<1x256x128xf32, #tpu.memory_space<vmem>>, %arg7: memref<64x128xbf16, #tpu.memory_space<vmem>>, %arg8: memref<1x128xf32, #tpu.memory_space<vmem>>, %arg9: memref<1xf32, #tpu.memory_space<smem>>, %arg10: memref<1x256x128xf32, #tpu.memory_space<vmem>>, %arg11: memref<256x1xf32, #tpu.memory_space<vmem>>, %arg12: memref<256x1xf32, #tpu.memory_space<vmem>>, %arg13: memref<256x64xf32, #tpu.memory_space<vmem>>) attributes {dimension_semantics = [#tpu.dimension_semantics<parallel>, #tpu.dimension_semantics<parallel>, #tpu.dimension_semantics<arbitrary>], iteration_bounds = array<i64: 2, 1, 1>, scalar_prefetch = 0 : i64, scratch_operands = 3 : i64, tpu.core_type = #tpu.core_type<tc>, window_params = [{transform_indices = @transform_0, window_bounds = array<i64: 1, 256, 16>}, {transform_indices = @transform_1, window_bounds = array<i64: 1, 16, 256>}, {transform_indices = @transform_2, window_bounds = array<i64: 1, 256, 64>}, {transform_indices = @transform_3, window_bounds = array<i64: 1, 256, 128>}, {pipeline_mode = #tpu.pipeline_mode<synchronous>, transform_indices = @transform_4, window_bounds = array<i64: 64, 128>}, {pipeline_mode = #tpu.pipeline_mode<synchronous>, transform_indices = @transform_5, window_bounds = array<i64: 1, 128>}, {transform_indices = @transform_6, window_bounds = array<i64: 1>}, {transform_indices = @transform_7, window_bounds = array<i64: 1, 256, 128>}]} {
    %c0_i32 = arith.constant 0 : i32
    %0 = arith.cmpi eq, %arg2, %c0_i32 : i32
    %1 = arith.extui %0 : i1 to i32
    %c0_i32_0 = arith.constant 0 : i32
    %2 = arith.cmpi ne, %1, %c0_i32_0 : i32
    scf.if %2 {
      %cst_26 = arith.constant 0xFF800000 : f32
      %36 = vector.broadcast %cst_26 : f32 to vector<256x1xf32>
      %c0_27 = arith.constant 0 : index
      %c0_28 = arith.constant 0 : index
      %37 = vector.load %arg11[%c0_27, %c0_28] : memref<256x1xf32, #tpu.memory_space<vmem>>, vector<256x1xf32>
      tpu.vector_store %arg11[%c0_27, %c0_28], %36 {strides = array<i32>} : memref<256x1xf32, #tpu.memory_space<vmem>>, vector<256x1xf32>,
      %cst_29 = arith.constant 0.000000e+00 : f32
      %38 = vector.broadcast %cst_29 : f32 to vector<256x1xf32>
      %c0_30 = arith.constant 0 : index
      %c0_31 = arith.constant 0 : index
      %39 = vector.load %arg12[%c0_30, %c0_31] : memref<256x1xf32, #tpu.memory_space<vmem>>, vector<256x1xf32>
      tpu.vector_store %arg12[%c0_30, %c0_31], %38 {strides = array<i32>} : memref<256x1xf32, #tpu.memory_space<vmem>>, vector<256x1xf32>,
      %cst_32 = arith.constant 0.000000e+00 : f32
      %40 = vector.broadcast %cst_32 : f32 to vector<256x64xf32>
      %c0_33 = arith.constant 0 : index
      %c0_34 = arith.constant 0 : index
      %41 = vector.load %arg13[%c0_33, %c0_34] : memref<256x64xf32, #tpu.memory_space<vmem>>, vector<256x64xf32>
      tpu.vector_store %arg13[%c0_33, %c0_34], %40 {strides = array<i32>} : memref<256x64xf32, #tpu.memory_space<vmem>>, vector<256x64xf32>,
    } else {
    }
    %c0 = arith.constant 0 : index
    %c0_1 = arith.constant 0 : index
    %c0_2 = arith.constant 0 : index
    %3 = vector.load %arg3[%c0, %c0_1, %c0_2] : memref<1x256x16xbf16, #tpu.memory_space<vmem>>, vector<1x256x16xbf16>
    %4 = vector.shape_cast %3 : vector<1x256x16xbf16> to vector<256x16xbf16>
    %c0_3 = arith.constant 0 : index
    %c0_4 = arith.constant 0 : index
    %c0_5 = arith.constant 0 : index
    %5 = vector.load %arg4[%c0_3, %c0_4, %c0_5] : memref<1x16x256xbf16, #tpu.memory_space<vmem>>, vector<1x16x256xbf16>
    %6 = vector.shape_cast %5 : vector<1x16x256xbf16> to vector<16x256xbf16>
    %c0_6 = arith.constant 0 : index
    %c0_7 = arith.constant 0 : index
    %c0_8 = arith.constant 0 : index
    %7 = vector.load %arg5[%c0_6, %c0_7, %c0_8] : memref<1x256x64xbf16, #tpu.memory_space<vmem>>, vector<1x256x64xbf16>
    %8 = vector.shape_cast %7 : vector<1x256x64xbf16> to vector<256x64xbf16>
    %cst = arith.constant dense<0.000000e+00> : vector<256x256xf32>
    %9 = tpu.matmul %4, %6, %cst {dimension_numbers = #tpu.dot_dimension_numbers<[1], [0], [0], [1], [0, 0, 1, 1], [], []>} : vector<256x16xbf16>, vector<16x256xbf16>, vector<256x256xf32> -> vector<256x256xf32>
    %c0_9 = arith.constant 0 : index
    %c0_10 = arith.constant 0 : index
    %10 = vector.load %arg11[%c0_9, %c0_10] : memref<256x1xf32, #tpu.memory_space<vmem>>, vector<256x1xf32>
    %cst_11 = arith.constant dense<0xFF800000> : vector<256xf32>
    %11 = vector.multi_reduction <maximumf>, %9, %cst_11 [1] : vector<256x256xf32> to vector<256xf32>
    %12 = vector.shape_cast %11 : vector<256xf32> to vector<256x1xf32>
    %13 = arith.maximumf %10, %12 : vector<256x1xf32>
    %14 = arith.subf %10, %13 : vector<256x1xf32>
    %15 = math.exp %14 : vector<256x1xf32>
    %16 = vector.broadcast %13 : vector<256x1xf32> to vector<256x256xf32>
    %17 = arith.subf %9, %16 : vector<256x256xf32>
    %18 = math.exp %17 : vector<256x256xf32>
    %cst_12 = arith.constant dense<0.000000e+00> : vector<256xf32>
    %19 = vector.multi_reduction <add>, %18, %cst_12 [1] : vector<256x256xf32> to vector<256xf32>
    %20 = vector.shape_cast %19 : vector<256xf32> to vector<256x1xf32>
    %21 = arith.truncf %18 : vector<256x256xf32> to vector<256x256xbf16>
    %c0_13 = arith.constant 0 : index
    %c0_14 = arith.constant 0 : index
    %22 = vector.load %arg12[%c0_13, %c0_14] : memref<256x1xf32, #tpu.memory_space<vmem>>, vector<256x1xf32>
    %23 = arith.mulf %15, %22 : vector<256x1xf32>
    %24 = arith.addf %23, %20 : vector<256x1xf32>
    %c0_15 = arith.constant 0 : index
    %c0_16 = arith.constant 0 : index
    %25 = vector.load %arg12[%c0_15, %c0_16] : memref<256x1xf32, #tpu.memory_space<vmem>>, vector<256x1xf32>
    tpu.vector_store %arg12[%c0_15, %c0_16], %24 {strides = array<i32>} : memref<256x1xf32, #tpu.memory_space<vmem>>, vector<256x1xf32>,
    %c0_17 = arith.constant 0 : index
    %c0_18 = arith.constant 0 : index
    %26 = vector.load %arg13[%c0_17, %c0_18] : memref<256x64xf32, #tpu.memory_space<vmem>>, vector<256x64xf32>
    %27 = vector.broadcast %15 : vector<256x1xf32> to vector<256x64xf32>
    %28 = arith.mulf %27, %26 : vector<256x64xf32>
    %cst_19 = arith.constant dense<0.000000e+00> : vector<256x64xf32>
    %29 = tpu.matmul %21, %8, %cst_19 {dimension_numbers = #tpu.dot_dimension_numbers<[1], [0], [0], [1], [0, 0, 1, 1], [], []>} : vector<256x256xbf16>, vector<256x64xbf16>, vector<256x64xf32> -> vector<256x64xf32>
    %30 = arith.addf %28, %29 : vector<256x64xf32>
    %c0_20 = arith.constant 0 : index
    %c0_21 = arith.constant 0 : index
    %31 = vector.load %arg13[%c0_20, %c0_21] : memref<256x64xf32, #tpu.memory_space<vmem>>, vector<256x64xf32>
    tpu.vector_store %arg13[%c0_20, %c0_21], %30 {strides = array<i32>} : memref<256x64xf32, #tpu.memory_space<vmem>>, vector<256x64xf32>,
    %c0_22 = arith.constant 0 : index
    %c0_23 = arith.constant 0 : index
    %32 = vector.load %arg11[%c0_22, %c0_23] : memref<256x1xf32, #tpu.memory_space<vmem>>, vector<256x1xf32>
    tpu.vector_store %arg11[%c0_22, %c0_23], %13 {strides = array<i32>} : memref<256x1xf32, #tpu.memory_space<vmem>>, vector<256x1xf32>,
    %c0_i32_24 = arith.constant 0 : i32
    %33 = arith.cmpi eq, %arg2, %c0_i32_24 : i32
    %34 = arith.extui %33 : i1 to i32
    %c0_i32_25 = arith.constant 0 : i32
    %35 = arith.cmpi ne, %34, %c0_i32_25 : i32
    scf.if %35 {
      %c0_26 = arith.constant 0 : index
      %c0_27 = arith.constant 0 : index
      %36 = vector.load %arg12[%c0_26, %c0_27] : memref<256x1xf32, #tpu.memory_space<vmem>>, vector<256x1xf32>
      %37 = tpu.reciprocal %36 {approx = true} : vector<256x1xf32> -> vector<256x1xf32>
      %c0_28 = arith.constant 0 : index
      %c0_29 = arith.constant 0 : index
      %38 = vector.load %arg13[%c0_28, %c0_29] : memref<256x64xf32, #tpu.memory_space<vmem>>, vector<256x64xf32>
      %39 = vector.broadcast %37 : vector<256x1xf32> to vector<256x64xf32>
      %40 = arith.mulf %38, %39 : vector<256x64xf32>
      %41 = arith.truncf %40 : vector<256x64xf32> to vector<256x64xbf16>
      %c0_30 = arith.constant 0 : index
      %c0_31 = arith.constant 0 : index
      %42 = vector.load %arg7[%c0_30, %c0_31] : memref<64x128xbf16, #tpu.memory_space<vmem>>, vector<64x128xbf16>
      %cst_32 = arith.constant dense<0.000000e+00> : vector<256x128xf32>
      %43 = tpu.matmul %41, %42, %cst_32 {dimension_numbers = #tpu.dot_dimension_numbers<[1], [0], [0], [1], [0, 0, 1, 1], [], []>} : vector<256x64xbf16>, vector<64x128xbf16>, vector<256x128xf32> -> vector<256x128xf32>
      %c0_33 = arith.constant 0 : index
      %c0_34 = arith.constant 0 : index
      %44 = vector.load %arg8[%c0_33, %c0_34] : memref<1x128xf32, #tpu.memory_space<vmem>>, vector<1x128xf32>
      %45 = vector.broadcast %44 : vector<1x128xf32> to vector<256x128xf32>
      %46 = arith.addf %43, %45 : vector<256x128xf32>
      %c0_35 = arith.constant 0 : index
      %47 = memref.load %arg9[%c0_35] : memref<1xf32, #tpu.memory_space<smem>>
      %48 = vector.broadcast %47 : f32 to vector<256x128xf32>
      %49 = arith.mulf %48, %46 : vector<256x128xf32>
      %c0_36 = arith.constant 0 : index
      %c0_37 = arith.constant 0 : index
      %c0_38 = arith.constant 0 : index
      %50 = vector.load %arg6[%c0_36, %c0_37, %c0_38] : memref<1x256x128xf32, #tpu.memory_space<vmem>>, vector<1x256x128xf32>
      %51 = vector.shape_cast %50 : vector<1x256x128xf32> to vector<256x128xf32>
      %52 = arith.addf %49, %51 : vector<256x128xf32>
      %c0_39 = arith.constant 0 : index
      %c0_40 = arith.constant 0 : index
      %c0_41 = arith.constant 0 : index
      %53 = vector.load %arg10[%c0_39, %c0_40, %c0_41] : memref<1x256x128xf32, #tpu.memory_space<vmem>>, vector<1x256x128xf32>
      %54 = vector.shape_cast %53 : vector<1x256x128xf32> to vector<256x128xf32>
      %55 = vector.shape_cast %52 : vector<256x128xf32> to vector<1x256x128xf32>
      tpu.vector_store %arg10[%c0_39, %c0_40, %c0_41], %55 {strides = array<i32>} : memref<1x256x128xf32, #tpu.memory_space<vmem>>, vector<1x256x128xf32>,
    } else {
    }
    return
  }
  func.func @transform_0(%arg0: i32, %arg1: i32, %arg2: i32) -> (i32, i32, i32) {
    %c0_i32 = arith.constant 0 : i32
    %c0_i32_0 = arith.constant 0 : i32
    return %arg0, %arg1, %c0_i32 : i32, i32, i32
  }
  func.func @transform_1(%arg0: i32, %arg1: i32, %arg2: i32) -> (i32, i32, i32) {
    %c0_i32 = arith.constant 0 : i32
    %c0_i32_0 = arith.constant 0 : i32
    return %arg0, %c0_i32, %arg2 : i32, i32, i32
  }
  func.func @transform_2(%arg0: i32, %arg1: i32, %arg2: i32) -> (i32, i32, i32) {
    %c0_i32 = arith.constant 0 : i32
    %c0_i32_0 = arith.constant 0 : i32
    return %arg0, %arg2, %c0_i32 : i32, i32, i32
  }
  func.func @transform_3(%arg0: i32, %arg1: i32, %arg2: i32) -> (i32, i32, i32) {
    %c0_i32 = arith.constant 0 : i32
    %c0_i32_0 = arith.constant 0 : i32
    return %arg0, %arg1, %c0_i32 : i32, i32, i32
  }
  func.func @transform_4(%arg0: i32, %arg1: i32, %arg2: i32) -> (i32, i32) {
    %c0_i32 = arith.constant 0 : i32
    %c0_i32_0 = arith.constant 0 : i32
    %c0_i32_1 = arith.constant 0 : i32
    return %c0_i32, %c0_i32_0 : i32, i32
  }
  func.func @transform_5(%arg0: i32, %arg1: i32, %arg2: i32) -> (i32, i32) {
    %c0_i32 = arith.constant 0 : i32
    %c0_i32_0 = arith.constant 0 : i32
    %c0_i32_1 = arith.constant 0 : i32
    return %c0_i32, %c0_i32_0 : i32, i32
  }
  func.func @transform_6(%arg0: i32, %arg1: i32, %arg2: i32) -> i32 {
    %c0_i32 = arith.constant 0 : i32
    %c0_i32_0 = arith.constant 0 : i32
    return %c0_i32 : i32
  }
  func.func @transform_7(%arg0: i32, %arg1: i32, %arg2: i32) -> (i32, i32, i32) {
    %c0_i32 = arith.constant 0 : i32
    %c0_i32_0 = arith.constant 0 : i32
    return %arg0, %arg1, %c0_i32 : i32, i32, i32
  }
}

</mosaic_0001>

<bundles_post_ra>
// kernel: tpu_custom_call.1
= control target key start
LH: loop header
LB: loop body
LE: loop exit
PB: predicated region body
PF: predicated region fallthrough
CT: control target
= control target key end

     0   :  { %s5458_s0 = inlined_call_operand.vmem [shape: bf16[2,256,16], index: 0, kind: input, shape index: {}]   ;;  %s5459_s1 = inlined_call_operand.vmem [shape: bf16[2,16,256], index: 1, kind: input, shape index: {}]   ;;  %s5460_s2 = inlined_call_operand.vmem [shape: bf16[2,256,64], index: 2, kind: input, shape index: {}]   ;;  %s5461_s3 = inlined_call_operand.vmem [shape: f32[2,256,128], index: 3, kind: input, shape index: {}]   ;;  %s5462_s4 = inlined_call_operand.vmem [shape: bf16[64,128], index: 4, kind: input, shape index: {}]   ;;  %s5463_s5 = inlined_call_operand.vmem [shape: f32[1,128], index: 5, kind: input, shape index: {}]   ;;  %s5464_s6 = inlined_call_operand.<no memory space> [shape: f32[1], index: 6, kind: input, shape index: {}]   ;;  %s5465_s7 = inlined_call_operand.hbm [shape: f32[2,256,128], index: 7, kind: output, shape index: {}]  }
   0x1   :  { %12 = sst [smem:[#allocation5]] %s5464_s6 }
   0x2   :  { %13 = vsyncpa [#allocation7], 0 }
   0x3   :  { %15 = vsyncpa [#allocation7 + $0x1], 0  ;;  %s3958_s26 = smov 0   ;;  %s3960_s27 = smov 0  }
   0x4   :  { %s3962_s28 = smov 0   ;;  %s3964_s29 = smov 0  }
   0x5   :  { %s3966_s30 = smov 0   ;;  %s3968_s8 = smov 0  }
   0x6 LB: > { %s3205_s6 = sadd.s32 4294967295, %s3907_s8   ;;  %s3206_s9 = sadd.s32 4294967294, %s3907_s8   ;;  %s3907_s8 = sphi %s3968_s8, %s21_s8   ;;  %s3903_s30 = sphi %s3966_s30, %s5765_s30   ;;  %s3899_s29 = sphi %s3964_s29, %s5764_s29   ;;  %s3895_s28 = sphi %s3962_s28, %s5763_s28   ;;  %s3891_s27 = sphi %s3960_s27, %s5762_s27   ;;  %s3887_s26 = sphi %s3958_s26, %s5761_s26  }
   0x7   : > { %s40_s10 = sadd.s32 1, %s3903_s30  ;;  %s224_s11 = sadd.s32 1, %s3895_s28 }
   0x8   : > { %p42_p0 = scmp.ge.s32.totalorder %s40_s10, 2  ;;  %p234_p1 = scmp.ne.s32.totalorder %s3895_s28, %s3891_s27 }
   0x9   : > { %p235_p2 = scmp.eq.s32.totalorder %s3205_s6, 1  ;;  %p240_p3 = scmp.ne.s32.totalorder %s3891_s27, %s3887_s26 }
   0xa   : > { %s5767_s10 = smov (%p42_p0, %s40_s10), 0  ;;  %p241_p5 = scmp.eq.s32.totalorder %s3206_s9, 1 }
   0xb   : > { %p3998_p4 = por %p235_p2, %p234_p1  ;;  %s219_s13 = ssub.s32 %s3903_s30, %s5767_s10 }
   0xc   : > { %p3209_p6 = scmp.ge.s32.totalorder %s3907_s8, 1  ;;  %p222_p7 = scmp.eq.s32.totalorder %s219_s13, 0 }
   0xd   : > { %p4005_p8 = por %p241_p5, %p240_p3  ;;  %p320_p9 = scmp.lt.s32.totalorder %s3907_s8, 3 }
   0xe   : > { %s4011_s15 = scalar_select %p222_p7, %s3895_s28, %s224_s11  }
   0xf   : > { %p321_p10 = pnand %p3209_p6, %p320_p9 }
  0x11   : > { %324 = sbr.rel (%p321_p10) target bundleno = 1292 (0x50c), region = 48 }
  0x16   : > { %p384_p11 = scmp.lt.s32.totalorder %s3899_s29, 1  ;;  %v3909_v0 = vmov 0   ;;  %vm683_vm0 = vcmask 130048   ;;  %vm429_vm1 = vcmask 7168   ;;  %v3910_v19 = vmov -inf   ;;  %s2923_s23 = sld [smem:[#allocation5]] }
  0x17   : > { %764 = vmatprep.mubr.bf16.mxu0 %v3909_v0  ;;  %884 = vmatprep.mubr.bf16.mxu1 %v3909_v0  ;;  %430 = vst.msk [vmem:[#allocation2] sm:$0xff] %vm429_vm1, %v3910_v19  ;;  %431 = vst.msk [vmem:[#allocation2 + $0x8] sm:$0xff] %vm429_vm1, %v3910_v19  ;;  %v5466_v61 = vmov 0.0   ;;  %vm494_vm2 = vcmask 523264   ;;  %s380_s25 = sand.u32 1, %s3891_s27   ;;  %s3299_s19 = sshll.u32 %s3899_s29, 12 }
  0x18   : > { %s4015_s16 = scalar_select %p384_p11, %s3899_s29, 1  ;;  %3534 = vset.pattern.permute.xlu0 %v3909_v0  ;;  %3535 = vset.pattern.permute.xlu1 %v3909_v0  ;;  %432 = vst.msk [vmem:[#allocation2 + $0x10] sm:$0xff] %vm429_vm1, %v3910_v19  ;;  %433 = vst.msk [vmem:[#allocation2 + $0x18] sm:$0xff] %vm429_vm1, %v3910_v19 }
  0x19   : > { %434 = vst.msk [vmem:[#allocation2 + $0x20] sm:$0xff] %vm429_vm1, %v3910_v19  ;;  %435 = vst.msk [vmem:[#allocation2 + $0x28] sm:$0xff] %vm429_vm1, %v3910_v19  ;;  %s5413_s29 = scalar_lea.sflag [#allocation7], %s380_s25  ;;  %s3912_s6 = smov [#allocation6]  }
  0x1a   : > { %s3295_s17 = sshll.u32 %s4015_s16, 7  ;;  %s3296_s18 = sshll.u32 %s4015_s16, 4  ;;  %436 = vst.msk [vmem:[#allocation2 + $0x30] sm:$0xff] %vm429_vm1, %v3910_v19  ;;  %437 = vst.msk [vmem:[#allocation2 + $0x38] sm:$0xff] %vm429_vm1, %v3910_v19 }
  0x1b   : > { %s4022_s21 = scalar_lea.vmem %s5458_s0, %s3295_s17  ;;  %s401_s24 = scalar_lea.vmem %s5459_s1, %s3296_s18  ;;  %438 = vst.msk [vmem:[#allocation2 + $0x40] sm:$0xff] %vm429_vm1, %v3910_v19  ;;  %439 = vst.msk [vmem:[#allocation2 + $0x48] sm:$0xff] %vm429_vm1, %v3910_v19 }
  0x1c   : > { %v3536_v1 = vld [vmem:[%s401_s24 + $0x4] ss:$8 sps:$4 sm:$0xff]   ;;  %v3538_v2 = vld [vmem:[%s401_s24] ss:$8 sps:$4 sm:$0xff]   ;;  %s4038_s9 = scalar_lea.vmem %s5460_s2, %s3295_s17  ;;  %v3543_v7 = vld [vmem:[%s4022_s21 + $0x10] sm:$0xff]   ;;  %440 = vst.msk [vmem:[#allocation2 + $0x50] sm:$0xff] %vm429_vm1, %v3910_v19 }
  0x1d   : > { %746 = vmatprep.subr.bf16.mxu0 %v3536_v1  ;;  %3472 = vmatprep.subr.bf16.mxu1 %v3536_v1  ;;  %v3539_v3 = vld [vmem:[%s4022_s21] sm:$0xff]   ;;  %v3541_v5 = vld [vmem:[%s4022_s21 + $0x8] sm:$0xff]   ;;  %v3544_v8 = vld [vmem:[%s4022_s21 + $0x70] sm:$0xff]   ;;  %441 = vst.msk [vmem:[#allocation2 + $0x58] sm:$0xff] %vm429_vm1, %v3910_v19  ;;  %s3298_s24 = sshll.u32 %s4015_s16, 8  ;;  %s3210_s18 = sshll.u32 %s380_s25, 8 }
  0x1e   : > { %747 = vmatpush1.bf16.msra.mxu0 %v3538_v2  ;;  %3473 = vmatpush1.bf16.msra.mxu1 %v3538_v2  ;;  %v3540_v4 = vld [vmem:[%s4022_s21 + $0x60] sm:$0xff]   ;;  %v3542_v6 = vld [vmem:[%s4022_s21 + $0x68] sm:$0xff]   ;;  %v3545_v9 = vld [vmem:[%s4022_s21 + $0x18] sm:$0xff]   ;;  %442 = vst.msk [vmem:[#allocation2 + $0x60] sm:$0xff] %vm429_vm1, %v3910_v19  ;;  %s5266_s17 = scalar_lea.vmem %s5461_s3, %s3298_s24  ;;  %s5280_s16 = scalar_lea.vmem [#allocation6], %s3210_s18 }
  0x1f   : > { %v3546_v10 = vld [vmem:[%s4022_s21 + $0x20] sm:$0xff]   ;;  %v3547_v11 = vld [vmem:[%s4022_s21 + $0x28] sm:$0xff]   ;;  %v3548_v12 = vld [vmem:[%s4022_s21 + $0x30] sm:$0xff]   ;;  %443 = vst.msk [vmem:[#allocation2 + $0x68] sm:$0xff] %vm429_vm1, %v3910_v19  ;;  %s3069_s20 = sshll.u32 %s5280_s16, 4  ;;  %s5407_s20 = int_to_ptr.vmem [resolvable:$true] %s3069_s20 }
  0x20   : > { %v3549_v13 = vld [vmem:[%s4022_s21 + $0x38] sm:$0xff]   ;;  %v3550_v14 = vld [vmem:[%s4022_s21 + $0x40] sm:$0xff]   ;;  %v3551_v15 = vld [vmem:[%s4022_s21 + $0x48] sm:$0xff]   ;;  %444 = vst.msk [vmem:[#allocation2 + $0x70] sm:$0xff] %vm429_vm1, %v3910_v19  ;;  %s3831_s24 = scalar_lea.vmem %s5407_s20, 4096 }
  0x21   : > { %3237 = vmatmul.mubr.msk.bf16.vlgmr.msra.gmra.mxu0 %vm683_vm0, %v3539_v3  ;;  %3249 = vmatmul.mubr.msk.bf16.vlgmr.msra.gmra.mxu1 %vm683_vm0, %v3540_v4  ;;  %v3554_v16 = vld [vmem:[%s4022_s21 + $0x78] sm:$0xff]   ;;  %v3552_v17 = vld [vmem:[%s4022_s21 + $0x50] sm:$0xff]   ;;  %445 = vst.msk [vmem:[#allocation2 + $0x78] sm:$0xff] %vm429_vm1, %v3910_v19  ;;  %446 = vst.msk [vmem:[#allocation2 + $0x80] sm:$0xff] %vm429_vm1, %v3910_v19  ;;  %p3832_p12 = scmp.ne.s32.totalorder %s5407_s20, %s3831_s24 }
  0x22   : > { %774 = vmatprep.mubr.bf16.mxu0 %v3909_v0  ;;  %894 = vmatprep.mubr.bf16.mxu1 %v3909_v0  ;;  %v3553_v18 = vld [vmem:[%s4022_s21 + $0x58] sm:$0xff]   ;;  %447 = vst.msk [vmem:[#allocation2 + $0x88] sm:$0xff] %vm429_vm1, %v3910_v19  ;;  %448 = vst.msk [vmem:[#allocation2 + $0x90] sm:$0xff] %vm429_vm1, %v3910_v19 }
  0x23   : > { %449 = vst.msk [vmem:[#allocation2 + $0x98] sm:$0xff] %vm429_vm1, %v3910_v19  ;;  %450 = vst.msk [vmem:[#allocation2 + $0xa0] sm:$0xff] %vm429_vm1, %v3910_v19  ;;  %p3833_p13 = pnand %p3832_p12, %p3998_p4 }
  0x24   : > { %451 = vst.msk [vmem:[#allocation2 + $0xa8] sm:$0xff] %vm429_vm1, %v3910_v19  ;;  %452 = vst.msk [vmem:[#allocation2 + $0xb0] sm:$0xff] %vm429_vm1, %v3910_v19 }
  0x25   : > { %453 = vst.msk [vmem:[#allocation2 + $0xb8] sm:$0xff] %vm429_vm1, %v3910_v19  ;;  %454 = vst.msk [vmem:[#allocation2 + $0xc0] sm:$0xff] %vm429_vm1, %v3910_v19  ;;  %p3834_p0 = pneg %p3833_p13 }
  0x26   : > { %455 = vst.msk [vmem:[#allocation2 + $0xc8] sm:$0xff] %vm429_vm1, %v3910_v19  ;;  %456 = vst.msk [vmem:[#allocation2 + $0xd0] sm:$0xff] %vm429_vm1, %v3910_v19 }
  0x27   : > { %457 = vst.msk [vmem:[#allocation2 + $0xd8] sm:$0xff] %vm429_vm1, %v3910_v19  ;;  %458 = vst.msk [vmem:[#allocation2 + $0xe0] sm:$0xff] %vm429_vm1, %v3910_v19 }
  0x28   : > { %459 = vst.msk [vmem:[#allocation2 + $0xe8] sm:$0xff] %vm429_vm1, %v3910_v19  ;;  %460 = vst.msk [vmem:[#allocation2 + $0xf0] sm:$0xff] %vm429_vm1, %v3910_v19 }
  0x29   : > { %3238 = vmatmul.mubr.msk.bf16.gmra.mxu0 %vm683_vm0, %v3541_v5  ;;  %3250 = vmatmul.mubr.msk.bf16.gmra.mxu1 %vm683_vm0, %v3542_v6  ;;  %461 = vst.msk [vmem:[#allocation2 + $0xf8] sm:$0xff] %vm429_vm1, %v3910_v19  ;;  %462 = vst.msk [vmem:[#allocation3] sm:$0xff] %vm429_vm1, %v5466_v61 }
  0x2a   : > { %784 = vmatprep.mubr.bf16.mxu0 %v3909_v0  ;;  %904 = vmatprep.mubr.bf16.mxu1 %v3909_v0  ;;  %463 = vst.msk [vmem:[#allocation3 + $0x8] sm:$0xff] %vm429_vm1, %v5466_v61  ;;  %464 = vst.msk [vmem:[#allocation3 + $0x10] sm:$0xff] %vm429_vm1, %v5466_v61 }
  0x2b   : > { %465 = vst.msk [vmem:[#allocation3 + $0x18] sm:$0xff] %vm429_vm1, %v5466_v61  ;;  %466 = vst.msk [vmem:[#allocation3 + $0x20] sm:$0xff] %vm429_vm1, %v5466_v61 }
  0x2c   : > { %467 = vst.msk [vmem:[#allocation3 + $0x28] sm:$0xff] %vm429_vm1, %v5466_v61  ;;  %468 = vst.msk [vmem:[#allocation3 + $0x30] sm:$0xff] %vm429_vm1, %v5466_v61 }
  0x2d   : > { %469 = vst.msk [vmem:[#allocation3 + $0x38] sm:$0xff] %vm429_vm1, %v5466_v61  ;;  %470 = vst.msk [vmem:[#allocation3 + $0x40] sm:$0xff] %vm429_vm1, %v5466_v61 }
  0x2e   : > { %471 = vst.msk [vmem:[#allocation3 + $0x48] sm:$0xff] %vm429_vm1, %v5466_v61  ;;  %472 = vst.msk [vmem:[#allocation3 + $0x50] sm:$0xff] %vm429_vm1, %v5466_v61 }
  0x2f   : > { %473 = vst.msk [vmem:[#allocation3 + $0x58] sm:$0xff] %vm429_vm1, %v5466_v61  ;;  %474 = vst.msk [vmem:[#allocation3 + $0x60] sm:$0xff] %vm429_vm1, %v5466_v61 }
  0x30   : > { %475 = vst.msk [vmem:[#allocation3 + $0x68] sm:$0xff] %vm429_vm1, %v5466_v61  ;;  %476 = vst.msk [vmem:[#allocation3 + $0x70] sm:$0xff] %vm429_vm1, %v5466_v61 }
  0x31   : > { %3239 = vmatmul.mubr.msk.bf16.gmra.mxu0 %vm683_vm0, %v3543_v7  ;;  %3251 = vmatmul.mubr.msk.bf16.gmra.mxu1 %vm683_vm0, %v3544_v8  ;;  %477 = vst.msk [vmem:[#allocation3 + $0x78] sm:$0xff] %vm429_vm1, %v5466_v61  ;;  %478 = vst.msk [vmem:[#allocation3 + $0x80] sm:$0xff] %vm429_vm1, %v5466_v61 }
  0x32   : > { %794 = vmatprep.mubr.bf16.mxu0 %v3909_v0  ;;  %914 = vmatprep.mubr.bf16.mxu1 %v3909_v0  ;;  %479 = vst.msk [vmem:[#allocation3 + $0x88] sm:$0xff] %vm429_vm1, %v5466_v61  ;;  %480 = vst.msk [vmem:[#allocation3 + $0x90] sm:$0xff] %vm429_vm1, %v5466_v61 }
  0x33   : > { %481 = vst.msk [vmem:[#allocation3 + $0x98] sm:$0xff] %vm429_vm1, %v5466_v61  ;;  %482 = vst.msk [vmem:[#allocation3 + $0xa0] sm:$0xff] %vm429_vm1, %v5466_v61 }
  0x34   : > { %483 = vst.msk [vmem:[#allocation3 + $0xa8] sm:$0xff] %vm429_vm1, %v5466_v61  ;;  %484 = vst.msk [vmem:[#allocation3 + $0xb0] sm:$0xff] %vm429_vm1, %v5466_v61 }
  0x35   : > { %485 = vst.msk [vmem:[#allocation3 + $0xb8] sm:$0xff] %vm429_vm1, %v5466_v61  ;;  %486 = vst.msk [vmem:[#allocation3 + $0xc0] sm:$0xff] %vm429_vm1, %v5466_v61 }
  0x36   : > { %487 = vst.msk [vmem:[#allocation3 + $0xc8] sm:$0xff] %vm429_vm1, %v5466_v61  ;;  %488 = vst.msk [vmem:[#allocation3 + $0xd0] sm:$0xff] %vm429_vm1, %v5466_v61 }
  0x37   : > { %489 = vst.msk [vmem:[#allocation3 + $0xd8] sm:$0xff] %vm429_vm1, %v5466_v61  ;;  %490 = vst.msk [vmem:[#allocation3 + $0xe0] sm:$0xff] %vm429_vm1, %v5466_v61 }
  0x38   : > { %491 = vst.msk [vmem:[#allocation3 + $0xe8] sm:$0xff] %vm429_vm1, %v5466_v61  ;;  %492 = vst.msk [vmem:[#allocation3 + $0xf0] sm:$0xff] %vm429_vm1, %v5466_v61 }
  0x39   : > { %3240 = vmatmul.mubr.msk.bf16.gmra.mxu0 %vm683_vm0, %v3545_v9  ;;  %3252 = vmatmul.mubr.msk.bf16.gmra.mxu1 %vm683_vm0, %v3554_v16  ;;  %493 = vst.msk [vmem:[#allocation3 + $0xf8] sm:$0xff] %vm429_vm1, %v5466_v61  ;;  %v3555_v61 = vld [vmem:[%s4038_s9 + $0x78] sm:$0xff]  }
  0x3a   : > { %804 = vmatprep.mubr.bf16.mxu0 %v3909_v0  ;;  %3300 = vmatprep.subr.bf16.mxu1 %v3555_v61  ;;  %v4368_v61 = vld [vmem:[#allocation2 + $0x10] sm:$0xff] }
  0x41   : > { %3241 = vmatmul.mubr.msk.bf16.gmra.mxu0 %vm683_vm0, %v3546_v10 }
  0x42   : > { %814 = vmatprep.mubr.bf16.mxu0 %v3909_v0 }
  0x49   : > { %3242 = vmatmul.mubr.msk.bf16.gmra.mxu0 %vm683_vm0, %v3547_v11 }
  0x4a   : > { %824 = vmatprep.mubr.bf16.mxu0 %v3909_v0 }
  0x51   : > { %3243 = vmatmul.mubr.msk.bf16.gmra.mxu0 %vm683_vm0, %v3548_v12 }
  0x52   : > { %834 = vmatprep.mubr.bf16.mxu0 %v3909_v0 }
  0x59   : > { %3244 = vmatmul.mubr.msk.bf16.gmra.mxu0 %vm683_vm0, %v3549_v13 }
  0x5a   : > { %844 = vmatprep.mubr.bf16.mxu0 %v3909_v0 }
  0x61   : > { %3245 = vmatmul.mubr.msk.bf16.gmra.mxu0 %vm683_vm0, %v3550_v14 }
  0x62   : > { %854 = vmatprep.mubr.bf16.mxu0 %v3909_v0 }
  0x69   : > { %3246 = vmatmul.mubr.msk.bf16.gmra.mxu0 %vm683_vm0, %v3551_v15 }
  0x6a   : > { %864 = vmatprep.mubr.bf16.mxu0 %v3909_v0 }
  0x71   : > { %3247 = vmatmul.mubr.msk.bf16.gmra.mxu0 %vm683_vm0, %v3552_v17 }
  0x72   : > { %874 = vmatprep.mubr.bf16.mxu0 %v3909_v0 }
  0x79   : > { %3248 = vmatmul.mubr.msk.bf16.gmra.mxu0 %vm683_vm0, %v3553_v18 }
  0xe1   : > { %v4096_v20 = vpop.f32.mrf.mxu0  ;;  %v4098_v21 = vpop.f32.mrf.mxu1 }
  0xe2   : > { %5558 = vst [vmem:[#allocation9_spill] sm:$0xff] %v4098_v21 }
  0xe3   : > { %v4100_v22 = vpop.f32.mrf.mxu0  ;;  %v4102_v23 = vpop.f32.mrf.mxu1 }
  0xe4   : > { %5559 = vst [vmem:[#allocation10_spill] sm:$0xff] %v4102_v23  ;;  %v957_v24 = vmax.f32 %v4096_v20, %v4100_v22  ;;  %v1029_v27 = vmax.f32 %v4098_v21, %v4102_v23  ;;  %v4405_v23 = vld [vmem:[#allocation2 + $0x20] sm:$0xff] }
  0xe5   : > { %v4106_v25 = vpop.f32.mrf.mxu0  ;;  %v4108_v26 = vpop.f32.mrf.mxu1 }
  0xe6   : > { %5560 = vst [vmem:[#allocation11_spill] sm:$0xff] %v4108_v26  ;;  %958 = vmax.xlane.f32.xlu0 %v957_v24 }
  0xe7   : > { %v4112_v28 = vpop.f32.mrf.mxu0  ;;  %v4114_v29 = vpop.f32.mrf.mxu1 }
  0xe8   : > { %5561 = vst [vmem:[#allocation12_spill] sm:$0xff] %v4114_v29  ;;  %v1032_v30 = vmax.f32 %v4108_v26, %v4114_v29  ;;  %v960_v35 = vmax.f32 %v4106_v25, %v4112_v28 }
  0xe9   : > { %v4118_v31 = vpop.f32.mrf.mxu0  ;;  %v4120_v32 = vpop.f32.mrf.mxu1 }
  0xea   : > { %5562 = vst [vmem:[#allocation13_spill] sm:$0xff] %v4120_v32  ;;  %1033 = vmax.xlane.f32.xlu1 %v1032_v30  ;;  %1030 = vmax.xlane.f32.xlu0 %v1029_v27 }
  0xeb   : > { %v4122_v33 = vpop.f32.mrf.mxu0  ;;  %v4124_v34 = vpop.f32.mrf.mxu1 }
  0xec   : > { %5563 = vst [vmem:[#allocation14_spill] sm:$0xff] %v4124_v34  ;;  %v963_v36 = vmax.f32 %v4118_v31, %v4122_v33  ;;  %v1035_v39 = vmax.f32 %v4120_v32, %v4124_v34  ;;  %v4351_v32 = vld [vmem:[#allocation2 + $0xc0] sm:$0xff] }
  0xed   : > { %v4130_v37 = vpop.f32.mrf.mxu0  ;;  %v4132_v38 = vpop.f32.mrf.mxu1  ;;  %5595 = vst [vmem:[#allocation46_spill] sm:$0xff] %v4351_v32  ;;  %v3561_v34 = vld [vmem:[%s4038_s9 + $0x60] sm:$0xff]  }
  0xee   : > { %5564 = vst [vmem:[#allocation15_spill] sm:$0xff] %v4132_v38  ;;  %961 = vmax.xlane.f32.xlu0 %v960_v35  ;;  %964 = vmax.xlane.f32.xlu1 %v963_v36 }
  0xef   : > { %v4136_v40 = vpop.f32.mrf.mxu0  ;;  %v4138_v41 = vpop.f32.mrf.mxu1 }
  0xf0   : > { %5565 = vst [vmem:[#allocation16_spill] sm:$0xff] %v4138_v41  ;;  %v1038_v42 = vmax.f32 %v4132_v38, %v4138_v41  ;;  %v966_v47 = vmax.f32 %v4130_v37, %v4136_v40  ;;  %v3558_v38 = vld [vmem:[%s4038_s9 + $0x30] sm:$0xff]   ;;  %v3560_v41 = vld [vmem:[%s4038_s9 + $0x28] sm:$0xff]  }
  0xf1   : > { %v4142_v43 = vpop.f32.mrf.mxu0  ;;  %v4144_v44 = vpop.f32.mrf.mxu1 }
  0xf2   : > { %5566 = vst [vmem:[#allocation17_spill] sm:$0xff] %v4144_v44  ;;  %1039 = vmax.xlane.f32.xlu0 %v1038_v42  ;;  %1036 = vmax.xlane.f32.xlu1 %v1035_v39 }
  0xf3   : > { %v4146_v45 = vpop.f32.mrf.mxu0  ;;  %v4148_v46 = vpop.f32.mrf.mxu1 }
  0xf4   : > { %5567 = vst [vmem:[#allocation18_spill] sm:$0xff] %v4148_v46  ;;  %v969_v48 = vmax.f32 %v4142_v43, %v4146_v45  ;;  %v1041_v51 = vmax.f32 %v4144_v44, %v4148_v46  ;;  %v4342_v44 = vld [vmem:[#allocation2] sm:$0xff] }
  0xf5   : > { %v4154_v49 = vpop.f32.mrf.mxu0  ;;  %v4156_v50 = vpop.f32.mrf.mxu1 }
  0xf6   : > { %5568 = vst [vmem:[#allocation19_spill] sm:$0xff] %v4156_v50  ;;  %967 = vmax.xlane.f32.xlu1 %v966_v47  ;;  %970 = vmax.xlane.f32.xlu0 %v969_v48 }
  0xf7   : > { %v4160_v52 = vpop.f32.mrf.mxu0  ;;  %v4162_v53 = vpop.f32.mrf.mxu1 }
  0xf8   : > { %5569 = vst [vmem:[#allocation20_spill] sm:$0xff] %v4162_v53  ;;  %v972_v54 = vmax.f32 %v4154_v49, %v4160_v52  ;;  %v1044_v56 = vmax.f32 %v4156_v50, %v4162_v53  ;;  %v3556_v50 = vld [vmem:[%s4038_s9 + $0x38] sm:$0xff]  }
  0xf9   : > { %v4166_v55 = vpop.f32.mrf.mxu0  ;;  %3301 = vmatpush3.bf16.msra.mxu1 %v3556_v50  ;;  %v3559_v50 = vld [vmem:[%s4038_s9 + $0x68] sm:$0xff]  }
  0xfa   : > { %1042 = vmax.xlane.f32.xlu0 %v1041_v51  ;;  %973 = vmax.xlane.f32.xlu1 %v972_v54 }
  0xfb   : > { %v4170_v57 = vpop.f32.mrf.mxu0 }
  0xfc   : > { %v975_v58 = vmax.f32 %v4166_v55, %v4170_v57 }
  0xfd   : > { %v4174_v59 = vpop.f32.mrf.mxu0 }
  0xfe   : > { %1045 = vmax.xlane.f32.xlu1 %v1044_v56  ;;  %976 = vmax.xlane.f32.xlu0 %v975_v58 }
  0xff   : > { %v4176_v60 = vpop.f32.mrf.mxu0 }
 0x100   : > { %v978_v62 = vmax.f32 %v4174_v59, %v4176_v60 }
 0x101   : > { %v4244_v63 = vpop.f32.mrf.mxu0 }
 0x102   : > { %979 = vmax.xlane.f32.xlu1 %v978_v62 }
 0x103   : > { %v4246_v0 = vpop.f32.mrf.mxu0 }
 0x104   : > { %v981_v1 = vmax.f32 %v4244_v63, %v4246_v0 }
 0x105   : > { %v4250_v2 = vpop.f32.mrf.mxu0 }
 0x106   : > { %982 = vmax.xlane.f32.xlu0 %v981_v1 }
 0x107   : > { %v4252_v3 = vpop.f32.mrf.mxu0 }
 0x108   : > { %v984_v4 = vmax.f32 %v4250_v2, %v4252_v3 }
 0x109   : > { %v4256_v5 = vpop.f32.mrf.mxu0 }
 0x10a   : > { %985 = vmax.xlane.f32.xlu1 %v984_v4 }
 0x10b   : > { %v4258_v6 = vpop.f32.mrf.mxu0 }
 0x10c   : > { %v987_v7 = vmax.f32 %v4256_v5, %v4258_v6 }
 0x10d   : > { %v4262_v8 = vpop.f32.mrf.mxu0 }
 0x10e   : > { %988 = vmax.xlane.f32.xlu0 %v987_v7 }
 0x10f   : > { %v4264_v9 = vpop.f32.mrf.mxu0 }
 0x110   : > { %v990_v10 = vmax.f32 %v4262_v8, %v4264_v9 }
 0x111   : > { %v4268_v11 = vpop.f32.mrf.mxu0 }
 0x112   : > { %5570 = vst [vmem:[#allocation21_spill] sm:$0xff] %v4268_v11  ;;  %991 = vmax.xlane.f32.xlu1 %v990_v10 }
 0x113   : > { %v4270_v12 = vpop.f32.mrf.mxu0 }
 0x114   : > { %5571 = vst [vmem:[#allocation22_spill] sm:$0xff] %v4270_v12  ;;  %v993_v13 = vmax.f32 %v4268_v11, %v4270_v12  ;;  %v4534_v12 = vld [vmem:[#allocation2 + $0x70] sm:$0xff] }
 0x115   : > { %v4274_v14 = vpop.f32.mrf.mxu0  ;;  %5616 = vst [vmem:[#allocation67_spill] sm:$0xff] %v4534_v12 }
 0x116   : > { %5572 = vst [vmem:[#allocation23_spill] sm:$0xff] %v4274_v14  ;;  %994 = vmax.xlane.f32.xlu0 %v993_v13 }
 0x117   : > { %v4276_v15 = vpop.f32.mrf.mxu0 }
 0x118   : > { %5573 = vst [vmem:[#allocation24_spill] sm:$0xff] %v4276_v15  ;;  %v996_v16 = vmax.f32 %v4274_v14, %v4276_v15  ;;  %v4525_v15 = vpop.f32.mrf.mxu1 }
 0x119   : > { %v4280_v17 = vpop.f32.mrf.mxu0  ;;  %5615 = vst [vmem:[#allocation66_spill] sm:$0xff] %v4525_v15 }
 0x11a   : > { %5574 = vst [vmem:[#allocation25_spill] sm:$0xff] %v4280_v17  ;;  %997 = vmax.xlane.f32.xlu1 %v996_v16  ;;  %v4536_v11 = vpop.f32.mrf.mxu1 }
 0x11b   : > { %v4282_v18 = vpop.f32.mrf.mxu0  ;;  %5617 = vst [vmem:[#allocation68_spill] sm:$0xff] %v4536_v11 }
 0x11c   : > { %5575 = vst [vmem:[#allocation26_spill] sm:$0xff] %v4282_v18  ;;  %v999_v19 = vmax.f32 %v4280_v17, %v4282_v18  ;;  %v4523_v17 = vld [vmem:[#allocation2 + $0x68] sm:$0xff] }
 0x11d   : > { %v4286_v24 = vpop.f32.mrf.mxu0  ;;  %5614 = vst [vmem:[#allocation65_spill] sm:$0xff] %v4523_v17 }
 0x11e   : > { %5576 = vst [vmem:[#allocation27_spill] sm:$0xff] %v4286_v24  ;;  %1000 = vmax.xlane.f32.xlu0 %v999_v19 }
 0x11f   : > { %v4288_v27 = vpop.f32.mrf.mxu0 }
 0x120   : > { %5577 = vst [vmem:[#allocation28_spill] sm:$0xff] %v4288_v27  ;;  %v1002_v30 = vmax.f32 %v4286_v24, %v4288_v27  ;;  %v4503_v24 = vld [vmem:[#allocation2 + $0x58] sm:$0xff] }
 0x121   : > { %v4292_v35 = vpop.f32.mrf.mxu0  ;;  %5611 = vst [vmem:[#allocation62_spill] sm:$0xff] %v4503_v24 }
 0x122   : > { %5578 = vst [vmem:[#allocation29_spill] sm:$0xff] %v4292_v35  ;;  %1003 = vmax.xlane.f32.xlu1 %v1002_v30 }
 0x123   : > { %v4294_v36 = vpop.f32.mrf.mxu0 }
 0x124   : > { %5579 = vst [vmem:[#allocation30_spill] sm:$0xff] %v4294_v36  ;;  %v1005_v39 = vmax.f32 %v4292_v35, %v4294_v36  ;;  %v4513_v35 = vld [vmem:[#allocation2 + $0x60] sm:$0xff] }
 0x125   : > { %v4298_v42 = vpop.f32.mrf.mxu0  ;;  %5613 = vst [vmem:[#allocation64_spill] sm:$0xff] %v4513_v35 }
 0x126   : > { %5580 = vst [vmem:[#allocation31_spill] sm:$0xff] %v4298_v42  ;;  %1006 = vmax.xlane.f32.xlu0 %v1005_v39 }
 0x127   : > { %v4300_v47 = vpop.f32.mrf.mxu0 }
 0x128   : > { %5581 = vst [vmem:[#allocation32_spill] sm:$0xff] %v4300_v47  ;;  %v1008_v48 = vmax.f32 %v4298_v42, %v4300_v47  ;;  %v3569_v47 = vld [vmem:[%s4038_s9 + $0x40] sm:$0xff]   ;;  %v4460_v42 = vld [vmem:[#allocation2 + $0x38] sm:$0xff] }
 0x129   : > { %v4304_v51 = vpop.f32.mrf.mxu0 }
 0x12a   : > { %5582 = vst [vmem:[#allocation33_spill] sm:$0xff] %v4304_v51  ;;  %1009 = vmax.xlane.f32.xlu1 %v1008_v48 }
 0x12b   : > { %v4306_v54 = vpop.f32.mrf.mxu0 }
 0x12c   : > { %5583 = vst [vmem:[#allocation34_spill] sm:$0xff] %v4306_v54  ;;  %v1011_v56 = vmax.f32 %v4304_v51, %v4306_v54  ;;  %v3567_v51 = vld [vmem:[%s4038_s9 + $0x48] sm:$0xff]  }
 0x12d   : > { %v4310_v58 = vpop.f32.mrf.mxu0 }
 0x12e   : > { %5584 = vst [vmem:[#allocation35_spill] sm:$0xff] %v4310_v58  ;;  %1012 = vmax.xlane.f32.xlu0 %v1011_v56 }
 0x12f   : > { %v4312_v62 = vpop.f32.mrf.mxu0 }
 0x130   : > { %5585 = vst [vmem:[#allocation36_spill] sm:$0xff] %v4312_v62  ;;  %v1014_v1 = vmax.f32 %v4310_v58, %v4312_v62 }
 0x131   : > { %v4316_v4 = vpop.f32.mrf.mxu0 }
 0x132   : > { %5586 = vst [vmem:[#allocation37_spill] sm:$0xff] %v4316_v4  ;;  %1015 = vmax.xlane.f32.xlu1 %v1014_v1 }
 0x133   : > { %v4318_v7 = vpop.f32.mrf.mxu0 }
 0x134   : > { %5587 = vst [vmem:[#allocation38_spill] sm:$0xff] %v4318_v7  ;;  %v1017_v10 = vmax.f32 %v4316_v4, %v4318_v7  ;;  %v3566_v4 = vld [vmem:[%s4038_s9 + $0x10] sm:$0xff]  }
 0x135   : > { %v4322_v13 = vpop.f32.mrf.mxu0 }
 0x136   : > { %5588 = vst [vmem:[#allocation39_spill] sm:$0xff] %v4322_v13  ;;  %1018 = vmax.xlane.f32.xlu1 %v1017_v10 }
 0x137   : > { %v4324_v16 = vpop.f32.mrf.mxu0 }
 0x138   : > { %5589 = vst [vmem:[#allocation40_spill] sm:$0xff] %v4324_v16  ;;  %v1020_v19 = vmax.f32 %v4322_v13, %v4324_v16  ;;  %v3570_v16 = vld [vmem:[%s4038_s9] sm:$0xff]   ;;  %v4493_v13 = vld [vmem:[#allocation2 + $0x50] sm:$0xff] }
 0x139   : > { %v4328_v30 = vpop.f32.mrf.mxu0  ;;  %5609 = vst [vmem:[#allocation60_spill] sm:$0xff] %v4493_v13 }
 0x13a   : > { %5590 = vst [vmem:[#allocation41_spill] sm:$0xff] %v4328_v30  ;;  %1021 = vmax.xlane.f32.xlu0 %v1020_v19  ;;  %v3557_v19 = vld [vmem:[%s4038_s9 + $0x70] sm:$0xff]  }
 0x13b   : > { %v4330_v39 = vpop.f32.mrf.mxu0  ;;  %3302 = vmatprep.subr.bf16.mxu1 %v3557_v19 }
 0x13c   : > { %5591 = vst [vmem:[#allocation42_spill] sm:$0xff] %v4330_v39  ;;  %v1023_v48 = vmax.f32 %v4328_v30, %v4330_v39  ;;  %3303 = vmatpush3.bf16.msra.mxu1 %v3558_v38  ;;  %v4366_v38 = vld [vmem:[#allocation2 + $0x8] sm:$0xff]  ;;  %v3564_v39 = vld [vmem:[%s4038_s9 + $0x18] sm:$0xff]  }
 0x13d   : > { %v4334_v56 = vpop.f32.mrf.mxu0  ;;  %3304 = vmatprep.subr.bf16.mxu1 %v3559_v50  ;;  %v4403_v30 = vld [vmem:[#allocation2 + $0x18] sm:$0xff] }
 0x13e   : > { %5592 = vst [vmem:[#allocation43_spill] sm:$0xff] %v4334_v56  ;;  %1024 = vmax.xlane.f32.xlu1 %v1023_v48  ;;  %v4349_v48 = vld [vmem:[#allocation2 + $0xc8] sm:$0xff] }
 0x13f   : > { %v4336_v1 = vpop.f32.mrf.mxu0  ;;  %5594 = vst [vmem:[#allocation45_spill] sm:$0xff] %v4349_v48 }
 0x140   : > { %5593 = vst [vmem:[#allocation44_spill] sm:$0xff] %v4336_v1  ;;  %v1026_v10 = vmax.f32 %v4334_v56, %v4336_v1  ;;  %3305 = vmatpush3.bf16.msra.mxu1 %v3560_v41  ;;  %v4382_v41 = vld [vmem:[#allocation2 + $0xd8] sm:$0xff]  ;;  %v4443_v1 = vld [vmem:[#allocation2 + $0x30] sm:$0xff]  ;;  %v3568_v56 = vld [vmem:[%s4038_s9 + $0x8] sm:$0xff]  }
 0x141   : > { %3306 = vmatprep.subr.bf16.mxu1 %v3561_v34  ;;  %5597 = vst [vmem:[#allocation48_spill] sm:$0xff] %v4382_v41 }
 0x142   : > { %1027 = vmax.xlane.f32.xlu0 %v1026_v10 }
 0x16f   : > { %v959_v53 = vpop.xlane.xlu0 %958 }
 0x170   : > { %v4347_v46 = vmax.f32 %v4342_v44, %v959_v53 }
 0x172   : > { %2336 = vst.msk [vmem:[#allocation2] sm:$0xff] %vm429_vm1, %v4347_v46  ;;  %1183 = vperm.xlu0 %3534, %v4347_v46  }
 0x173   : > { %v1034_v10 = vpop.xlane.xlu1 %1033  ;;  %v1031_v53 = vpop.xlane.xlu0 %1030 }
 0x174   : > { %v4361_v19 = vmax.f32 %v4349_v48, %v1034_v10  ;;  %v4364_v26 = vmax.f32 %v4351_v32, %v1031_v53  ;;  %v3562_v48 = vld [vmem:[%s4038_s9 + $0x20] sm:$0xff]   ;;  %v4384_v32 = vld [vmem:[#allocation2 + $0xd0] sm:$0xff] }
 0x175   : > { %5598 = vst [vmem:[#allocation49_spill] sm:$0xff] %v4384_v32  ;;  %3307 = vmatpush3.bf16.msra.mxu1 %v3562_v48 }
 0x176   : > { %5596 = vst [vmem:[#allocation47_spill] sm:$0xff] %v4361_v19  ;;  %2361 = vst.msk [vmem:[#allocation2 + $0xc8] sm:$0xff] %vm429_vm1, %v4361_v19 }
 0x177   : > { %2360 = vst.msk [vmem:[#allocation2 + $0xc0] sm:$0xff] %vm429_vm1, %v4364_v26  ;;  %v962_v21 = vpop.xlane.xlu0 %961  ;;  %v965_v10 = vpop.xlane.xlu1 %964 }
 0x178   : > { %v4377_v53 = vmax.f32 %v4366_v38, %v962_v21  ;;  %v4380_v50 = vmax.f32 %v4368_v61, %v965_v10  ;;  %v3563_v21 = vld [vmem:[%s4038_s9 + $0x58] sm:$0xff]  }
 0x179   : > { %3308 = vmatprep.subr.bf16.mxu1 %v3563_v21 }
 0x17a   : > { %2337 = vst.msk [vmem:[#allocation2 + $0x8] sm:$0xff] %vm429_vm1, %v4377_v53  ;;  %2338 = vst.msk [vmem:[#allocation2 + $0x10] sm:$0xff] %vm429_vm1, %v4380_v50  ;;  %1188 = vperm.xlu1 %3535, %v4377_v53   ;;  %3309 = vmatpush3.bf16.msra.mxu1 %v3564_v39  ;;  %v4421_v39 = vld [vmem:[#allocation2 + $0x28] sm:$0xff] }
 0x17b   : > { %v1040_v34 = vpop.xlane.xlu0 %1039  ;;  %v1037_v10 = vpop.xlane.xlu1 %1036 }
 0x17c   : > { %v4398_v48 = vmax.f32 %v4382_v41, %v1040_v34  ;;  %v4401_v29 = vmax.f32 %v4384_v32, %v1037_v10  ;;  %v3565_v10 = vld [vmem:[%s4038_s9 + $0x50] sm:$0xff]   ;;  %v4419_v32 = vld [vmem:[#allocation2 + $0xe0] sm:$0xff]  ;;  %s3835_s9 = sshll.u32 %s3912_s6, 4  ;;  %s3836_s9 = int_to_ptr.vmem [resolvable:$false] %s3835_s9 }
 0x17d   : > { %5600 = vst [vmem:[#allocation51_spill] sm:$0xff] %v4419_v32  ;;  %3310 = vmatprep.subr.bf16.mxu1 %v3565_v10  ;;  %s3837_s11 = scalar_lea.vmem %s3836_s9, 8192  ;;  %p3838_p1 = scmp.lt.s32.totalorder %s5407_s20, %s3836_s9 }
 0x17e   : > { %5599 = vst [vmem:[#allocation50_spill] sm:$0xff] %v4398_v48  ;;  %2363 = vst.msk [vmem:[#allocation2 + $0xd8] sm:$0xff] %vm429_vm1, %v4398_v48  ;;  %1193 = vperm.xlu1 %3535, %v4380_v50   ;;  %3311 = vmatpush3.bf16.msra.mxu1 %v3566_v4  ;;  %p3839_p2 = scmp.lt.s32.totalorder %s3837_s11, %s3831_s24 }
 0x17f   : > { %2362 = vst.msk [vmem:[#allocation2 + $0xd0] sm:$0xff] %vm429_vm1, %v4401_v29  ;;  %v968_v34 = vpop.xlane.xlu1 %967  ;;  %v971_v41 = vpop.xlane.xlu0 %970  ;;  %3312 = vmatprep.subr.bf16.mxu1 %v3567_v51 }
 0x180   : > { %v4413_v7 = vmax.f32 %v4403_v30, %v968_v34  ;;  %v4416_v21 = vmax.f32 %v4405_v23, %v971_v41  ;;  %v4441_v34 = vld [vmem:[#allocation2 + $0xe8] sm:$0xff]  ;;  %p3840_p3 = por %p3839_p2, %p3838_p1 }
 0x181   : > { %5602 = vst [vmem:[#allocation53_spill] sm:$0xff] %v4441_v34 }
 0x182   : > { %2339 = vst.msk [vmem:[#allocation2 + $0x18] sm:$0xff] %vm429_vm1, %v4413_v7  ;;  %2340 = vst.msk [vmem:[#allocation2 + $0x20] sm:$0xff] %vm429_vm1, %v4416_v21  ;;  %1198 = vperm.xlu1 %3535, %v4413_v7   ;;  %1203 = vperm.xlu0 %3534, %v4416_v21   ;;  %p3841_p5 = pnand %p3840_p3, %p3834_p0 }
 0x183   : > { %v1043_v41 = vpop.xlane.xlu0 %1042  ;;  %v974_v58 = vpop.xlane.xlu1 %973  ;;  %3313 = vmatpush3.bf16.msra.mxu1 %v3568_v56  ;;  %v4473_v56 = vld [vmem:[#allocation2 + $0x40] sm:$0xff] }
 0x184   : > { %v4435_v54 = vmax.f32 %v4419_v32, %v1043_v41  ;;  %v4438_v62 = vmax.f32 %v4421_v39, %v974_v58  ;;  %3314 = vmatprep.subr.bf16.mxu1 %v3569_v47  ;;  %5605 = vst [vmem:[#allocation56_spill] sm:$0xff] %v4473_v56  ;;  %v4483_v47 = vld [vmem:[#allocation2 + $0x48] sm:$0xff] }
 0x185   : > { %5607 = vst [vmem:[#allocation58_spill] sm:$0xff] %v4483_v47 }
 0x186   : > { %5601 = vst [vmem:[#allocation52_spill] sm:$0xff] %v4435_v54  ;;  %2364 = vst.msk [vmem:[#allocation2 + $0xe0] sm:$0xff] %vm429_vm1, %v4435_v54  ;;  %1208 = vperm.xlu0 %3534, %v4438_v62  }
 0x187   : > { %2341 = vst.msk [vmem:[#allocation2 + $0x28] sm:$0xff] %vm429_vm1, %v4438_v62  ;;  %v1046_v58 = vpop.xlane.xlu1 %1045  ;;  %v977_v4 = vpop.xlane.xlu0 %976  ;;  %3315 = vmatpush3.bf16.msra.mxu1 %v3570_v16 }
 0x188   : > { %v4454_v41 = vmax.f32 %v4441_v34, %v1046_v58  ;;  %v4457_v32 = vmax.f32 %v4443_v1, %v977_v4 }
 0x18a   : > { %5603 = vst [vmem:[#allocation54_spill] sm:$0xff] %v4454_v41  ;;  %2365 = vst.msk [vmem:[#allocation2 + $0xe8] sm:$0xff] %vm429_vm1, %v4454_v41  ;;  %1213 = vperm.xlu1 %3535, %v4457_v32  }
 0x18b   : > { %2342 = vst.msk [vmem:[#allocation2 + $0x30] sm:$0xff] %vm429_vm1, %v4457_v32  ;;  %v980_v51 = vpop.xlane.xlu1 %979 }
 0x18c   : > { %v4471_v58 = vmax.f32 %v4460_v42, %v980_v51 }
 0x18e   : > { %5604 = vst [vmem:[#allocation55_spill] sm:$0xff] %v4471_v58  ;;  %2343 = vst.msk [vmem:[#allocation2 + $0x38] sm:$0xff] %vm429_vm1, %v4471_v58  ;;  %1218 = vperm.xlu1 %3535, %v4471_v58   ;;  %v4616_v58 = vld [vmem:[#allocation2 + $0xb0] sm:$0xff] }
 0x18f   : > { %v983_v10 = vpop.xlane.xlu0 %982 }
 0x190   : > { %v4481_v34 = vmax.f32 %v4473_v56, %v983_v10  ;;  %v1047_v56 = vmax.f32 %v4525_v15, %v4536_v11 }
 0x192   : > { %5606 = vst [vmem:[#allocation57_spill] sm:$0xff] %v4481_v34  ;;  %2344 = vst.msk [vmem:[#allocation2 + $0x40] sm:$0xff] %vm429_vm1, %v4481_v34  ;;  %1223 = vperm.xlu0 %3534, %v4481_v34  }
 0x193   : > { %v986_v16 = vpop.xlane.xlu1 %985 }
 0x194   : > { %v4491_v4 = vmax.f32 %v4483_v47, %v986_v16  ;;  %v4569_v47 = vld [vmem:[#allocation2 + $0x88] sm:$0xff] }
 0x195   : > { %5622 = vst [vmem:[#allocation73_spill] sm:$0xff] %v4569_v47 }
 0x196   : > { %5608 = vst [vmem:[#allocation59_spill] sm:$0xff] %v4491_v4  ;;  %2345 = vst.msk [vmem:[#allocation2 + $0x48] sm:$0xff] %vm429_vm1, %v4491_v4  ;;  %1228 = vperm.xlu0 %3534, %v4491_v4  }
 0x197   : > { %v989_v51 = vpop.xlane.xlu0 %988 }
 0x198   : > { %v4501_v27 = vmax.f32 %v4493_v13, %v989_v51 }
 0x19a   : > { %5610 = vst [vmem:[#allocation61_spill] sm:$0xff] %v4501_v27  ;;  %2346 = vst.msk [vmem:[#allocation2 + $0x50] sm:$0xff] %vm429_vm1, %v4501_v27  ;;  %1233 = vperm.xlu1 %3535, %v4501_v27  }
 0x19b   : > { %v992_v10 = vpop.xlane.xlu1 %991 }
 0x19c   : > { %v4511_v36 = vmax.f32 %v4503_v24, %v992_v10  ;;  %v4547_v24 = vpop.f32.mrf.mxu1 }
 0x19d   : > { %5619 = vst [vmem:[#allocation70_spill] sm:$0xff] %v4547_v24 }
 0x19e   : > { %5612 = vst [vmem:[#allocation63_spill] sm:$0xff] %v4511_v36  ;;  %2347 = vst.msk [vmem:[#allocation2 + $0x58] sm:$0xff] %vm429_vm1, %v4511_v36  ;;  %1238 = vperm.xlu1 %3535, %v4511_v36   ;;  %v4558_v13 = vpop.f32.mrf.mxu1 }
 0x19f   : > { %v995_v16 = vpop.xlane.xlu0 %994  ;;  %5621 = vst [vmem:[#allocation72_spill] sm:$0xff] %v4558_v13 }
 0x1a0   : > { %v4521_v18 = vmax.f32 %v4513_v35, %v995_v16  ;;  %v4545_v35 = vld [vmem:[#allocation2 + $0x78] sm:$0xff] }
 0x1a1   : > { %5618 = vst [vmem:[#allocation69_spill] sm:$0xff] %v4545_v35 }
 0x1a2   : > { %2348 = vst.msk [vmem:[#allocation2 + $0x60] sm:$0xff] %vm429_vm1, %v4521_v18 }
 0x1a3   : > { %v998_v51 = vpop.xlane.xlu1 %997 }
 0x1a4   : > { %v4532_v14 = vmax.f32 %v4523_v17, %v998_v51  ;;  %v4556_v17 = vld [vmem:[#allocation2 + $0x80] sm:$0xff] }
 0x1a5   : > { %5620 = vst [vmem:[#allocation71_spill] sm:$0xff] %v4556_v17 }
 0x1a6   : > { %2349 = vst.msk [vmem:[#allocation2 + $0x68] sm:$0xff] %vm429_vm1, %v4532_v14 }
 0x1a7   : > { %v1001_v36 = vpop.xlane.xlu0 %1000 }
 0x1a8   : > { %v4543_v10 = vmax.f32 %v4534_v12, %v1001_v36  ;;  %v1050_v12 = vmax.f32 %v4547_v24, %v4558_v13 }
 0x1aa   : > { %2350 = vst.msk [vmem:[#allocation2 + $0x70] sm:$0xff] %vm429_vm1, %v4543_v10 }
 0x1ab   : > { %v1004_v27 = vpop.xlane.xlu1 %1003 }
 0x1ac   : > { %v4554_v16 = vmax.f32 %v4545_v35, %v1004_v27  ;;  %v4578_v35 = vld [vmem:[#allocation2 + $0x90] sm:$0xff]  ;;  %v4587_v27 = vld [vmem:[#allocation2 + $0x98] sm:$0xff] }
 0x1ad   : > { %5623 = vst [vmem:[#allocation74_spill] sm:$0xff] %v4578_v35  ;;  %5624 = vst [vmem:[#allocation75_spill] sm:$0xff] %v4587_v27 }
 0x1ae   : > { %2351 = vst.msk [vmem:[#allocation2 + $0x78] sm:$0xff] %vm429_vm1, %v4554_v16 }
 0x1af   : > { %v1007_v4 = vpop.xlane.xlu0 %1006 }
 0x1b0   : > { %v4565_v51 = vmax.f32 %v4556_v17, %v1007_v4  ;;  %v4596_v4 = vld [vmem:[#allocation2 + $0xa0] sm:$0xff] }
 0x1b1   : > { %5625 = vst [vmem:[#allocation76_spill] sm:$0xff] %v4596_v4 }
 0x1b2   : > { %2352 = vst.msk [vmem:[#allocation2 + $0x80] sm:$0xff] %vm429_vm1, %v4565_v51 }
 0x1b3   : > { %v1010_v34 = vpop.xlane.xlu1 %1009 }
 0x1b4   : > { %v4576_v36 = vmax.f32 %v4569_v47, %v1010_v34 }
 0x1b5   : > { %1051 = vmax.xlane.f32.xlu0 %v1050_v12 }
 0x1b6   : > { %2353 = vst.msk [vmem:[#allocation2 + $0x88] sm:$0xff] %vm429_vm1, %v4576_v36 }
 0x1b7   : > { %v1013_v13 = vpop.xlane.xlu0 %1012 }
 0x1b8   : > { %v4585_v24 = vmax.f32 %v4578_v35, %v1013_v13  ;;  %v4607_v35 = vld [vmem:[#allocation2 + $0xa8] sm:$0xff] }
 0x1ba   : > { %2354 = vst.msk [vmem:[#allocation2 + $0x90] sm:$0xff] %vm429_vm1, %v4585_v24 }
 0x1bb   : > { %v1016_v12 = vpop.xlane.xlu1 %1015 }
 0x1bc   : > { %v4594_v34 = vmax.f32 %v4587_v27, %v1016_v12  ;;  %v4625_v12 = vld [vmem:[#allocation2 + $0xb8] sm:$0xff] }
 0x1bd   : > { %5627 = vst [vmem:[#allocation78_spill] sm:$0xff] %v4625_v12 }
 0x1be   : > { %2355 = vst.msk [vmem:[#allocation2 + $0x98] sm:$0xff] %vm429_vm1, %v4594_v34 }
 0x1bf   : > { %v1019_v13 = vpop.xlane.xlu1 %1018 }
 0x1c0   : > { %v4605_v17 = vmax.f32 %v4596_v4, %v1019_v13 }
 0x1c2   : > { %1048 = vmax.xlane.f32.xlu1 %v1047_v56  ;;  %2356 = vst.msk [vmem:[#allocation2 + $0xa0] sm:$0xff] %vm429_vm1, %v4605_v17 }
 0x1c3   : > { %v1022_v47 = vpop.xlane.xlu0 %1021 }
 0x1c4   : > { %v4614_v27 = vmax.f32 %v4607_v35, %v1022_v47 }
 0x1c6   : > { %2357 = vst.msk [vmem:[#allocation2 + $0xa8] sm:$0xff] %vm429_vm1, %v4614_v27 }
 0x1c7   : > { %v1025_v13 = vpop.xlane.xlu1 %1024 }
 0x1c8   : > { %v4623_v56 = vmax.f32 %v4616_v58, %v1025_v13 }
 0x1ca   : > { %5626 = vst [vmem:[#allocation77_spill] sm:$0xff] %v4623_v56  ;;  %2358 = vst.msk [vmem:[#allocation2 + $0xb0] sm:$0xff] %vm429_vm1, %v4623_v56 }
 0x1cb   : > { %1243 = vperm.xlu0 %3534, %v4521_v18   ;;  %v1028_v47 = vpop.xlane.xlu0 %1027 }
 0x1cc   : > { %v4633_v11 = vmax.f32 %v4625_v12, %v1028_v47 }
 0x1ce   : > { %5628 = vst [vmem:[#allocation79_spill] sm:$0xff] %v4633_v11  ;;  %2359 = vst.msk [vmem:[#allocation2 + $0xb8] sm:$0xff] %vm429_vm1, %v4633_v11 }
 0x1cf   : > { %1248 = vperm.xlu0 %3534, %v4532_v14  }
 0x1d3   : > { %1263 = vperm.xlu1 %3535, %v4565_v51   ;;  %1253 = vperm.xlu0 %3534, %v4543_v10  }
 0x1d7   : > { %1288 = vperm.xlu1 %3535, %v4614_v27   ;;  %1258 = vperm.xlu0 %3534, %v4554_v16  }
 0x1db   : > { %1268 = vperm.xlu0 %3534, %v4576_v36   ;;  %1298 = vperm.xlu1 %3535, %v4633_v11  }
 0x1df   : > { %1273 = vperm.xlu0 %3534, %v4585_v24   ;;  %1308 = vperm.xlu1 %3535, %v4361_v19  }
 0x1e3   : > { %1278 = vperm.xlu0 %3534, %v4594_v34   ;;  %1318 = vperm.xlu1 %3535, %v4398_v48  }
 0x1e7   : > { %1283 = vperm.xlu0 %3534, %v4605_v17   ;;  %1328 = vperm.xlu1 %3535, %v4454_v41  }
 0x1eb   : > { %1293 = vperm.xlu0 %3534, %v4623_v56  }
 0x1ed   : > { %v1184_v13 = vpop.permute.xlu0 %1183 }
 0x1ee   : > { %v1341_v47 = vsub.f32 %v4096_v20, %v1184_v13  ;;  %v1342_v4 = vsub.f32 %v4100_v22, %v1184_v13 }
 0x1ef   : > { %1303 = vperm.xlu0 %3534, %v4364_v26  }
 0x1f0   : > { %v1405_v15 = vmul.f32 1.442695, %v1341_v47  ;;  %v1407_v11 = vmul.f32 1.442695, %v1342_v4 }
 0x1f2   : > { %3575 = vpow2.f32 %v1405_v15 }
 0x1f3   : > { %3577 = vpow2.f32 %v1407_v11  ;;  %1313 = vperm.xlu0 %3534, %v4401_v29  }
 0x1f5   : > { %v1189_v48 = vpop.permute.xlu1 %1188 }
 0x1f6   : > { %v1343_v12 = vsub.f32 %v4106_v25, %v1189_v48  ;;  %v1344_v41 = vsub.f32 %v4112_v28, %v1189_v48 }
 0x1f7   : > { %1323 = vperm.xlu0 %3534, %v4435_v54  }
 0x1f8   : > { %v1409_v19 = vmul.f32 1.442695, %v1343_v12  ;;  %v1411_v56 = vmul.f32 1.442695, %v1344_v41 }
 0x1f9   : > { %v1194_v20 = vpop.permute.xlu1 %1193 }
 0x1fa   : > { %3579 = vpow2.f32 %v1409_v19  ;;  %v1345_v22 = vsub.f32 %v4118_v31, %v1194_v20  ;;  %v1346_v13 = vsub.f32 %v4122_v33, %v1194_v20 }
 0x1fb   : > { %3581 = vpow2.f32 %v1411_v56 }
 0x1fc   : > { %v1413_v15 = vmul.f32 1.442695, %v1345_v22  ;;  %v1415_v11 = vmul.f32 1.442695, %v1346_v13 }
 0x1fd   : > { %v1199_v4 = vpop.permute.xlu1 %1198  ;;  %v1204_v47 = vpop.permute.xlu0 %1203 }
 0x1fe   : > { %3583 = vpow2.f32 %v1413_v15  ;;  %v1347_v25 = vsub.f32 %v4130_v37, %v1199_v4  ;;  %v1348_v28 = vsub.f32 %v4136_v40, %v1199_v4  ;;  %v1349_v48 = vsub.f32 %v4142_v43, %v1204_v47 }
 0x1ff   : > { %v3576_v12 = vpop.eup %3575  ;;  %3585 = vpow2.f32 %v1415_v11  ;;  %v1350_v19 = vsub.f32 %v4146_v45, %v1204_v47 }
 0x200   : > { %v3578_v41 = vpop.eup %3577  ;;  %v1417_v31 = vmul.f32 1.442695, %v1347_v25  ;;  %v1419_v54 = vmul.f32 1.442695, %v1348_v28  ;;  %v1421_v33 = vmul.f32 1.442695, %v1349_v48 }
 0x201   : > { %v1423_v56 = vmul.f32 1.442695, %v1350_v19  ;;  %v1209_v20 = vpop.permute.xlu0 %1208  ;;  %v4666_v22 = vadd.f32 %v3578_v41, %v3576_v12 }
 0x202   : > { %3587 = vpow2.f32 %v1417_v31  ;;  %v1351_v13 = vsub.f32 %v4154_v49, %v1209_v20  ;;  %v1352_v37 = vsub.f32 %v4160_v52, %v1209_v20 }
 0x203   : > { %3589 = vpow2.f32 %v1419_v54 }
 0x204   : > { %3591 = vpow2.f32 %v1421_v33  ;;  %v1425_v40 = vmul.f32 1.442695, %v1351_v13  ;;  %v1427_v43 = vmul.f32 1.442695, %v1352_v37 }
 0x205   : > { %3593 = vpow2.f32 %v1423_v56  ;;  %v1214_v15 = vpop.permute.xlu1 %1213 }
 0x206   : > { %3595 = vpow2.f32 %v1425_v40  ;;  %v1353_v45 = vsub.f32 %v4166_v55, %v1214_v15  ;;  %v1354_v11 = vsub.f32 %v4170_v57, %v1214_v15 }
 0x207   : > { %v3580_v4 = vpop.eup %3579  ;;  %3597 = vpow2.f32 %v1427_v43 }
 0x208   : > { %v3582_v47 = vpop.eup %3581  ;;  %v1429_v25 = vmul.f32 1.442695, %v1353_v45  ;;  %v1431_v28 = vmul.f32 1.442695, %v1354_v11  ;;  %v1629_v48 = vpack.c.bf16 %v3580_v4, %v3576_v12 }
 0x209   : > { %v1219_v49 = vpop.permute.xlu1 %1218  ;;  %v1630_v19 = vpack.c.bf16 %v3582_v47, %v3578_v41  ;;  %v4672_v52 = vadd.f32 %v3582_v47, %v3580_v4 }
 0x20a   : > { %3599 = vpow2.f32 %v1429_v25  ;;  %v1355_v54 = vsub.f32 %v4174_v59, %v1219_v49  ;;  %v1356_v31 = vsub.f32 %v4176_v60, %v1219_v49 }
 0x20b   : > { %v3584_v33 = vpop.eup %3583  ;;  %3601 = vpow2.f32 %v1431_v28  ;;  %2142 = vmatprep.mubr.bf16.mxu1 %v1630_v19 }
 0x20c   : > { %v3586_v55 = vpop.eup %3585  ;;  %v1433_v57 = vmul.f32 1.442695, %v1355_v54  ;;  %v1435_v56 = vmul.f32 1.442695, %v1356_v31  ;;  %2143 = vmatmul.mubr.bf16.vlgmr.msra.gmra.mxu1 %v1629_v48 }
 0x20d   : > { %v1224_v20 = vpop.permute.xlu0 %1223  ;;  %v4676_v13 = vadd.f32 %v3586_v55, %v3584_v33 }
 0x20e   : > { %3603 = vpow2.f32 %v1433_v57  ;;  %v1357_v12 = vsub.f32 %v4244_v63, %v1224_v20  ;;  %v1358_v41 = vsub.f32 %v4246_v0, %v1224_v20 }
 0x20f   : > { %v3588_v37 = vpop.eup %3587  ;;  %3605 = vpow2.f32 %v1435_v56 }
 0x210   : > { %v3590_v59 = vpop.eup %3589  ;;  %v1437_v40 = vmul.f32 1.442695, %v1357_v12  ;;  %v1439_v60 = vmul.f32 1.442695, %v1358_v41  ;;  %v1631_v43 = vpack.c.bf16 %v3588_v37, %v3584_v33 }
 0x211   : > { %v3592_v15 = vpop.eup %3591  ;;  %v1229_v45 = vpop.permute.xlu0 %1228  ;;  %v1632_v11 = vpack.c.bf16 %v3590_v59, %v3586_v55  ;;  %v4680_v4 = vadd.f32 %v3590_v59, %v3588_v37 }
 0x212   : > { %v3594_v47 = vpop.eup %3593  ;;  %3607 = vpow2.f32 %v1437_v40  ;;  %v1359_v25 = vsub.f32 %v4250_v2, %v1229_v45  ;;  %v1360_v28 = vsub.f32 %v4252_v3, %v1229_v45 }
 0x213   : > { %v3596_v63 = vpop.eup %3595  ;;  %3609 = vpow2.f32 %v1439_v60  ;;  %2150 = vmatprep.mubr.bf16.mxu1 %v1632_v11  ;;  %v4684_v0 = vadd.f32 %v3594_v47, %v3592_v15 }
 0x214   : > { %v3598_v48 = vpop.eup %3597  ;;  %v1441_v49 = vmul.f32 1.442695, %v1359_v25  ;;  %v1443_v19 = vmul.f32 1.442695, %v1360_v28  ;;  %2151 = vmatmul.mubr.bf16.gmra.mxu1 %v1631_v43  ;;  %v1633_v40 = vpack.c.bf16 %v3596_v63, %v3592_v15 }
 0x215   : > { %v1234_v54 = vpop.permute.xlu1 %1233  ;;  %v1634_v31 = vpack.c.bf16 %v3598_v48, %v3594_v47  ;;  %v4686_v33 = vadd.f32 %v3598_v48, %v3596_v63 }
 0x216   : > { %3611 = vpow2.f32 %v1441_v49  ;;  %v1361_v55 = vsub.f32 %v4256_v5, %v1234_v54  ;;  %v1362_v2 = vsub.f32 %v4258_v6, %v1234_v54 }
 0x217   : > { %v3600_v57 = vpop.eup %3599  ;;  %3613 = vpow2.f32 %v1443_v19  ;;  %2158 = vmatprep.mubr.bf16.mxu1 %v1634_v31 }
 0x218   : > { %v3602_v3 = vpop.eup %3601  ;;  %v1445_v56 = vmul.f32 1.442695, %v1361_v55  ;;  %v1447_v20 = vmul.f32 1.442695, %v1362_v2 }
 0x219   : > { %v1239_v12 = vpop.permute.xlu1 %1238  ;;  %v4690_v41 = vadd.f32 %v3602_v3, %v3600_v57 }
 0x21a   : > { %3615 = vpow2.f32 %v1445_v56  ;;  %v1363_v37 = vsub.f32 %v4262_v8, %v1239_v12  ;;  %v1364_v59 = vsub.f32 %v4264_v9, %v1239_v12 }
 0x21b   : > { %v3604_v60 = vpop.eup %3603  ;;  %3617 = vpow2.f32 %v1447_v20  ;;  %v5629_v20 = vsub.f32 %v4342_v44, %v4347_v46  ;;  %v5633_v44 = vsub.f32 %v4405_v23, %v4416_v21  ;;  %v5635_v23 = vsub.f32 %v4421_v39, %v4438_v62  ;;  %v5642_v39 = vld [vmem:[#allocation58_spill] sm:$0xff] }
 0x21c   : > { %v3606_v5 = vpop.eup %3605  ;;  %v1449_v43 = vmul.f32 1.442695, %v1363_v37  ;;  %v1451_v6 = vmul.f32 1.442695, %v1364_v59  ;;  %2159 = vmatmul.mubr.bf16.gmra.mxu1 %v1633_v40  ;;  %v1635_v8 = vpack.c.bf16 %v3604_v60, %v3600_v57  ;;  %v5630_v37 = vsub.f32 %v4368_v61, %v4380_v50 }
 0x21d   : > { %v1636_v45 = vpack.c.bf16 %v3606_v5, %v3602_v3  ;;  %v4694_v11 = vadd.f32 %v3606_v5, %v3604_v60  ;;  %v1117_v12 = vmul.f32 1.442695, %v5629_v20  ;;  %v5631_v40 = vsub.f32 %v4366_v38, %v4377_v53  ;;  %v5637_v53 = vld [vmem:[#allocation55_spill] sm:$0xff] }
 0x21e   : > { %3619 = vpow2.f32 %v1449_v43  ;;  %v1121_v59 = vmul.f32 1.442695, %v5630_v37  ;;  %v5632_v5 = vsub.f32 %v4403_v30, %v4413_v7  ;;  %v1125_v46 = vmul.f32 1.442695, %v5633_v44 }
 0x21f   : > { %v3608_v47 = vpop.eup %3607  ;;  %3621 = vpow2.f32 %v1451_v6  ;;  %2166 = vmatprep.mubr.bf16.mxu1 %v1636_v45  ;;  %v1119_v60 = vmul.f32 1.442695, %v5631_v40  ;;  %v4719_v6 = vld [vmem:[#allocation2 + $0xf8] sm:$0xff]  ;;  %v5634_v45 = vmov 0.0   ;;  %v1127_v7 = vmul.f32 1.442695, %v5635_v23 }
 0x220   : > { %v3610_v25 = vpop.eup %3609  ;;  %3623 = vpow2.f32 %v1117_v12  ;;  %v1123_v43 = vmul.f32 1.442695, %v5632_v5  ;;  %495 = vst.msk [vmem:[#allocation4] sm:$0xff] %vm494_vm2, %v5634_v45  ;;  %496 = vst.msk [vmem:[#allocation4 + $0x8] sm:$0xff] %vm494_vm2, %v5634_v45  ;;  %v5636_v30 = vsub.f32 %v4443_v1, %v4457_v32  ;;  %v5638_v50 = vsub.f32 %v4460_v42, %v5637_v53  ;;  %v5645_v42 = vld [vmem:[#allocation60_spill] sm:$0xff]  ;;  %v5653_v40 = vld [vmem:[#allocation65_spill] sm:$0xff] }
 0x221   : > { %v4696_v28 = vadd.f32 %v3610_v25, %v3608_v47  ;;  %3625 = vpow2.f32 %v1121_v59  ;;  %497 = vst.msk [vmem:[#allocation4 + $0x10] sm:$0xff] %vm494_vm2, %v5634_v45  ;;  %498 = vst.msk [vmem:[#allocation4 + $0x18] sm:$0xff] %vm494_vm2, %v5634_v45  ;;  %v5651_v12 = vld [vmem:[#allocation64_spill] sm:$0xff]  ;;  %v5657_v23 = vld [vmem:[#allocation21_spill] sm:$0xff] }
 0x222   : > { %499 = vst.msk [vmem:[#allocation4 + $0x20] sm:$0xff] %vm494_vm2, %v5634_v45  ;;  %500 = vst.msk [vmem:[#allocation4 + $0x28] sm:$0xff] %vm494_vm2, %v5634_v45  ;;  %3627 = vpow2.f32 %v1119_v60  ;;  %v1129_v61 = vmul.f32 1.442695, %v5636_v30  ;;  %v1131_v21 = vmul.f32 1.442695, %v5638_v50  ;;  %v5652_v37 = vsub.f32 %v5651_v12, %v4521_v18 }
 0x223   : > { %v3612_v48 = vpop.eup %3611  ;;  %501 = vst.msk [vmem:[#allocation4 + $0x30] sm:$0xff] %vm494_vm2, %v5634_v45  ;;  %502 = vst.msk [vmem:[#allocation4 + $0x38] sm:$0xff] %vm494_vm2, %v5634_v45  ;;  %3629 = vpow2.f32 %v1123_v43  ;;  %v5654_v60 = vsub.f32 %v5653_v40, %v4532_v14  ;;  %v5655_v43 = vld [vmem:[#allocation67_spill] sm:$0xff]  ;;  %v5658_v30 = vld [vmem:[#allocation22_spill] sm:$0xff] }
 0x224   : > { %v3614_v9 = vpop.eup %3613  ;;  %2167 = vmatmul.mubr.bf16.gmra.mxu1 %v1635_v8  ;;  %v1637_v31 = vpack.c.bf16 %v3612_v48, %v3608_v47  ;;  %503 = vst.msk [vmem:[#allocation4 + $0x40] sm:$0xff] %vm494_vm2, %v5634_v45  ;;  %504 = vst.msk [vmem:[#allocation4 + $0x48] sm:$0xff] %vm494_vm2, %v5634_v45  ;;  %3631 = vpow2.f32 %v1125_v46  ;;  %v5640_v8 = vld [vmem:[#allocation57_spill] sm:$0xff]  ;;  %v1141_v59 = vmul.f32 1.442695, %v5652_v37  ;;  %v5656_v44 = vsub.f32 %v5655_v43, %v4543_v10  ;;  %v4834_v10 = vld [vmem:[#allocation2 + $0xf0] sm:$0xff] }
 0x225   : > { %v1638_v15 = vpack.c.bf16 %v3614_v9, %v3610_v25  ;;  %v4698_v63 = vadd.f32 %v3614_v9, %v3612_v48  ;;  %505 = vst.msk [vmem:[#allocation4 + $0x50] sm:$0xff] %vm494_vm2, %v5634_v45  ;;  %506 = vst.msk [vmem:[#allocation4 + $0x58] sm:$0xff] %vm494_vm2, %v5634_v45  ;;  %v5639_v25 = vld [vmem:[#allocation56_spill] sm:$0xff]  ;;  %3633 = vpow2.f32 %v1127_v7  ;;  %v5643_v9 = vld [vmem:[#allocation59_spill] sm:$0xff]  ;;  %v1143_v5 = vmul.f32 1.442695, %v5654_v60 }
 0x226   : > { %507 = vst.msk [vmem:[#allocation4 + $0x60] sm:$0xff] %vm494_vm2, %v5634_v45  ;;  %508 = vst.msk [vmem:[#allocation4 + $0x68] sm:$0xff] %vm494_vm2, %v5634_v45  ;;  %v5641_v48 = vsub.f32 %v5639_v25, %v5640_v8  ;;  %3635 = vpow2.f32 %v1129_v61  ;;  %v1145_v46 = vmul.f32 1.442695, %v5656_v44  ;;  %v5661_v25 = vld [vmem:[#allocation71_spill] sm:$0xff]  ;;  %v5671_v43 = vld [vmem:[#allocation25_spill] sm:$0xff] }
 0x227   : > { %v3616_v49 = vpop.eup %3615  ;;  %2174 = vmatprep.mubr.bf16.mxu1 %v1638_v15  ;;  %509 = vst.msk [vmem:[#allocation4 + $0x70] sm:$0xff] %vm494_vm2, %v5634_v45  ;;  %510 = vst.msk [vmem:[#allocation4 + $0x78] sm:$0xff] %vm494_vm2, %v5634_v45  ;;  %v5644_v15 = vsub.f32 %v5642_v39, %v5643_v9  ;;  %3637 = vpow2.f32 %v1131_v21  ;;  %v5662_v8 = vsub.f32 %v5661_v25, %v4565_v51  ;;  %v5663_v9 = vld [vmem:[#allocation23_spill] sm:$0xff]  ;;  %v5665_v51 = vld [vmem:[#allocation73_spill] sm:$0xff] }
 0x228   : > { %v3618_v19 = vpop.eup %3617  ;;  %511 = vst.msk [vmem:[#allocation4 + $0x80] sm:$0xff] %vm494_vm2, %v5634_v45  ;;  %512 = vst.msk [vmem:[#allocation4 + $0x88] sm:$0xff] %vm494_vm2, %v5634_v45  ;;  %v1133_v62 = vmul.f32 1.442695, %v5641_v48  ;;  %v5668_v37 = vld [vmem:[#allocation75_spill] sm:$0xff] }
 0x229   : > { %v4700_v54 = vadd.f32 %v3618_v19, %v3616_v49  ;;  %513 = vst.msk [vmem:[#allocation4 + $0x90] sm:$0xff] %vm494_vm2, %v5634_v45  ;;  %514 = vst.msk [vmem:[#allocation4 + $0x98] sm:$0xff] %vm494_vm2, %v5634_v45  ;;  %v1135_v32 = vmul.f32 1.442695, %v5644_v15  ;;  %v1149_v48 = vmul.f32 1.442695, %v5662_v8 }
 0x22a   : > { %515 = vst.msk [vmem:[#allocation4 + $0xa0] sm:$0xff] %vm494_vm2, %v5634_v45  ;;  %516 = vst.msk [vmem:[#allocation4 + $0xa8] sm:$0xff] %vm494_vm2, %v5634_v45  ;;  %3639 = vpow2.f32 %v1133_v62 }
 0x22b   : > { %v3620_v55 = vpop.eup %3619  ;;  %517 = vst.msk [vmem:[#allocation4 + $0xb0] sm:$0xff] %vm494_vm2, %v5634_v45  ;;  %518 = vst.msk [vmem:[#allocation4 + $0xb8] sm:$0xff] %vm494_vm2, %v5634_v45  ;;  %3641 = vpow2.f32 %v1135_v32 }
 0x22c   : > { %v3622_v2 = vpop.eup %3621  ;;  %2175 = vmatmul.mubr.bf16.gmra.mxu1 %v1637_v31  ;;  %v1639_v57 = vpack.c.bf16 %v3620_v55, %v3616_v49  ;;  %519 = vst.msk [vmem:[#allocation4 + $0xc0] sm:$0xff] %vm494_vm2, %v5634_v45  ;;  %520 = vst.msk [vmem:[#allocation4 + $0xc8] sm:$0xff] %vm494_vm2, %v5634_v45  ;;  %v5646_v49 = vld [vmem:[#allocation61_spill] sm:$0xff] }
 0x22d   : > { %v1640_v3 = vpack.c.bf16 %v3622_v2, %v3618_v19  ;;  %v4702_v56 = vadd.f32 %v3622_v2, %v3620_v55  ;;  %521 = vst.msk [vmem:[#allocation4 + $0xd0] sm:$0xff] %vm494_vm2, %v5634_v45  ;;  %522 = vst.msk [vmem:[#allocation4 + $0xd8] sm:$0xff] %vm494_vm2, %v5634_v45  ;;  %v5647_v19 = vsub.f32 %v5645_v42, %v5646_v49  ;;  %v5648_v55 = vld [vmem:[#allocation62_spill] sm:$0xff]  ;;  %v5649_v2 = vld [vmem:[#allocation63_spill] sm:$0xff]  ;;  %v4814_v20 = vpop.eup %3623 }
 0x22e   : > { %523 = vst.msk [vmem:[#allocation4 + $0xe0] sm:$0xff] %vm494_vm2, %v5634_v45  ;;  %524 = vst.msk [vmem:[#allocation4 + $0xe8] sm:$0xff] %vm494_vm2, %v5634_v45  ;;  %v4828_v18 = vpop.eup %3625 }
 0x22f   : > { %2182 = vmatprep.mubr.bf16.mxu1 %v1640_v3  ;;  %525 = vst.msk [vmem:[#allocation4 + $0xf0] sm:$0xff] %vm494_vm2, %v5634_v45  ;;  %526 = vst.msk [vmem:[#allocation4 + $0xf8] sm:$0xff] %vm494_vm2, %v5634_v45  ;;  %v1137_v31 = vmul.f32 1.442695, %v5647_v19  ;;  %v5650_v3 = vsub.f32 %v5648_v55, %v5649_v2  ;;  %v4839_v39 = vpop.eup %3627  ;;  %v5666_v55 = vsub.f32 %v5665_v51, %v4576_v36 }
 0x230   : > { %v4843_v49 = vpop.eup %3629 }
 0x231   : > { %3643 = vpow2.f32 %v1137_v31  ;;  %v4848_v31 = vpop.eup %3631  ;;  %v1151_v2 = vmul.f32 1.442695, %v5666_v55  ;;  %v5682_v55 = vld [vmem:[#allocation39_spill] sm:$0xff] }
 0x232   : > { %v4854_v12 = vpop.eup %3633 }
 0x233   : > { %5667 = vst [vmem:[#allocation55_spill] sm:$0xff] %v4854_v12 }
 0x234   : > { %2183 = vmatmul.mubr.bf16.gmra.mxu1 %v1639_v57  ;;  %v1139_v57 = vmul.f32 1.442695, %v5650_v3 }
 0x236   : > { %3645 = vpow2.f32 %v1139_v57 }
 0x237   : > { %3647 = vpow2.f32 %v1141_v59  ;;  %v5669_v59 = vsub.f32 %v5668_v37, %v4594_v34  ;;  %v5674_v34 = vld [vmem:[#allocation29_spill] sm:$0xff] }
 0x238   : > { %3649 = vpow2.f32 %v1143_v5  ;;  %v4864_v5 = vpop.eup %3635 }
 0x239   : > { %3651 = vpow2.f32 %v1145_v46  ;;  %v1155_v40 = vmul.f32 1.442695, %v5669_v59  ;;  %5670 = vst [vmem:[#allocation56_spill] sm:$0xff] %v4864_v5  ;;  %v5672_v46 = vld [vmem:[#allocation26_spill] sm:$0xff] }
 0x23e   : > { %v1052_v38 = vpop.xlane.xlu0 %1051 }
 0x23f   : > { %v4795_v47 = vmax.f32 %v4719_v6, %v1052_v38  ;;  %v5659_v38 = vld [vmem:[#allocation69_spill] sm:$0xff] }
 0x240   : > { %v5660_v14 = vsub.f32 %v5659_v38, %v4554_v16  ;;  %v5664_v16 = vld [vmem:[#allocation24_spill] sm:$0xff] }
 0x241   : > { %2367 = vst.msk [vmem:[#allocation2 + $0xf8] sm:$0xff] %vm429_vm1, %v4795_v47  ;;  %1338 = vperm.xlu1 %3535, %v4795_v47  }
 0x242   : > { %v1147_v53 = vmul.f32 1.442695, %v5660_v14 }
 0x245   : > { %1824 = vperm.xlu1 %3535, %v4814_v20  }
 0x246   : > { %v1244_v45 = vpop.permute.xlu0 %1243 }
 0x247   : > { %v1365_v7 = vsub.f32 %v5657_v23, %v1244_v45  ;;  %v1366_v61 = vsub.f32 %v5658_v30, %v1244_v45 }
 0x249   : > { %v1453_v50 = vmul.f32 1.442695, %v1365_v7  ;;  %v1455_v21 = vmul.f32 1.442695, %v1366_v61  ;;  %1834 = vperm.xlu1 %3535, %v4828_v18   ;;  %v4868_v7 = vpop.eup %3637  ;;  %v5675_v61 = vld [vmem:[#allocation30_spill] sm:$0xff] }
 0x24a   : > { %v1249_v62 = vpop.permute.xlu0 %1248  ;;  %5673 = vst [vmem:[#allocation57_spill] sm:$0xff] %v4868_v7  ;;  %v4872_v14 = vpop.eup %3639 }
 0x24b   : > { %3653 = vpow2.f32 %v1453_v50  ;;  %v1367_v15 = vsub.f32 %v5663_v9, %v1249_v62  ;;  %v1368_v32 = vsub.f32 %v5664_v16, %v1249_v62  ;;  %v1049_v42 = vpop.xlane.xlu1 %1048  ;;  %5676 = vst [vmem:[#allocation58_spill] sm:$0xff] %v4872_v14  ;;  %v5679_v9 = vld [vmem:[#allocation27_spill] sm:$0xff]  ;;  %v5680_v16 = vld [vmem:[#allocation28_spill] sm:$0xff] }
 0x24c   : > { %3655 = vpow2.f32 %v1455_v21  ;;  %v4846_v19 = vmax.f32 %v4834_v10, %v1049_v42  ;;  %v4875_v21 = vpop.eup %3641 }
 0x24d   : > { %3657 = vpow2.f32 %v1147_v53  ;;  %v1457_v3 = vmul.f32 1.442695, %v1367_v15  ;;  %v1459_v57 = vmul.f32 1.442695, %v1368_v32  ;;  %1839 = vperm.xlu1 %3535, %v4843_v49   ;;  %5677 = vst [vmem:[#allocation59_spill] sm:$0xff] %v4875_v21  ;;  %v4878_v62 = vpop.eup %3643 }
 0x24e   : > { %3659 = vpow2.f32 %v1149_v48  ;;  %2366 = vst.msk [vmem:[#allocation2 + $0xf0] sm:$0xff] %vm429_vm1, %v4846_v19  ;;  %1333 = vperm.xlu0 %3534, %v4846_v19   ;;  %v1254_v36 = vpop.permute.xlu0 %1253  ;;  %5678 = vst [vmem:[#allocation60_spill] sm:$0xff] %v4878_v62  ;;  %v4882_v51 = vpop.eup %3645 }
 0x24f   : > { %3661 = vpow2.f32 %v1457_v3  ;;  %v1369_v44 = vsub.f32 %v5671_v43, %v1254_v36  ;;  %v1370_v45 = vsub.f32 %v5672_v46, %v1254_v36  ;;  %v1264_v23 = vpop.permute.xlu1 %1263  ;;  %5681 = vst [vmem:[#allocation61_spill] sm:$0xff] %v4882_v51  ;;  %v5683_v3 = vld [vmem:[#allocation40_spill] sm:$0xff]  ;;  %v4886_v37 = vpop.eup %3647 }
 0x250   : > { %3663 = vpow2.f32 %v1459_v57  ;;  %v1373_v30 = vsub.f32 %v5674_v34, %v1264_v23  ;;  %v1374_v38 = vsub.f32 %v5675_v61, %v1264_v23  ;;  %5684 = vst [vmem:[#allocation62_spill] sm:$0xff] %v4886_v37  ;;  %v4889_v36 = vpop.eup %3649  ;;  %v5687_v23 = vld [vmem:[#allocation31_spill] sm:$0xff] }
 0x251   : > { %3665 = vpow2.f32 %v1151_v2  ;;  %v1461_v53 = vmul.f32 1.442695, %v1369_v44  ;;  %v1463_v50 = vmul.f32 1.442695, %v1370_v45  ;;  %1849 = vperm.xlu1 %3535, %v4854_v12   ;;  %5685 = vst [vmem:[#allocation63_spill] sm:$0xff] %v4889_v36  ;;  %v4892_v45 = vpop.eup %3651 }
 0x252   : > { %3667 = vpow2.f32 %v1155_v40  ;;  %v1469_v25 = vmul.f32 1.442695, %v1373_v30  ;;  %v1471_v8 = vmul.f32 1.442695, %v1374_v38  ;;  %1829 = vperm.xlu0 %3534, %v4839_v39   ;;  %v1259_v48 = vpop.permute.xlu0 %1258  ;;  %5686 = vst [vmem:[#allocation64_spill] sm:$0xff] %v4892_v45  ;;  %v5688_v30 = vld [vmem:[#allocation32_spill] sm:$0xff] }
 0x253   : > { %3669 = vpow2.f32 %v1461_v53  ;;  %v1371_v15 = vsub.f32 %v5679_v9, %v1259_v48  ;;  %v1372_v32 = vsub.f32 %v5680_v16, %v1259_v48  ;;  %v1289_v42 = vpop.permute.xlu1 %1288  ;;  %v5690_v48 = vld [vmem:[#allocation44_spill] sm:$0xff] }
 0x254   : > { %3671 = vpow2.f32 %v1463_v50  ;;  %v1383_v2 = vsub.f32 %v5682_v55, %v1289_v42  ;;  %v1384_v57 = vsub.f32 %v5683_v3, %v1289_v42  ;;  %v5689_v50 = vld [vmem:[#allocation43_spill] sm:$0xff] }
 0x255   : > { %3673 = vpow2.f32 %v1469_v25  ;;  %v1465_v59 = vmul.f32 1.442695, %v1371_v15  ;;  %v1467_v40 = vmul.f32 1.442695, %v1372_v32  ;;  %1859 = vperm.xlu1 %3535, %v4868_v7  }
 0x256   : > { %3675 = vpow2.f32 %v1471_v8  ;;  %v1489_v43 = vmul.f32 1.442695, %v1383_v2  ;;  %v1491_v44 = vmul.f32 1.442695, %v1384_v57  ;;  %1844 = vperm.xlu0 %3534, %v4848_v31   ;;  %v1269_v46 = vpop.permute.xlu0 %1268 }
 0x257   : > { %3677 = vpow2.f32 %v1465_v59  ;;  %v1375_v34 = vsub.f32 %v5687_v23, %v1269_v46  ;;  %v1376_v61 = vsub.f32 %v5688_v30, %v1269_v46  ;;  %v1299_v38 = vpop.permute.xlu1 %1298  ;;  %v5693_v59 = vld [vmem:[#allocation33_spill] sm:$0xff] }
 0x258   : > { %v3654_v53 = vpop.eup %3653  ;;  %3679 = vpow2.f32 %v1467_v40  ;;  %v1387_v25 = vsub.f32 %v5689_v50, %v1299_v38  ;;  %v1388_v9 = vsub.f32 %v5690_v48, %v1299_v38 }
 0x259   : > { %v3656_v8 = vpop.eup %3655  ;;  %3681 = vpow2.f32 %v1489_v43  ;;  %v1473_v15 = vmul.f32 1.442695, %v1375_v34  ;;  %v1475_v16 = vmul.f32 1.442695, %v1376_v61  ;;  %1869 = vperm.xlu1 %3535, %v4875_v21   ;;  %v5694_v43 = vld [vmem:[#allocation34_spill] sm:$0xff] }
 0x25a   : > { %v4899_v32 = vpop.eup %3657  ;;  %3683 = vpow2.f32 %v1491_v44  ;;  %v1497_v42 = vmul.f32 1.442695, %v1387_v25  ;;  %v1499_v55 = vmul.f32 1.442695, %v1388_v9  ;;  %1854 = vperm.xlu0 %3534, %v4864_v5   ;;  %v1274_v2 = vpop.permute.xlu0 %1273  ;;  %v4902_v3 = vadd.f32 %v3656_v8, %v3654_v53  ;;  %v5695_v34 = vld [vmem:[#allocation74_spill] sm:$0xff] }
 0x25b   : > { %5691 = vst [vmem:[#allocation65_spill] sm:$0xff] %v4899_v32  ;;  %v4904_v57 = vpop.eup %3659  ;;  %3685 = vpow2.f32 %v1473_v15  ;;  %v1377_v40 = vsub.f32 %v5693_v59, %v1274_v2  ;;  %v1378_v46 = vsub.f32 %v5694_v43, %v1274_v2  ;;  %v5696_v30 = vsub.f32 %v5695_v34, %v4585_v24 }
 0x25c   : > { %5692 = vst [vmem:[#allocation67_spill] sm:$0xff] %v4904_v57  ;;  %v3662_v23 = vpop.eup %3661  ;;  %3687 = vpow2.f32 %v1475_v16  ;;  %v5698_v9 = vsub.f32 %v4607_v35, %v4614_v27  ;;  %v5700_v16 = vld [vmem:[#allocation35_spill] sm:$0xff] }
 0x25d   : > { %v1153_v61 = vmul.f32 1.442695, %v5696_v30  ;;  %v3664_v44 = vpop.eup %3663  ;;  %3689 = vpow2.f32 %v1497_v42  ;;  %v1477_v38 = vmul.f32 1.442695, %v1377_v40  ;;  %v1479_v50 = vmul.f32 1.442695, %v1378_v46  ;;  %1879 = vperm.xlu1 %3535, %v4882_v51  }
 0x25e   : > { %v1641_v25 = vpack.c.bf16 %v3662_v23, %v3654_v53  ;;  %v4912_v48 = vpop.eup %3665  ;;  %v1159_v15 = vmul.f32 1.442695, %v5698_v9  ;;  %3691 = vpow2.f32 %v1499_v55  ;;  %1864 = vperm.xlu0 %3534, %v4872_v14   ;;  %v1279_v2 = vpop.permute.xlu0 %1278  ;;  %v1642_v24 = vpack.c.bf16 %v3664_v44, %v3656_v8  ;;  %v5701_v40 = vld [vmem:[#allocation36_spill] sm:$0xff]  ;;  %v5704_v9 = vld [vmem:[#allocation37_spill] sm:$0xff] }
 0x25f   : > { %5697 = vst [vmem:[#allocation21_spill] sm:$0xff] %v4912_v48  ;;  %v4918_v59 = vpop.eup %3667  ;;  %3693 = vpow2.f32 %v1477_v38  ;;  %v1379_v42 = vsub.f32 %v5700_v16, %v1279_v2  ;;  %v1380_v43 = vsub.f32 %v5701_v40, %v1279_v2  ;;  %v4922_v46 = vadd.f32 %v3664_v44, %v3662_v23  ;;  %v5702_v55 = vld [vmem:[#allocation76_spill] sm:$0xff]  ;;  %v5705_v2 = vld [vmem:[#allocation38_spill] sm:$0xff] }
 0x260   : > { %5699 = vst [vmem:[#allocation22_spill] sm:$0xff] %v4918_v59  ;;  %v3670_v53 = vpop.eup %3669  ;;  %3695 = vpow2.f32 %v1479_v50  ;;  %2190 = vmatprep.mubr.bf16.mxu1 %v1642_v24  ;;  %v5703_v30 = vsub.f32 %v5702_v55, %v4605_v17 }
 0x261   : > { %v3672_v34 = vpop.eup %3671  ;;  %3697 = vpow2.f32 %v1153_v61  ;;  %v1481_v35 = vmul.f32 1.442695, %v1379_v42  ;;  %v1483_v27 = vmul.f32 1.442695, %v1380_v43  ;;  %2191 = vmatmul.mubr.bf16.gmra.mxu1 %v1641_v25  ;;  %1889 = vperm.xlu1 %3535, %v4889_v36  }
 0x262   : > { %v3674_v8 = vpop.eup %3673  ;;  %3699 = vpow2.f32 %v1159_v15  ;;  %v1157_v38 = vmul.f32 1.442695, %v5703_v30  ;;  %1874 = vperm.xlu0 %3534, %v4878_v62   ;;  %v1284_v23 = vpop.permute.xlu0 %1283  ;;  %v4929_v44 = vadd.f32 %v3672_v34, %v3670_v53 }
 0x263   : > { %v3676_v50 = vpop.eup %3675  ;;  %3701 = vpow2.f32 %v1481_v35  ;;  %v1381_v61 = vsub.f32 %v5704_v9, %v1284_v23  ;;  %v1382_v24 = vsub.f32 %v5705_v2, %v1284_v23  ;;  %v5706_v23 = vld [vmem:[#allocation41_spill] sm:$0xff]  ;;  %v5707_v9 = vld [vmem:[#allocation42_spill] sm:$0xff] }
 0x264   : > { %v3678_v25 = vpop.eup %3677  ;;  %3703 = vpow2.f32 %v1483_v27  ;;  %v4933_v16 = vadd.f32 %v3676_v50, %v3674_v8 }
 0x265   : > { %v3680_v15 = vpop.eup %3679  ;;  %v1485_v42 = vmul.f32 1.442695, %v1381_v61  ;;  %v1487_v40 = vmul.f32 1.442695, %v1382_v24  ;;  %1899 = vperm.xlu1 %3535, %v4899_v32   ;;  %v1643_v17 = vpack.c.bf16 %v3678_v25, %v3670_v53  ;;  %3705 = vpow2.f32 %v1157_v38 }
 0x266   : > { %v4936_v43 = vpop.eup %3681  ;;  %1884 = vperm.xlu0 %3534, %v4886_v37   ;;  %v1294_v35 = vpop.permute.xlu0 %1293  ;;  %v1644_v55 = vpack.c.bf16 %v3680_v15, %v3672_v34  ;;  %v4943_v1 = vadd.f32 %v3680_v15, %v3678_v25 }
 0x267   : > { %v4939_v30 = vpop.eup %3683  ;;  %3707 = vpow2.f32 %v1485_v42  ;;  %v1385_v27 = vsub.f32 %v5706_v23, %v1294_v35  ;;  %v1386_v2 = vsub.f32 %v5707_v9, %v1294_v35  ;;  %v1309_v9 = vpop.permute.xlu1 %1308 }
 0x268   : > { %v3686_v61 = vpop.eup %3685  ;;  %3709 = vpow2.f32 %v1487_v40  ;;  %2198 = vmatprep.mubr.bf16.mxu1 %v1644_v55  ;;  %v4947_v53 = vadd.f32 %v4939_v30, %v4936_v43 }
 0x269   : > { %v3688_v38 = vpop.eup %3687  ;;  %v1493_v24 = vmul.f32 1.442695, %v1385_v27  ;;  %v1495_v60 = vmul.f32 1.442695, %v1386_v2  ;;  %2199 = vmatmul.mubr.bf16.gmra.mxu1 %v1643_v17  ;;  %1909 = vperm.xlu1 %3535, %v4912_v48   ;;  %v1645_v2 = vpack.c.bf16 %v3686_v61, %v3674_v8 }
 0x26a   : > { %v4950_v34 = vpop.eup %3689  ;;  %1894 = vperm.xlu0 %3534, %v4892_v45   ;;  %v1646_v42 = vpack.c.bf16 %v3688_v38, %v3676_v50  ;;  %v4953_v25 = vadd.f32 %v3688_v38, %v3686_v61  ;;  %v1304_v55 = vpop.permute.xlu0 %1303  ;;  %v5710_v38 = vld [vmem:[#allocation10_spill] sm:$0xff]  ;;  %v5711_v45 = vld [vmem:[#allocation12_spill] sm:$0xff] }
 0x26b   : > { %v4955_v15 = vpop.eup %3691  ;;  %3711 = vpow2.f32 %v1493_v24  ;;  %v1390_v24 = vsub.f32 %v5710_v38, %v1304_v55  ;;  %v1392_v37 = vsub.f32 %v5711_v45, %v1309_v9  ;;  %v1319_v38 = vpop.permute.xlu1 %1318 }
 0x26c   : > { %v3694_v40 = vpop.eup %3693  ;;  %3713 = vpow2.f32 %v1495_v60  ;;  %2206 = vmatprep.mubr.bf16.mxu1 %v1646_v42  ;;  %v4959_v35 = vadd.f32 %v4955_v15, %v4950_v34 }
 0x26d   : > { %v3696_v17 = vpop.eup %3695  ;;  %1919 = vperm.xlu1 %3535, %v4918_v59   ;;  %v1503_v14 = vmul.f32 1.442695, %v1390_v24  ;;  %v1507_v32 = vmul.f32 1.442695, %v1392_v37  ;;  %v5715_v24 = vld [vmem:[#allocation11_spill] sm:$0xff]  ;;  %v5716_v37 = vld [vmem:[#allocation16_spill] sm:$0xff] }
 0x26e   : > { %v4962_v23 = vpop.eup %3697  ;;  %1904 = vperm.xlu0 %3534, %v4904_v57   ;;  %v4965_v50 = vadd.f32 %v3696_v17, %v3694_v40  ;;  %v1314_v61 = vpop.permute.xlu0 %1313  ;;  %v1396_v7 = vsub.f32 %v5716_v37, %v1319_v38 }
 0x26f   : > { %5708 = vst [vmem:[#allocation69_spill] sm:$0xff] %v4962_v23  ;;  %v4967_v27 = vpop.eup %3699  ;;  %3715 = vpow2.f32 %v1503_v14  ;;  %v1329_v14 = vpop.permute.xlu1 %1328 }
 0x270   : > { %5709 = vst [vmem:[#allocation71_spill] sm:$0xff] %v4967_v27  ;;  %v3702_v60 = vpop.eup %3701  ;;  %3717 = vpow2.f32 %v1507_v32 }
 0x271   : > { %v3704_v42 = vpop.eup %3703  ;;  %2207 = vmatmul.mubr.bf16.gmra.mxu1 %v1645_v2  ;;  %1929 = vperm.xlu1 %3535, %v4967_v27   ;;  %v5713_v27 = vld [vmem:[#allocation9_spill] sm:$0xff]  ;;  %v1647_v36 = vpack.c.bf16 %v3702_v60, %v3694_v40 }
 0x272   : > { %1914 = vperm.xlu0 %3534, %v4962_v23   ;;  %v1648_v59 = vpack.c.bf16 %v3704_v42, %v3696_v17  ;;  %v4973_v62 = vadd.f32 %v3704_v42, %v3702_v60  ;;  %v4975_v57 = vpop.eup %3705  ;;  %v1389_v45 = vsub.f32 %v5713_v27, %v1304_v55  ;;  %v5714_v17 = vld [vmem:[#allocation14_spill] sm:$0xff]  ;;  %v1324_v40 = vpop.permute.xlu0 %1323  ;;  %v1515_v27 = vmul.f32 1.442695, %v1396_v7  ;;  %v5717_v60 = vld [vmem:[#allocation13_spill] sm:$0xff] }
 0x273   : > { %5712 = vst [vmem:[#allocation23_spill] sm:$0xff] %v4975_v57  ;;  %v1394_v42 = vsub.f32 %v5714_v17, %v1314_v61  ;;  %v1393_v17 = vsub.f32 %v5717_v60, %v1314_v61 }
 0x274   : > { %v3708_v48 = vpop.eup %3707  ;;  %2214 = vmatprep.mubr.bf16.mxu1 %v1648_v59  ;;  %v1391_v59 = vsub.f32 %v5715_v24, %v1309_v9  ;;  %v1501_v5 = vmul.f32 1.442695, %v1389_v45  ;;  %v5718_v9 = vld [vmem:[#allocation18_spill] sm:$0xff]  ;;  %v5720_v45 = vld [vmem:[#allocation20_spill] sm:$0xff] }
 0x275   : > { %v3710_v8 = vpop.eup %3709  ;;  %v1511_v12 = vmul.f32 1.442695, %v1394_v42  ;;  %v1400_v42 = vsub.f32 %v5720_v45, %v1329_v14  ;;  %v1509_v7 = vmul.f32 1.442695, %v1393_v17 }
 0x276   : > { %1924 = vperm.xlu0 %3534, %v4975_v57   ;;  %v4978_v2 = vadd.f32 %v3710_v8, %v3708_v48  ;;  %v1650_v51 = vpack.c.bf16 %v4939_v30, %v3710_v8  ;;  %v1505_v55 = vmul.f32 1.442695, %v1391_v59  ;;  %3719 = vpow2.f32 %v1501_v5 }
 0x277   : > { %v1649_v30 = vpack.c.bf16 %v4936_v43, %v3708_v48  ;;  %3721 = vpow2.f32 %v1511_v12  ;;  %v1523_v61 = vmul.f32 1.442695, %v1400_v42  ;;  %v5721_v12 = vld [vmem:[#allocation17_spill] sm:$0xff] }
 0x278   : > { %v3712_v23 = vpop.eup %3711  ;;  %3723 = vpow2.f32 %v1505_v55  ;;  %v1397_v48 = vsub.f32 %v5721_v12, %v1324_v40 }
 0x279   : > { %v3714_v21 = vpop.eup %3713  ;;  %2215 = vmatmul.mubr.bf16.gmra.mxu1 %v1647_v36  ;;  %v1398_v36 = vsub.f32 %v5718_v9, %v1324_v40  ;;  %3725 = vpow2.f32 %v1515_v27  ;;  %v1651_v43 = vpack.c.bf16 %v4950_v34, %v3712_v23 }
 0x27a   : > { %2222 = vmatprep.mubr.bf16.mxu1 %v1650_v51  ;;  %v4985_v57 = vadd.f32 %v3714_v21, %v3712_v23  ;;  %v1652_v32 = vpack.c.bf16 %v4955_v15, %v3714_v21  ;;  %v5719_v51 = vld [vmem:[#allocation15_spill] sm:$0xff]  ;;  %3727 = vpow2.f32 %v1509_v7  ;;  %v1517_v55 = vmul.f32 1.442695, %v1397_v48  ;;  %v5724_v48 = vld [vmem:[#allocation72_spill] sm:$0xff] }
 0x27b   : > { %v1395_v8 = vsub.f32 %v5719_v51, %v1319_v38  ;;  %v1519_v24 = vmul.f32 1.442695, %v1398_v36  ;;  %v5722_v15 = vld [vmem:[#allocation19_spill] sm:$0xff] }
 0x27c   : > { %v3716_v5 = vpop.eup %3715  ;;  %v1399_v38 = vsub.f32 %v5722_v15, %v1329_v14  ;;  %v5725_v15 = vld [vmem:[#allocation66_spill] sm:$0xff] }
 0x27d   : > { %v1513_v59 = vmul.f32 1.442695, %v1395_v8  ;;  %v3718_v37 = vpop.eup %3717  ;;  %3729 = vpow2.f32 %v1519_v24 }
 0x27e   : > { %v1654_v21 = vpack.c.bf16 %v3718_v37, %v3716_v5  ;;  %v1521_v17 = vmul.f32 1.442695, %v1399_v38 }
 0x27f   : > { %3731 = vpow2.f32 %v1513_v59 }
 0x280   : > { %3733 = vpow2.f32 %v1523_v61 }
 0x281   : > { %2223 = vmatmul.mubr.bf16.gmra.mxu1 %v1649_v30  ;;  %3735 = vpow2.f32 %v1517_v55  ;;  %v5726_v55 = vld [vmem:[#allocation68_spill] sm:$0xff] }
 0x282   : > { %2230 = vmatprep.mubr.bf16.mxu1 %v1652_v32  ;;  %3737 = vpow2.f32 %v1521_v17 }
 0x283   : > { %v3720_v27 = vpop.eup %3719 }
 0x284   : > { %v3722_v60 = vpop.eup %3721  ;;  %v1605_v34 = vadd.f32 %v3720_v27, %v3716_v5 }
 0x285   : > { %v3724_v30 = vpop.eup %3723 }
 0x286   : > { %v3726_v9 = vpop.eup %3725  ;;  %v1653_v36 = vpack.c.bf16 %v3724_v30, %v3720_v27  ;;  %v1608_v45 = vadd.f32 %v3724_v30, %v3718_v37  ;;  %v5723_v37 = vld [vmem:[#allocation70_spill] sm:$0xff]  ;;  %v1790_v27 = vld [vmem:[#allocation4] sm:$0xff] }
 0x287   : > { %v1656_v32 = vpack.c.bf16 %v3726_v9, %v3722_v60  ;;  %v3728_v23 = vpop.eup %3727 }
 0x288   : > { %v1611_v24 = vadd.f32 %v3728_v23, %v3722_v60 }
 0x289   : > { %2231 = vmatmul.mubr.bf16.gmra.mxu1 %v1651_v43 }
 0x28a   : > { %2238 = vmatprep.mubr.bf16.mxu1 %v1654_v21  ;;  %v3730_v40 = vpop.eup %3729 }
 0x28c   : > { %v3732_v14 = vpop.eup %3731 }
 0x28d   : > { %v3734_v51 = vpop.eup %3733  ;;  %v1655_v8 = vpack.c.bf16 %v3732_v14, %v3728_v23  ;;  %v1791_v23 = vld [vmem:[#allocation4 + $0x8] sm:$0xff] }
 0x28e   : > { %v1658_v42 = vpack.c.bf16 %v3734_v51, %v3730_v40  ;;  %v3736_v7 = vpop.eup %3735 }
 0x28f   : > { %v3738_v5 = vpop.eup %3737  ;;  %v1617_v61 = vadd.f32 %v3736_v7, %v3730_v40 }
 0x290   : > { %v1657_v59 = vpack.c.bf16 %v3738_v5, %v3736_v7 }
 0x291   : > { %2239 = vmatmul.mubr.bf16.gmra.mxu1 %v1653_v36 }
 0x292   : > { %2246 = vmatprep.mubr.bf16.mxu1 %v1656_v32 }
 0x295   : > { %1534 = vadd.xlane.f32.xlu0 %v4666_v22  ;;  %1606 = vadd.xlane.f32.xlu1 %v1605_v34  ;;  %v1614_v22 = vadd.f32 %v3732_v14, %v3726_v9 }
 0x299   : > { %2247 = vmatmul.mubr.bf16.gmra.mxu1 %v1655_v8  ;;  %1609 = vadd.xlane.f32.xlu0 %v1608_v45 }
 0x29a   : > { %1537 = vadd.xlane.f32.xlu1 %v4672_v52  ;;  %2254 = vmatprep.mubr.bf16.mxu1 %v1658_v42  ;;  %v1620_v52 = vadd.f32 %v3738_v5, %v3734_v51  ;;  %v1792_v5 = vld [vmem:[#allocation4 + $0x10] sm:$0xff] }
 0x29d   : > { %1540 = vadd.xlane.f32.xlu0 %v4676_v13 }
 0x29e   : > { %1612 = vadd.xlane.f32.xlu1 %v1611_v24 }
 0x2a1   : > { %2255 = vmatmul.mubr.bf16.gmra.mxu1 %v1657_v59  ;;  %1543 = vadd.xlane.f32.xlu0 %v4680_v4 }
 0x2a2   : > { %1546 = vadd.xlane.f32.xlu1 %v4684_v0 }
 0x2a5   : > { %1615 = vadd.xlane.f32.xlu0 %v1614_v22 }
 0x2a6   : > { %1618 = vadd.xlane.f32.xlu1 %v1617_v61 }
 0x2a9   : > { %1549 = vadd.xlane.f32.xlu0 %v4686_v33 }
 0x2aa   : > { %1552 = vadd.xlane.f32.xlu1 %v4690_v41 }
 0x2ad   : > { %1621 = vadd.xlane.f32.xlu0 %v1620_v52 }
 0x2b1   : > { %1555 = vadd.xlane.f32.xlu0 %v4694_v11 }
 0x2bc   : > { %v1339_v13 = vpop.permute.xlu1 %1338 }
 0x2bd   : > { %v1403_v12 = vsub.f32 %v5723_v37, %v1339_v13  ;;  %v1404_v43 = vsub.f32 %v5724_v48, %v1339_v13  ;;  %v1793_v37 = vld [vmem:[#allocation4 + $0x18] sm:$0xff] }
 0x2bf   : > { %v1529_v4 = vmul.f32 1.442695, %v1403_v12  ;;  %v1531_v21 = vmul.f32 1.442695, %v1404_v43 }
 0x2c0   : > { %v1825_v41 = vpop.permute.xlu1 %1824 }
 0x2c1   : > { %3739 = vpow2.f32 %v1529_v4  ;;  %v1982_v32 = vmul.f32 %v1825_v41, %v1790_v27 }
 0x2c2   : > { %3741 = vpow2.f32 %v1531_v21 }
 0x2c4   : > { %v1835_v45 = vpop.permute.xlu1 %1834 }
 0x2c5   : > { %v1984_v52 = vmul.f32 %v1835_v45, %v1792_v5 }
 0x2c8   : > { %v1840_v12 = vpop.permute.xlu1 %1839 }
 0x2c9   : > { %v1334_v0 = vpop.permute.xlu0 %1333 }
 0x2ca   : > { %v1401_v38 = vsub.f32 %v5725_v15, %v1334_v0  ;;  %v1402_v33 = vsub.f32 %v5726_v55, %v1334_v0  ;;  %v1985_v0 = vmul.f32 %v1840_v12, %v1793_v37  ;;  %v1794_v55 = vld [vmem:[#allocation4 + $0x20] sm:$0xff] }
 0x2cc   : > { %v1525_v60 = vmul.f32 1.442695, %v1401_v38  ;;  %v1527_v17 = vmul.f32 1.442695, %v1402_v33  ;;  %v3316_v30 = vpop.f32.mrf.mxu1 }
 0x2cd   : > { %v1830_v40 = vpop.permute.xlu0 %1829 }
 0x2ce   : > { %v3740_v11 = vpop.eup %3739  ;;  %3743 = vpow2.f32 %v1525_v60  ;;  %v3317_v9 = vpop.f32.mrf.mxu1  ;;  %v1983_v7 = vmul.f32 %v1830_v40, %v1791_v23 }
 0x2cf   : > { %v3742_v36 = vpop.eup %3741  ;;  %3745 = vpow2.f32 %v1527_v17  ;;  %v3318_v34 = vadd.f32 %v3317_v9, %v3316_v30 }
 0x2d0   : > { %v3319_v14 = vpop.f32.mrf.mxu1  ;;  %v1626_v51 = vadd.f32 %v3742_v36, %v3740_v11 }
 0x2d1   : > { %v2271_v8 = vadd.f32 %v3318_v34, %v1982_v32  ;;  %v1845_v33 = vpop.permute.xlu0 %1844  ;;  %v1795_v32 = vld [vmem:[#allocation4 + $0x28] sm:$0xff]  ;;  %v1850_v34 = vpop.permute.xlu1 %1849 }
 0x2d2   : > { %v3320_v42 = vpop.f32.mrf.mxu1  ;;  %1627 = vadd.xlane.f32.xlu0 %v1626_v51  ;;  %v1986_v9 = vmul.f32 %v1845_v33, %v1794_v55 }
 0x2d3   : > { %2304 = vst.msk [vmem:[#allocation4] sm:$0xff] %vm494_vm2, %v2271_v8  ;;  %v3321_v24 = vadd.f32 %v3320_v42, %v3319_v14 }
 0x2d4   : > { %v3322_v59 = vpop.f32.mrf.mxu1 }
 0x2d5   : > { %v2272_v22 = vadd.f32 %v3321_v24, %v1983_v7  ;;  %v1855_v51 = vpop.permute.xlu0 %1854  ;;  %v1860_v5 = vpop.permute.xlu1 %1859 }
 0x2d6   : > { %v3323_v61 = vpop.f32.mrf.mxu1  ;;  %1561 = vadd.xlane.f32.xlu0 %v4698_v63 }
 0x2d7   : > { %2305 = vst.msk [vmem:[#allocation4 + $0x8] sm:$0xff] %vm494_vm2, %v2272_v22  ;;  %v3324_v13 = vadd.f32 %v3323_v61, %v3322_v59 }
 0x2d8   : > { %v3325_v48 = vpop.f32.mrf.mxu1 }
 0x2d9   : > { %v2273_v43 = vadd.f32 %v3324_v13, %v1984_v52  ;;  %v1865_v13 = vpop.permute.xlu0 %1864 }
 0x2da   : > { %v3326_v4 = vpop.f32.mrf.mxu1  ;;  %1567 = vadd.xlane.f32.xlu0 %v4702_v56 }
 0x2db   : > { %v3744_v21 = vpop.eup %3743  ;;  %2306 = vst.msk [vmem:[#allocation4 + $0x10] sm:$0xff] %vm494_vm2, %v2273_v43  ;;  %v3327_v15 = vadd.f32 %v3326_v4, %v3325_v48  ;;  %v1870_v4 = vpop.permute.xlu1 %1869 }
 0x2dc   : > { %v3746_v38 = vpop.eup %3745  ;;  %v3328_v63 = vpop.f32.mrf.mxu1  ;;  %v1659_v27 = vpack.c.bf16 %v3740_v11, %v3744_v21  ;;  %v1987_v11 = vmul.f32 %v1850_v34, %v1795_v32  ;;  %v5730_v34 = vld [vmem:[#allocation49_spill] sm:$0xff] }
 0x2dd   : > { %v2274_v41 = vadd.f32 %v3327_v15, %v1985_v0  ;;  %v1660_v60 = vpack.c.bf16 %v3742_v36, %v3746_v38  ;;  %v1623_v17 = vadd.f32 %v3746_v38, %v3744_v21  ;;  %v1875_v55 = vpop.permute.xlu0 %1874 }
 0x2de   : > { %v3329_v30 = vpop.f32.mrf.mxu1  ;;  %1573 = vadd.xlane.f32.xlu0 %v4922_v46  ;;  %v1796_v46 = vld [vmem:[#allocation4 + $0x30] sm:$0xff] }
 0x2df   : > { %2307 = vst.msk [vmem:[#allocation4 + $0x18] sm:$0xff] %vm494_vm2, %v2274_v41  ;;  %v3330_v56 = vadd.f32 %v3329_v30, %v3328_v63  ;;  %2262 = vmatprep.mubr.bf16.mxu1 %v1660_v60  ;;  %1624 = vadd.xlane.f32.xlu1 %v1623_v17  ;;  %v1988_v7 = vmul.f32 %v1855_v51, %v1796_v46  ;;  %v5728_v41 = vld [vmem:[#allocation77_spill] sm:$0xff] }
 0x2e0   : > { %v3331_v23 = vpop.f32.mrf.mxu1  ;;  %2263 = vmatmul.mubr.bf16.gmra.mxu1 %v1659_v27  ;;  %v5727_v27 = vld [vmem:[#allocation46_spill] sm:$0xff]  ;;  %v5729_v60 = vsub.f32 %v4616_v58, %v5728_v41  ;;  %v5732_v46 = vld [vmem:[#allocation45_spill] sm:$0xff] }
 0x2e1   : > { %v2275_v40 = vadd.f32 %v3330_v56, %v1986_v9  ;;  %v1801_v56 = vld [vmem:[#allocation4 + $0x58] sm:$0xff] }
 0x2e2   : > { %v3332_v14 = vpop.f32.mrf.mxu1  ;;  %1579 = vadd.xlane.f32.xlu0 %v4943_v1  ;;  %v1797_v1 = vld [vmem:[#allocation4 + $0x38] sm:$0xff]  ;;  %v1161_v17 = vmul.f32 1.442695, %v5729_v60 }
 0x2e3   : > { %2308 = vst.msk [vmem:[#allocation4 + $0x20] sm:$0xff] %vm494_vm2, %v2275_v40  ;;  %v3333_v36 = vadd.f32 %v3332_v14, %v3331_v23  ;;  %1558 = vadd.xlane.f32.xlu1 %v4696_v28  ;;  %v1989_v28 = vmul.f32 %v1860_v5, %v1797_v1  ;;  %v1111_v23 = vsub.f32 %v5730_v34, %v4401_v29  ;;  %v5735_v29 = vld [vmem:[#allocation78_spill] sm:$0xff] }
 0x2e4   : > { %v3334_v8 = vpop.f32.mrf.mxu1  ;;  %3747 = vpow2.f32 %v1161_v17  ;;  %v1685_v17 = vld [vmem:[#allocation3 + $0xc0] sm:$0xff]  ;;  %v1686_v34 = vld [vmem:[#allocation3 + $0xc8] sm:$0xff] }
 0x2e5   : > { %v2276_v45 = vadd.f32 %v3333_v36, %v1987_v11  ;;  %v5731_v36 = vld [vmem:[#allocation47_spill] sm:$0xff] }
 0x2e6   : > { %v3335_v42 = vpop.f32.mrf.mxu1  ;;  %1585 = vadd.xlane.f32.xlu0 %v4953_v25  ;;  %v1798_v25 = vld [vmem:[#allocation4 + $0x40] sm:$0xff]  ;;  %v1110_v51 = vsub.f32 %v5732_v46, %v5731_v36 }
 0x2e7   : > { %2309 = vst.msk [vmem:[#allocation4 + $0x28] sm:$0xff] %vm494_vm2, %v2276_v45  ;;  %v3336_v24 = vadd.f32 %v3335_v42, %v3334_v8  ;;  %1564 = vadd.xlane.f32.xlu1 %v4700_v54  ;;  %v1990_v54 = vmul.f32 %v1865_v13, %v1798_v25  ;;  %v5733_v45 = vld [vmem:[#allocation52_spill] sm:$0xff]  ;;  %v5734_v42 = vld [vmem:[#allocation51_spill] sm:$0xff]  ;;  %v5054_v25 = vpop.permute.xlu0 %1884 }
 0x2e8   : > { %v3337_v59 = vpop.f32.mrf.mxu1 }
 0x2e9   : > { %v2277_v22 = vadd.f32 %v3336_v24, %v1988_v7  ;;  %v1113_v7 = vsub.f32 %v5734_v42, %v5733_v45  ;;  %v5736_v24 = vld [vmem:[#allocation79_spill] sm:$0xff] }
 0x2ea   : > { %v3338_v61 = vpop.f32.mrf.mxu1  ;;  %1591 = vadd.xlane.f32.xlu0 %v4973_v62  ;;  %v1799_v62 = vld [vmem:[#allocation4 + $0x48] sm:$0xff]  ;;  %v5737_v1 = vsub.f32 %v5735_v29, %v5736_v24  ;;  %v1687_v42 = vld [vmem:[#allocation3 + $0xd0] sm:$0xff] }
 0x2eb   : > { %2310 = vst.msk [vmem:[#allocation4 + $0x30] sm:$0xff] %vm494_vm2, %v2277_v22  ;;  %v3339_v52 = vadd.f32 %v3338_v61, %v3337_v59  ;;  %1570 = vadd.xlane.f32.xlu1 %v4902_v3  ;;  %v1991_v3 = vmul.f32 %v1870_v4, %v1799_v62  ;;  %v1167_v59 = vmul.f32 1.442695, %v1110_v51  ;;  %v5738_v22 = vld [vmem:[#allocation50_spill] sm:$0xff]  ;;  %v5065_v4 = vpop.permute.xlu0 %1894  ;;  %v1663_v51 = vld [vmem:[#allocation3 + $0x10] sm:$0xff] }
 0x2ec   : > { %v3340_v37 = vpop.f32.mrf.mxu1  ;;  %v1163_v5 = vmul.f32 1.442695, %v5737_v1  ;;  %v1803_v1 = vld [vmem:[#allocation4 + $0x68] sm:$0xff] }
 0x2ed   : > { %v2278_v12 = vadd.f32 %v3339_v52, %v1989_v28  ;;  %v1173_v28 = vmul.f32 1.442695, %v1113_v7 }
 0x2ee   : > { %v3341_v48 = vpop.f32.mrf.mxu1  ;;  %1597 = vadd.xlane.f32.xlu0 %v4947_v53  ;;  %v1800_v53 = vld [vmem:[#allocation4 + $0x50] sm:$0xff] }
 0x2ef   : > { %2311 = vst.msk [vmem:[#allocation4 + $0x38] sm:$0xff] %vm494_vm2, %v2278_v12  ;;  %v3342_v43 = vadd.f32 %v3341_v48, %v3340_v37  ;;  %1576 = vadd.xlane.f32.xlu1 %v4929_v44  ;;  %v1109_v44 = vsub.f32 %v5727_v27, %v4364_v26  ;;  %v1992_v9 = vmul.f32 %v1875_v55, %v1800_v53  ;;  %v5740_v37 = vld [vmem:[#allocation54_spill] sm:$0xff]  ;;  %v5741_v12 = vld [vmem:[#allocation53_spill] sm:$0xff] }
 0x2f0   : > { %v3343_v21 = vpop.f32.mrf.mxu1  ;;  %v1114_v48 = vsub.f32 %v5741_v12, %v5740_v37  ;;  %v1665_v12 = vld [vmem:[#allocation3 + $0x20] sm:$0xff] }
 0x2f1   : > { %v2279_v0 = vadd.f32 %v3342_v43, %v1990_v54  ;;  %v1165_v14 = vmul.f32 1.442695, %v1109_v44  ;;  %v5061_v43 = vpop.eup %3747  ;;  %v3571_v44 = vld [vmem:[%s5462_s4 + $0x18] sm:$0xff]  }
 0x2f2   : > { %v3344_v15 = vpop.f32.mrf.mxu1  ;;  %1603 = vadd.xlane.f32.xlu0 %v4959_v35  ;;  %3432 = vmatprep.subr.bf16.mxu0 %v3571_v44 }
 0x2f3   : > { %2312 = vst.msk [vmem:[#allocation4 + $0x40] sm:$0xff] %vm494_vm2, %v2279_v0  ;;  %v3345_v38 = vadd.f32 %v3344_v15, %v3343_v21  ;;  %1582 = vadd.xlane.f32.xlu1 %v4933_v16  ;;  %v1880_v16 = vpop.permute.xlu1 %1879  ;;  %3749 = vpow2.f32 %v1165_v14  ;;  %v1175_v21 = vmul.f32 1.442695, %v1114_v48  ;;  %3433 = vmatpush3.bf16.msra.mxu0 %v3571_v44 }
 0x2f4   : > { %v3346_v33 = vpop.f32.mrf.mxu1  ;;  %v1993_v11 = vmul.f32 %v1880_v16, %v1801_v56 }
 0x2f5   : > { %v2280_v63 = vadd.f32 %v3345_v38, %v1991_v3  ;;  %v5743_v3 = vsub.f32 %v4719_v6, %v4795_v47  ;;  %v5073_v38 = vpop.permute.xlu0 %1904 }
 0x2f6   : > { %v3347_v30 = vpop.f32.mrf.mxu1 }
 0x2f7   : > { %2313 = vst.msk [vmem:[#allocation4 + $0x48] sm:$0xff] %vm494_vm2, %v2280_v63  ;;  %v3348_v35 = vadd.f32 %v3347_v30, %v3346_v33  ;;  %1588 = vadd.xlane.f32.xlu1 %v4965_v50  ;;  %v1169_v50 = vmul.f32 1.442695, %v1111_v23  ;;  %v5052_v52 = vpop.permute.xlu1 %1889  ;;  %v1661_v30 = vld [vmem:[#allocation3] sm:$0xff] }
 0x2f8   : > { %v3349_v32 = vpop.f32.mrf.mxu1  ;;  %v1693_v56 = vmul.f32 %v4814_v20, %v1661_v30  ;;  %v1689_v30 = vld [vmem:[#allocation3 + $0xe0] sm:$0xff] }
 0x2f9   : > { %v2281_v40 = vadd.f32 %v3348_v35, %v1992_v9  ;;  %3751 = vpow2.f32 %v1169_v50  ;;  %v5082_v27 = vpop.permute.xlu0 %1914 }
 0x2fa   : > { %v3350_v26 = vpop.f32.mrf.mxu1  ;;  %3753 = vpow2.f32 %v1163_v5 }
 0x2fb   : > { %2314 = vst.msk [vmem:[#allocation4 + $0x50] sm:$0xff] %vm494_vm2, %v2281_v40  ;;  %v3351_v58 = vadd.f32 %v3350_v26, %v3349_v32  ;;  %1594 = vadd.xlane.f32.xlu1 %v4978_v2  ;;  %v5739_v2 = vld [vmem:[#allocation48_spill] sm:$0xff]  ;;  %3755 = vpow2.f32 %v1167_v59  ;;  %v5063_v62 = vpop.permute.xlu1 %1899  ;;  %v1662_v26 = vld [vmem:[#allocation3 + $0x8] sm:$0xff]  ;;  %v1695_v59 = vmul.f32 %v4828_v18, %v1663_v51 }
 0x2fc   : > { %v1112_v61 = vsub.f32 %v5739_v2, %v5738_v22  ;;  %3757 = vpow2.f32 %v1173_v28  ;;  %v1694_v46 = vmul.f32 %v4839_v39, %v1662_v26 }
 0x2fd   : > { %v2282_v8 = vadd.f32 %v3351_v58, %v1993_v11  ;;  %v5096_v60 = vpop.permute.xlu0 %1924  ;;  %v1802_v11 = vld [vmem:[#allocation4 + $0x60] sm:$0xff] }
 0x2fe   : > { %v1171_v13 = vmul.f32 1.442695, %v1112_v61  ;;  %v1994_v7 = vmul.f32 %v5054_v25, %v1802_v11  ;;  %v1664_v61 = vld [vmem:[#allocation3 + $0x18] sm:$0xff]  ;;  %v1995_v25 = vmul.f32 %v5052_v52, %v1803_v1  ;;  %v1666_v11 = vld [vmem:[#allocation3 + $0x28] sm:$0xff] }
 0x2ff   : > { %2315 = vst.msk [vmem:[#allocation4 + $0x58] sm:$0xff] %vm494_vm2, %v2282_v8  ;;  %1600 = vadd.xlane.f32.xlu1 %v4985_v57  ;;  %v5742_v57 = vsub.f32 %v4834_v10, %v4846_v19  ;;  %v1179_v10 = vmul.f32 1.442695, %v5743_v3  ;;  %v5071_v19 = vpop.permute.xlu1 %1909  ;;  %v1697_v3 = vmul.f32 %v4848_v31, %v1665_v12  ;;  %v3572_v31 = vld [vmem:[%s5462_s4 + $0x10] sm:$0xff]  }
 0x300   : > { %3759 = vpow2.f32 %v1171_v13  ;;  %v3750_v0 = vpop.eup %3749  ;;  %3434 = vmatprep.subr.bf16.mxu0 %v3572_v31 }
 0x301   : > { %v1177_v54 = vmul.f32 1.442695, %v5742_v57  ;;  %v1717_v35 = vmul.f32 %v3750_v0, %v1685_v17  ;;  %3435 = vmatpush3.bf16.msra.mxu0 %v3572_v31 }
 0x303   : > { %3761 = vpow2.f32 %v1177_v54  ;;  %v5080_v63 = vpop.permute.xlu1 %1919 }
 0x304   : > { %3763 = vpow2.f32 %v1175_v21  ;;  %v1804_v21 = vld [vmem:[#allocation4 + $0x70] sm:$0xff] }
 0x305   : > { %3765 = vpow2.f32 %v1179_v10 }
 0x306   : > { %v3752_v15 = vpop.eup %3751 }
 0x307   : > { %v5075_v53 = vpop.eup %3753  ;;  %v5094_v41 = vpop.permute.xlu1 %1929  ;;  %v1719_v39 = vmul.f32 %v3752_v15, %v1687_v42  ;;  %v5744_v42 = vld [vmem:[#allocation55_spill] sm:$0xff] }
 0x308   : > { %1934 = vperm.xlu0 %3534, %v5061_v43   ;;  %v3756_v55 = vpop.eup %3755 }
 0x309   : > { %v5078_v33 = vpop.eup %3757  ;;  %v1718_v36 = vmul.f32 %v3756_v55, %v1686_v34 }
 0x30c   : > { %1944 = vperm.xlu0 %3534, %v3750_v0   ;;  %v1696_v0 = vmul.f32 %v4843_v49, %v1664_v61 }
 0x30d   : > { %v5085_v6 = vpop.eup %3759 }
 0x310   : > { %1954 = vperm.xlu0 %3534, %v3752_v15   ;;  %1939 = vperm.xlu1 %3535, %v5075_v53   ;;  %v5087_v47 = vpop.eup %3761 }
 0x311   : > { %v5098_v9 = vpop.eup %3763 }
 0x312   : > { %v5102_v23 = vpop.eup %3765 }
 0x314   : > { %1964 = vperm.xlu0 %3534, %v5078_v33   ;;  %1949 = vperm.xlu1 %3535, %v3756_v55   ;;  %v1688_v55 = vld [vmem:[#allocation3 + $0xd8] sm:$0xff] }
 0x318   : > { %1974 = vperm.xlu0 %3534, %v5087_v47   ;;  %1959 = vperm.xlu1 %3535, %v5085_v6  }
 0x31c   : > { %1969 = vperm.xlu1 %3535, %v5098_v9  }
 0x31e   : > { %v1607_v16 = vpop.xlane.xlu1 %1606  ;;  %v1535_v32 = vpop.xlane.xlu0 %1534 }
 0x31f   : > { %v1749_v40 = vadd.f32 %v1717_v35, %v1607_v16  ;;  %v1725_v14 = vadd.f32 %v1693_v56, %v1535_v32  ;;  %v1996_v35 = vmul.f32 %v5065_v4, %v1804_v21  ;;  %v1805_v32 = vld [vmem:[#allocation4 + $0x78] sm:$0xff]  ;;  %v1721_v4 = vmul.f32 %v5078_v33, %v1689_v30 }
 0x320   : > { %1979 = vperm.xlu1 %3535, %v5102_v23   ;;  %v1997_v51 = vmul.f32 %v5063_v62, %v1805_v32  ;;  %v1690_v62 = vld [vmem:[#allocation3 + $0xe8] sm:$0xff]  ;;  %v1668_v21 = vld [vmem:[#allocation3 + $0x38] sm:$0xff] }
 0x321   : > { %1782 = vst.msk [vmem:[#allocation3 + $0xc0] sm:$0xff] %vm429_vm1, %v1749_v40  ;;  %1758 = vst.msk [vmem:[#allocation3] sm:$0xff] %vm429_vm1, %v1725_v14  ;;  %v3352_v58 = vpop.f32.mrf.mxu1  ;;  %v1720_v40 = vmul.f32 %v5085_v6, %v1688_v55 }
 0x322   : > { %v1610_v20 = vpop.xlane.xlu0 %1609 }
 0x323   : > { %v3353_v50 = vpop.f32.mrf.mxu1  ;;  %v1538_v8 = vpop.xlane.xlu1 %1537  ;;  %v1750_v45 = vadd.f32 %v1718_v36, %v1610_v20  ;;  %v1667_v20 = vld [vmem:[#allocation3 + $0x30] sm:$0xff] }
 0x324   : > { %v3354_v29 = vadd.f32 %v3353_v50, %v3352_v58  ;;  %v1726_v24 = vadd.f32 %v1694_v46, %v1538_v8 }
 0x325   : > { %1783 = vst.msk [vmem:[#allocation3 + $0xc8] sm:$0xff] %vm429_vm1, %v1750_v45  ;;  %v3355_v5 = vpop.f32.mrf.mxu1  ;;  %v1806_v45 = vld [vmem:[#allocation4 + $0x80] sm:$0xff] }
 0x326   : > { %v2283_v22 = vadd.f32 %v3354_v29, %v1994_v7  ;;  %1759 = vst.msk [vmem:[#allocation3 + $0x8] sm:$0xff] %vm429_vm1, %v1726_v24  ;;  %v1541_v2 = vpop.xlane.xlu0 %1540  ;;  %v1698_v7 = vmul.f32 %v5744_v42, %v1666_v11  ;;  %v5745_v24 = vld [vmem:[#allocation56_spill] sm:$0xff] }
 0x327   : > { %v3356_v28 = vpop.f32.mrf.mxu1  ;;  %v1613_v13 = vpop.xlane.xlu1 %1612  ;;  %v1727_v37 = vadd.f32 %v1695_v59, %v1541_v2  ;;  %v1699_v1 = vmul.f32 %v5745_v24, %v1667_v20  ;;  %v1998_v2 = vmul.f32 %v5073_v38, %v1806_v45 }
 0x328   : > { %v2371_v48 = vld [vmem:[#allocation3] sm:$0xff]  ;;  %2316 = vst.msk [vmem:[#allocation4 + $0x60] sm:$0xff] %vm494_vm2, %v2283_v22  ;;  %v3357_v57 = vadd.f32 %v3356_v28, %v3355_v5  ;;  %v1751_v54 = vadd.f32 %v1719_v39, %v1613_v13 }
 0x329   : > { %1760 = vst.msk [vmem:[#allocation3 + $0x10] sm:$0xff] %vm429_vm1, %v1727_v37  ;;  %v3358_v18 = vpop.f32.mrf.mxu1  ;;  %3767 = vrcp.f32 %v2371_v48  ;;  %v1807_v37 = vld [vmem:[#allocation4 + $0x88] sm:$0xff]  ;;  %v1722_v48 = vmul.f32 %v5098_v9, %v1690_v62  ;;  %v5746_v9 = vld [vmem:[#allocation57_spill] sm:$0xff] }
 0x32a   : > { %v2284_v15 = vadd.f32 %v3357_v57, %v1995_v25  ;;  %1784 = vst.msk [vmem:[#allocation3 + $0xd0] sm:$0xff] %vm429_vm1, %v1751_v54  ;;  %v1544_v10 = vpop.xlane.xlu0 %1543 }
 0x32b   : > { %v3359_v52 = vpop.f32.mrf.mxu1  ;;  %v1547_v44 = vpop.xlane.xlu1 %1546  ;;  %v1728_v17 = vadd.f32 %v1696_v0, %v1544_v10  ;;  %v1808_v10 = vld [vmem:[#allocation4 + $0x90] sm:$0xff] }
 0x32c   : > { %2317 = vst.msk [vmem:[#allocation4 + $0x68] sm:$0xff] %vm494_vm2, %v2284_v15  ;;  %v3360_v56 = vadd.f32 %v3359_v52, %v3358_v18  ;;  %v1729_v16 = vadd.f32 %v1697_v3, %v1547_v44  ;;  %v1999_v15 = vmul.f32 %v5071_v19, %v1807_v37  ;;  %v1700_v52 = vmul.f32 %v5746_v9, %v1668_v21  ;;  %v5747_v37 = vld [vmem:[#allocation59_spill] sm:$0xff]  ;;  %v5748_v21 = vld [vmem:[#allocation61_spill] sm:$0xff] }
 0x32d   : > { %v2372_v49 = vld [vmem:[#allocation3 + $0x8] sm:$0xff]  ;;  %1761 = vst.msk [vmem:[#allocation3 + $0x18] sm:$0xff] %vm429_vm1, %v1728_v17  ;;  %v3361_v34 = vpop.f32.mrf.mxu1  ;;  %v2000_v19 = vmul.f32 %v5082_v27, %v1808_v10  ;;  %v5749_v10 = vld [vmem:[#allocation63_spill] sm:$0xff] }
 0x32e   : > { %3769 = vrcp.f32 %v2372_v49  ;;  %v2285_v14 = vadd.f32 %v3360_v56, %v1996_v35  ;;  %1762 = vst.msk [vmem:[#allocation3 + $0x20] sm:$0xff] %vm429_vm1, %v1729_v16  ;;  %v1616_v26 = vpop.xlane.xlu0 %1615  ;;  %v3573_v16 = vld [vmem:[%s5462_s4 + $0x8] sm:$0xff]  }
 0x32f   : > { %v3362_v58 = vpop.f32.mrf.mxu1  ;;  %v1619_v36 = vpop.xlane.xlu1 %1618  ;;  %v1752_v46 = vadd.f32 %v1720_v40, %v1616_v26  ;;  %3436 = vmatprep.subr.bf16.mxu0 %v3573_v16 }
 0x330   : > { %v2373_v6 = vld [vmem:[#allocation3 + $0x10] sm:$0xff]  ;;  %2318 = vst.msk [vmem:[#allocation4 + $0x70] sm:$0xff] %vm494_vm2, %v2285_v14  ;;  %v3363_v50 = vadd.f32 %v3362_v58, %v3361_v34  ;;  %v1753_v8 = vadd.f32 %v1721_v4, %v1619_v36  ;;  %v1809_v34 = vld [vmem:[#allocation4 + $0x98] sm:$0xff]  ;;  %3437 = vmatpush3.bf16.msra.mxu0 %v3573_v16  ;;  %v3574_v58 = vld [vmem:[%s5462_s4] sm:$0xff]  }
 0x331   : > { %3771 = vrcp.f32 %v2373_v6  ;;  %1785 = vst.msk [vmem:[#allocation3 + $0xd8] sm:$0xff] %vm429_vm1, %v1752_v46  ;;  %v3364_v33 = vpop.f32.mrf.mxu1  ;;  %v2001_v27 = vmul.f32 %v5080_v63, %v1809_v34  ;;  %v1810_v36 = vld [vmem:[#allocation4 + $0xa0] sm:$0xff]  ;;  %3438 = vmatprep.subr.bf16.mxu0 %v3574_v58 }
 0x332   : > { %v2286_v29 = vadd.f32 %v3363_v50, %v1997_v51  ;;  %1786 = vst.msk [vmem:[#allocation3 + $0xe0] sm:$0xff] %vm429_vm1, %v1753_v8  ;;  %v1550_v5 = vpop.xlane.xlu0 %1549  ;;  %v2002_v8 = vmul.f32 %v5096_v60, %v1810_v36  ;;  %v5752_v36 = vld [vmem:[#allocation21_spill] sm:$0xff] }
 0x333   : > { %v3365_v59 = vpop.f32.mrf.mxu1  ;;  %v1553_v22 = vpop.xlane.xlu1 %1552  ;;  %v1730_v39 = vadd.f32 %v1698_v7, %v1550_v5 }
 0x334   : > { %v2374_v61 = vld [vmem:[#allocation3 + $0x18] sm:$0xff]  ;;  %2319 = vst.msk [vmem:[#allocation4 + $0x78] sm:$0xff] %vm494_vm2, %v2286_v29  ;;  %v3366_v28 = vadd.f32 %v3365_v59, %v3364_v33  ;;  %v1731_v13 = vadd.f32 %v1699_v1, %v1553_v22  ;;  %3439 = vmatpush3.bf16.msra.mxu0 %v3574_v58  ;;  %v1811_v33 = vld [vmem:[#allocation4 + $0xa8] sm:$0xff] }
 0x335   : > { %v2375_v12 = vld [vmem:[#allocation3 + $0x20] sm:$0xff]  ;;  %3773 = vrcp.f32 %v2374_v61  ;;  %1763 = vst.msk [vmem:[#allocation3 + $0x28] sm:$0xff] %vm429_vm1, %v1730_v39  ;;  %v3367_v25 = vpop.f32.mrf.mxu1  ;;  %v2003_v24 = vmul.f32 %v5094_v41, %v1811_v33  ;;  %v1692_v22 = vld [vmem:[#allocation3 + $0xf8] sm:$0xff] }
 0x336   : > { %3775 = vrcp.f32 %v2375_v12  ;;  %v2287_v57 = vadd.f32 %v3366_v28, %v1998_v2  ;;  %1764 = vst.msk [vmem:[#allocation3 + $0x30] sm:$0xff] %vm429_vm1, %v1731_v13  ;;  %v1622_v54 = vpop.xlane.xlu0 %1621  ;;  %v3768_v38 = vpop.eup %3767  ;;  %v1724_v2 = vmul.f32 %v5102_v23, %v1692_v22  ;;  %v1670_v28 = vld [vmem:[#allocation3 + $0x48] sm:$0xff] }
 0x337   : > { %v3368_v18 = vpop.f32.mrf.mxu1  ;;  %v1754_v0 = vadd.f32 %v1722_v48, %v1622_v54  ;;  %2469 = vperm.xlu0 %3534, %v3768_v38   ;;  %v1702_v12 = vmul.f32 %v5747_v37, %v1670_v28  ;;  %v1672_v48 = vld [vmem:[#allocation3 + $0x58] sm:$0xff]  ;;  %v1674_v23 = vld [vmem:[#allocation3 + $0x68] sm:$0xff] }
 0x338   : > { %2320 = vst.msk [vmem:[#allocation4 + $0x80] sm:$0xff] %vm494_vm2, %v2287_v57  ;;  %v3369_v3 = vadd.f32 %v3368_v18, %v3367_v25  ;;  %v1704_v38 = vmul.f32 %v5748_v21, %v1672_v48  ;;  %v5757_v21 = vld [vmem:[#allocation64_spill] sm:$0xff] }
 0x339   : > { %1787 = vst.msk [vmem:[#allocation3 + $0xe8] sm:$0xff] %vm429_vm1, %v1754_v0  ;;  %v3370_v55 = vpop.f32.mrf.mxu1 }
 0x33a   : > { %v2288_v44 = vadd.f32 %v3369_v3, %v1999_v15  ;;  %v1556_v17 = vpop.xlane.xlu0 %1555  ;;  %v1691_v15 = vld [vmem:[#allocation3 + $0xf0] sm:$0xff] }
 0x33b   : > { %v3770_v30 = vpop.eup %3769  ;;  %v3371_v35 = vpop.f32.mrf.mxu1  ;;  %v1732_v56 = vadd.f32 %v1700_v52, %v1556_v17  ;;  %v1723_v52 = vmul.f32 %v5087_v47, %v1691_v15  ;;  %v1677_v15 = vld [vmem:[#allocation3 + $0x80] sm:$0xff] }
 0x33c   : > { %v2376_v32 = vld [vmem:[#allocation3 + $0x28] sm:$0xff]  ;;  %2321 = vst.msk [vmem:[#allocation4 + $0x88] sm:$0xff] %vm494_vm2, %v2288_v44  ;;  %v3372_v49 = vadd.f32 %v3371_v35, %v3370_v55  ;;  %2474 = vperm.xlu1 %3535, %v3770_v30   ;;  %v1706_v55 = vmul.f32 %v5749_v10, %v1674_v23  ;;  %v1676_v44 = vld [vmem:[#allocation3 + $0x78] sm:$0xff]  ;;  %v1669_v35 = vld [vmem:[#allocation3 + $0x40] sm:$0xff] }
 0x33d   : > { %v2377_v40 = vld [vmem:[#allocation3 + $0x30] sm:$0xff]  ;;  %3777 = vrcp.f32 %v2376_v32  ;;  %1765 = vst.msk [vmem:[#allocation3 + $0x38] sm:$0xff] %vm429_vm1, %v1732_v56  ;;  %v3373_v31 = vpop.f32.mrf.mxu1  ;;  %v5750_v32 = vld [vmem:[#allocation65_spill] sm:$0xff] }
 0x33e   : > { %v3772_v14 = vpop.eup %3771  ;;  %3779 = vrcp.f32 %v2377_v40  ;;  %v2289_v4 = vadd.f32 %v3372_v49, %v2000_v19  ;;  %v1708_v49 = vmul.f32 %v5750_v32, %v1676_v44  ;;  %v5751_v40 = vld [vmem:[#allocation58_spill] sm:$0xff] }
 0x33f   : > { %v3374_v26 = vpop.f32.mrf.mxu1  ;;  %2479 = vperm.xlu0 %3534, %v3772_v14   ;;  %v1678_v14 = vld [vmem:[#allocation3 + $0x88] sm:$0xff] }
 0x340   : > { %2322 = vst.msk [vmem:[#allocation4 + $0x90] sm:$0xff] %vm494_vm2, %v2289_v4  ;;  %v3375_v11 = vadd.f32 %v3374_v26, %v3373_v31  ;;  %v1701_v31 = vmul.f32 %v5751_v40, %v1669_v35  ;;  %v1671_v26 = vld [vmem:[#allocation3 + $0x50] sm:$0xff] }
 0x341   : > { %v3376_v46 = vpop.f32.mrf.mxu1  ;;  %v5758_v35 = vld [vmem:[#allocation67_spill] sm:$0xff] }
 0x342   : > { %v3774_v20 = vpop.eup %3773  ;;  %v2290_v51 = vadd.f32 %v3375_v11, %v2001_v27 }
 0x343   : > { %v3776_v6 = vpop.eup %3775  ;;  %v3377_v50 = vpop.f32.mrf.mxu1  ;;  %2484 = vperm.xlu1 %3535, %v3774_v20  }
 0x344   : > { %v2378_v45 = vld [vmem:[#allocation3 + $0x38] sm:$0xff]  ;;  %2323 = vst.msk [vmem:[#allocation4 + $0x98] sm:$0xff] %vm494_vm2, %v2290_v51  ;;  %v3378_v63 = vadd.f32 %v3377_v50, %v3376_v46  ;;  %2489 = vperm.xlu0 %3534, %v3776_v6   ;;  %v1710_v46 = vmul.f32 %v5752_v36, %v1678_v14 }
 0x345   : > { %3781 = vrcp.f32 %v2378_v45  ;;  %v3379_v42 = vpop.f32.mrf.mxu1  ;;  %v5753_v51 = vld [vmem:[#allocation60_spill] sm:$0xff] }
 0x346   : > { %v2291_v7 = vadd.f32 %v3378_v63, %v2002_v8  ;;  %v1703_v6 = vmul.f32 %v5753_v51, %v1671_v26  ;;  %v1680_v50 = vld [vmem:[#allocation3 + $0x98] sm:$0xff]  ;;  %v1673_v63 = vld [vmem:[#allocation3 + $0x60] sm:$0xff] }
 0x347   : > { %v3380_v29 = vpop.f32.mrf.mxu1 }
 0x348   : > { %2324 = vst.msk [vmem:[#allocation4 + $0xa0] sm:$0xff] %vm494_vm2, %v2291_v7  ;;  %v3381_v1 = vadd.f32 %v3380_v29, %v3379_v42  ;;  %v5754_v29 = vld [vmem:[#allocation22_spill] sm:$0xff] }
 0x349   : > { %v5158_v39 = vpop.f32.mrf.mxu1 }
 0x34a   : > { %v3778_v5 = vpop.eup %3777  ;;  %v2292_v62 = vadd.f32 %v3381_v1, %v2003_v24  ;;  %v1712_v24 = vmul.f32 %v5754_v29, %v1680_v50 }
 0x34b   : > { %v3780_v59 = vpop.eup %3779  ;;  %2494 = vperm.xlu1 %3535, %v3778_v5   ;;  %v5161_v13 = vpop.f32.mrf.mxu1  ;;  %v5755_v5 = vld [vmem:[#allocation62_spill] sm:$0xff] }
 0x34c   : > { %2325 = vst.msk [vmem:[#allocation4 + $0xa8] sm:$0xff] %vm494_vm2, %v2292_v62  ;;  %2499 = vperm.xlu0 %3534, %v3780_v59   ;;  %v1705_v62 = vmul.f32 %v5755_v5, %v1673_v63  ;;  %v1682_v59 = vld [vmem:[#allocation3 + $0xa8] sm:$0xff] }
 0x34d   : > { %v5165_v54 = vpop.f32.mrf.mxu1 }
 0x34f   : > { %v5169_v3 = vpop.f32.mrf.mxu1 }
 0x351   : > { %v5174_v56 = vpop.f32.mrf.mxu1 }
 0x352   : > { %v3782_v60 = vpop.eup %3781 }
 0x353   : > { %2504 = vperm.xlu1 %3535, %v3782_v60   ;;  %v5180_v27 = vpop.f32.mrf.mxu1 }
 0x355   : > { %v5186_v33 = vpop.f32.mrf.mxu1 }
 0x35b   : > { %v1628_v61 = vpop.xlane.xlu0 %1627 }
 0x35c   : > { %v1756_v41 = vadd.f32 %v1724_v2, %v1628_v61  ;;  %v1675_v2 = vld [vmem:[#allocation3 + $0x70] sm:$0xff]  ;;  %v5192_v61 = vpop.f32.mrf.mxu1 }
 0x35e   : > { %1789 = vst.msk [vmem:[#allocation3 + $0xf8] sm:$0xff] %vm429_vm1, %v1756_v41  ;;  %v5198_v10 = vpop.f32.mrf.mxu1 }
 0x35f   : > { %v1562_v25 = vpop.xlane.xlu0 %1561 }
 0x360   : > { %v1734_v57 = vadd.f32 %v1702_v12, %v1562_v25  ;;  %v5756_v12 = vld [vmem:[#allocation71_spill] sm:$0xff] }
 0x361   : > { %v1714_v25 = vmul.f32 %v5756_v12, %v1682_v59  ;;  %v1814_v59 = vld [vmem:[#allocation4 + $0xc0] sm:$0xff] }
 0x362   : > { %1767 = vst.msk [vmem:[#allocation3 + $0x48] sm:$0xff] %vm429_vm1, %v1734_v57 }
 0x363   : > { %v1568_v18 = vpop.xlane.xlu0 %1567 }
 0x364   : > { %v1736_v0 = vadd.f32 %v1704_v38, %v1568_v18  ;;  %v1707_v38 = vmul.f32 %v5757_v21, %v1675_v2  ;;  %v1684_v18 = vld [vmem:[#allocation3 + $0xb8] sm:$0xff]  ;;  %v1816_v21 = vld [vmem:[#allocation4 + $0xd0] sm:$0xff] }
 0x365   : > { %v1716_v44 = vmul.f32 %v5075_v53, %v1684_v18 }
 0x366   : > { %1769 = vst.msk [vmem:[#allocation3 + $0x58] sm:$0xff] %vm429_vm1, %v1736_v0 }
 0x367   : > { %v1574_v9 = vpop.xlane.xlu0 %1573 }
 0x368   : > { %v1738_v17 = vadd.f32 %v1706_v55, %v1574_v9  ;;  %v1625_v30 = vpop.xlane.xlu1 %1624 }
 0x369   : > { %v2380_v16 = vld [vmem:[#allocation3 + $0x48] sm:$0xff]  ;;  %v1755_v19 = vadd.f32 %v1723_v52, %v1625_v30 }
 0x36a   : > { %3783 = vrcp.f32 %v2380_v16  ;;  %1771 = vst.msk [vmem:[#allocation3 + $0x68] sm:$0xff] %vm429_vm1, %v1738_v17  ;;  %v1709_v16 = vmul.f32 %v5758_v35, %v1677_v15  ;;  %v2398_v15 = vld [vmem:[#allocation3 + $0xd8] sm:$0xff] }
 0x36b   : > { %1788 = vst.msk [vmem:[#allocation3 + $0xf0] sm:$0xff] %vm429_vm1, %v1755_v19  ;;  %v1580_v34 = vpop.xlane.xlu0 %1579 }
 0x36c   : > { %v1740_v47 = vadd.f32 %v1708_v49, %v1580_v34  ;;  %v1559_v4 = vpop.xlane.xlu1 %1558  ;;  %v1679_v49 = vld [vmem:[#allocation3 + $0x90] sm:$0xff]  ;;  %v5204_v34 = vpop.f32.mrf.mxu1 }
 0x36d   : > { %v2382_v11 = vld [vmem:[#allocation3 + $0x58] sm:$0xff]  ;;  %v1733_v58 = vadd.f32 %v1701_v31, %v1559_v4 }
 0x36e   : > { %3785 = vrcp.f32 %v2382_v11  ;;  %1773 = vst.msk [vmem:[#allocation3 + $0x78] sm:$0xff] %vm429_vm1, %v1740_v47  ;;  %v5759_v47 = vld [vmem:[#allocation69_spill] sm:$0xff] }
 0x36f   : > { %1766 = vst.msk [vmem:[#allocation3 + $0x40] sm:$0xff] %vm429_vm1, %v1733_v58  ;;  %v1586_v20 = vpop.xlane.xlu0 %1585  ;;  %v1711_v4 = vmul.f32 %v5759_v47, %v1679_v49  ;;  %v1681_v11 = vld [vmem:[#allocation3 + $0xa0] sm:$0xff]  ;;  %v5209_v58 = vpop.f32.mrf.mxu1  ;;  %v2400_v49 = vld [vmem:[#allocation3 + $0xe8] sm:$0xff] }
 0x370   : > { %v1742_v8 = vadd.f32 %v1710_v46, %v1586_v20  ;;  %v1565_v45 = vpop.xlane.xlu1 %1564  ;;  %v1812_v20 = vld [vmem:[#allocation4 + $0xb0] sm:$0xff] }
 0x371   : > { %v2384_v42 = vld [vmem:[#allocation3 + $0x68] sm:$0xff]  ;;  %v1735_v7 = vadd.f32 %v1703_v6, %v1565_v45 }
 0x372   : > { %3787 = vrcp.f32 %v2384_v42  ;;  %1775 = vst.msk [vmem:[#allocation3 + $0x88] sm:$0xff] %vm429_vm1, %v1742_v8  ;;  %v5760_v8 = vld [vmem:[#allocation23_spill] sm:$0xff]  ;;  %v3384_v42 = vadd.f32 %v5161_v13, %v5158_v39 }
 0x373   : > { %1768 = vst.msk [vmem:[#allocation3 + $0x50] sm:$0xff] %vm429_vm1, %v1735_v7  ;;  %v1592_v1 = vpop.xlane.xlu0 %1591  ;;  %v1713_v45 = vmul.f32 %v5760_v8, %v1681_v11  ;;  %v1817_v11 = vld [vmem:[#allocation4 + $0xd8] sm:$0xff] }
 0x374   : > { %v1744_v60 = vadd.f32 %v1712_v24, %v1592_v1  ;;  %v1571_v22 = vpop.xlane.xlu1 %1570  ;;  %v1683_v24 = vld [vmem:[#allocation3 + $0xb0] sm:$0xff]  ;;  %v5215_v1 = vpop.f32.mrf.mxu1 }
 0x375   : > { %v2386_v28 = vld [vmem:[#allocation3 + $0x78] sm:$0xff]  ;;  %v1737_v41 = vadd.f32 %v1705_v62, %v1571_v22  ;;  %v1715_v39 = vmul.f32 %v5061_v43, %v1683_v24 }
 0x376   : > { %3789 = vrcp.f32 %v2386_v28  ;;  %v2379_v37 = vld [vmem:[#allocation3 + $0x40] sm:$0xff]  ;;  %1777 = vst.msk [vmem:[#allocation3 + $0x98] sm:$0xff] %vm429_vm1, %v1744_v60  ;;  %v2396_v28 = vld [vmem:[#allocation3 + $0xc8] sm:$0xff] }
 0x377   : > { %v3784_v48 = vpop.eup %3783  ;;  %3791 = vrcp.f32 %v2379_v37  ;;  %1770 = vst.msk [vmem:[#allocation3 + $0x60] sm:$0xff] %vm429_vm1, %v1737_v41  ;;  %v1598_v57 = vpop.xlane.xlu0 %1597  ;;  %v3390_v37 = vadd.f32 %v5180_v27, %v5174_v56  ;;  %v3396_v27 = vadd.f32 %v5204_v34, %v5198_v10 }
 0x378   : > { %v1746_v23 = vadd.f32 %v1714_v25, %v1598_v57  ;;  %v1577_v0 = vpop.xlane.xlu1 %1576  ;;  %2514 = vperm.xlu1 %3535, %v3784_v48   ;;  %v3400_v48 = vpop.f32.mrf.mxu1 }
 0x379   : > { %v2388_v55 = vld [vmem:[#allocation3 + $0x88] sm:$0xff]  ;;  %v1739_v9 = vadd.f32 %v1707_v38, %v1577_v0 }
 0x37a   : > { %3793 = vrcp.f32 %v2388_v55  ;;  %v2381_v52 = vld [vmem:[#allocation3 + $0x50] sm:$0xff]  ;;  %1779 = vst.msk [vmem:[#allocation3 + $0xa8] sm:$0xff] %vm429_vm1, %v1746_v23  ;;  %v1813_v23 = vld [vmem:[#allocation4 + $0xb8] sm:$0xff] }
 0x37b   : > { %v3786_v17 = vpop.eup %3785  ;;  %3795 = vrcp.f32 %v2381_v52  ;;  %1772 = vst.msk [vmem:[#allocation3 + $0x70] sm:$0xff] %vm429_vm1, %v1739_v9  ;;  %v1604_v30 = vpop.xlane.xlu0 %1603  ;;  %v3387_v52 = vadd.f32 %v5169_v3, %v5165_v54  ;;  %v3393_v54 = vadd.f32 %v5192_v61, %v5186_v33  ;;  %v3399_v33 = vadd.f32 %v5215_v1, %v5209_v58 }
 0x37c   : > { %v1748_v19 = vadd.f32 %v1716_v44, %v1604_v30  ;;  %v1583_v32 = vpop.xlane.xlu1 %1582  ;;  %2524 = vperm.xlu1 %3535, %v3786_v17   ;;  %v3401_v44 = vpop.f32.mrf.mxu1  ;;  %v1818_v30 = vld [vmem:[#allocation4 + $0xe0] sm:$0xff] }
 0x37d   : > { %v2390_v40 = vld [vmem:[#allocation3 + $0x98] sm:$0xff]  ;;  %v1741_v31 = vadd.f32 %v1709_v16, %v1583_v32 }
 0x37e   : > { %3797 = vrcp.f32 %v2390_v40  ;;  %v2383_v14 = vld [vmem:[#allocation3 + $0x60] sm:$0xff]  ;;  %1781 = vst.msk [vmem:[#allocation3 + $0xb8] sm:$0xff] %vm429_vm1, %v1748_v19  ;;  %v1815_v19 = vld [vmem:[#allocation4 + $0xc8] sm:$0xff]  ;;  %v3403_v47 = vpop.f32.mrf.mxu1 }
 0x37f   : > { %v3788_v53 = vpop.eup %3787  ;;  %3799 = vrcp.f32 %v2383_v14  ;;  %1774 = vst.msk [vmem:[#allocation3 + $0x80] sm:$0xff] %vm429_vm1, %v1741_v31  ;;  %v3402_v31 = vadd.f32 %v3401_v44, %v3400_v48  ;;  %v2435_v44 = vld [vmem:[#allocation4] sm:$0xff] }
 0x380   : > { %v1589_v26 = vpop.xlane.xlu1 %1588  ;;  %2534 = vperm.xlu1 %3535, %v3788_v53   ;;  %v3404_v8 = vpop.f32.mrf.mxu1 }
 0x381   : > { %v2392_v36 = vld [vmem:[#allocation3 + $0xa8] sm:$0xff]  ;;  %v1743_v46 = vadd.f32 %v1711_v4, %v1589_v26 }
 0x382   : > { %3801 = vrcp.f32 %v2392_v36  ;;  %v2385_v51 = vld [vmem:[#allocation3 + $0x70] sm:$0xff] }
 0x383   : > { %v3790_v6 = vpop.eup %3789  ;;  %3803 = vrcp.f32 %v2385_v51  ;;  %1776 = vst.msk [vmem:[#allocation3 + $0x90] sm:$0xff] %vm429_vm1, %v1743_v46  ;;  %v1935_v50 = vpop.permute.xlu0 %1934  ;;  %v2402_v46 = vld [vmem:[#allocation3 + $0xf8] sm:$0xff] }
 0x384   : > { %v3792_v63 = vpop.eup %3791  ;;  %v2004_v7 = vmul.f32 %v1935_v50, %v1812_v20  ;;  %v1595_v29 = vpop.xlane.xlu1 %1594  ;;  %2544 = vperm.xlu1 %3535, %v3790_v6   ;;  %v2395_v6 = vld [vmem:[#allocation3 + $0xc0] sm:$0xff] }
 0x385   : > { %v2394_v5 = vld [vmem:[#allocation3 + $0xb8] sm:$0xff]  ;;  %v1745_v62 = vadd.f32 %v1713_v45, %v1595_v29  ;;  %2509 = vperm.xlu0 %3534, %v3792_v63   ;;  %v1819_v45 = vld [vmem:[#allocation4 + $0xe8] sm:$0xff]  ;;  %v2397_v29 = vld [vmem:[#allocation3 + $0xd0] sm:$0xff] }
 0x386   : > { %3805 = vrcp.f32 %v2394_v5  ;;  %v2387_v60 = vld [vmem:[#allocation3 + $0x80] sm:$0xff]  ;;  %v2293_v22 = vadd.f32 %v3384_v42, %v2004_v7  ;;  %v3405_v5 = vadd.f32 %v3404_v8, %v3403_v47 }
 0x387   : > { %v3794_v2 = vpop.eup %3793  ;;  %3807 = vrcp.f32 %v2387_v60  ;;  %1778 = vst.msk [vmem:[#allocation3 + $0xa0] sm:$0xff] %vm429_vm1, %v1745_v62  ;;  %v1945_v41 = vpop.permute.xlu0 %1944  ;;  %v2399_v60 = vld [vmem:[#allocation3 + $0xe0] sm:$0xff] }
 0x388   : > { %v3796_v13 = vpop.eup %3795  ;;  %2326 = vst.msk [vmem:[#allocation4 + $0xb0] sm:$0xff] %vm494_vm2, %v2293_v22  ;;  %v2006_v12 = vmul.f32 %v1945_v41, %v1814_v59  ;;  %v1601_v25 = vpop.xlane.xlu1 %1600  ;;  %2554 = vperm.xlu1 %3535, %v3794_v2   ;;  %3809 = vrcp.f32 %v2396_v28  ;;  %v2401_v28 = vld [vmem:[#allocation3 + $0xf0] sm:$0xff] }
 0x389   : > { %v1747_v57 = vadd.f32 %v1715_v39, %v1601_v25  ;;  %2519 = vperm.xlu0 %3534, %v3796_v13   ;;  %v1820_v41 = vld [vmem:[#allocation4 + $0xf0] sm:$0xff] }
 0x38a   : > { %v2389_v38 = vld [vmem:[#allocation3 + $0x90] sm:$0xff]  ;;  %v2295_v18 = vadd.f32 %v3390_v37, %v2006_v12 }
 0x38b   : > { %v3798_v0 = vpop.eup %3797  ;;  %3811 = vrcp.f32 %v2389_v38  ;;  %1780 = vst.msk [vmem:[#allocation3 + $0xb0] sm:$0xff] %vm429_vm1, %v1747_v57  ;;  %v1955_v43 = vpop.permute.xlu0 %1954 }
 0x38c   : > { %v3800_v56 = vpop.eup %3799  ;;  %2328 = vst.msk [vmem:[#allocation4 + $0xc0] sm:$0xff] %vm494_vm2, %v2295_v18  ;;  %v2008_v55 = vmul.f32 %v1955_v43, %v1816_v21  ;;  %v1940_v9 = vpop.permute.xlu1 %1939  ;;  %2564 = vperm.xlu1 %3535, %v3798_v0   ;;  %3813 = vrcp.f32 %v2398_v15  ;;  %v1821_v21 = vld [vmem:[#allocation4 + $0xf8] sm:$0xff] }
 0x38d   : > { %v2005_v17 = vmul.f32 %v1940_v9, %v1813_v23  ;;  %2529 = vperm.xlu0 %3534, %v3800_v56  }
 0x38e   : > { %v2391_v35 = vld [vmem:[#allocation3 + $0xa0] sm:$0xff]  ;;  %v2297_v16 = vadd.f32 %v3396_v27, %v2008_v55 }
 0x38f   : > { %v3802_v32 = vpop.eup %3801  ;;  %3815 = vrcp.f32 %v2391_v35  ;;  %v2294_v10 = vadd.f32 %v3387_v52, %v2005_v17  ;;  %v1965_v34 = vpop.permute.xlu0 %1964 }
 0x390   : > { %v3804_v40 = vpop.eup %3803  ;;  %2330 = vst.msk [vmem:[#allocation4 + $0xd0] sm:$0xff] %vm494_vm2, %v2297_v16  ;;  %v2010_v14 = vmul.f32 %v1965_v34, %v1818_v30  ;;  %v1950_v53 = vpop.permute.xlu1 %1949  ;;  %2574 = vperm.xlu1 %3535, %v3802_v32   ;;  %3817 = vrcp.f32 %v2400_v49  ;;  %v2436_v30 = vld [vmem:[#allocation4 + $0x8] sm:$0xff]  ;;  %v2437_v49 = vld [vmem:[#allocation4 + $0x10] sm:$0xff] }
 0x391   : > { %2327 = vst.msk [vmem:[#allocation4 + $0xb8] sm:$0xff] %vm494_vm2, %v2294_v10  ;;  %v2007_v3 = vmul.f32 %v1950_v53, %v1815_v19  ;;  %2539 = vperm.xlu0 %3534, %v3804_v40   ;;  %v2438_v10 = vld [vmem:[#allocation4 + $0x18] sm:$0xff] }
 0x392   : > { %v2393_v4 = vld [vmem:[#allocation3 + $0xb0] sm:$0xff]  ;;  %v2299_v26 = vadd.f32 %v3402_v31, %v2010_v14 }
 0x393   : > { %v3806_v36 = vpop.eup %3805  ;;  %3819 = vrcp.f32 %v2393_v4  ;;  %v2296_v20 = vadd.f32 %v3393_v54, %v2007_v3  ;;  %v1975_v39 = vpop.permute.xlu0 %1974  ;;  %v2439_v54 = vld [vmem:[#allocation4 + $0x20] sm:$0xff]  ;;  %v2440_v3 = vld [vmem:[#allocation4 + $0x28] sm:$0xff] }
 0x394   : > { %v3808_v51 = vpop.eup %3807  ;;  %2332 = vst.msk [vmem:[#allocation4 + $0xe0] sm:$0xff] %vm494_vm2, %v2299_v26  ;;  %v1960_v50 = vpop.permute.xlu1 %1959  ;;  %2584 = vperm.xlu1 %3535, %v3806_v36   ;;  %3821 = vrcp.f32 %v2402_v46  ;;  %v2012_v25 = vmul.f32 %v1975_v39, %v1820_v41  ;;  %v2441_v46 = vld [vmem:[#allocation4 + $0x30] sm:$0xff]  ;;  %v2448_v39 = vld [vmem:[#allocation4 + $0x68] sm:$0xff] }
 0x395   : > { %2329 = vst.msk [vmem:[#allocation4 + $0xc8] sm:$0xff] %vm494_vm2, %v2296_v20  ;;  %v2009_v61 = vmul.f32 %v1960_v50, %v1817_v11  ;;  %2549 = vperm.xlu0 %3534, %v3808_v51   ;;  %v3810_v63 = vpop.eup %3809  ;;  %3823 = vrcp.f32 %v2395_v6  ;;  %v2442_v20 = vld [vmem:[#allocation4 + $0x38] sm:$0xff] }
 0x396   : > { %3825 = vrcp.f32 %v2397_v29 }
 0x397   : > { %v2298_v42 = vadd.f32 %v3399_v33, %v2009_v61  ;;  %3827 = vrcp.f32 %v2399_v60 }
 0x398   : > { %v3812_v7 = vpop.eup %3811  ;;  %v1970_v24 = vpop.permute.xlu1 %1969  ;;  %2594 = vperm.xlu1 %3535, %v3810_v63   ;;  %3829 = vrcp.f32 %v2401_v28 }
 0x399   : > { %2331 = vst.msk [vmem:[#allocation4 + $0xd8] sm:$0xff] %vm494_vm2, %v2298_v42  ;;  %v2011_v62 = vmul.f32 %v1970_v24, %v1819_v45  ;;  %2559 = vperm.xlu0 %3534, %v3812_v7   ;;  %v3814_v58 = vpop.eup %3813  ;;  %v2444_v42 = vld [vmem:[#allocation4 + $0x48] sm:$0xff]  ;;  %v2443_v7 = vld [vmem:[#allocation4 + $0x40] sm:$0xff] }
 0x39b   : > { %v2300_v1 = vadd.f32 %v3405_v5, %v2011_v62 }
 0x39c   : > { %v3816_v59 = vpop.eup %3815  ;;  %2604 = vperm.xlu1 %3535, %v3814_v58   ;;  %v1980_v38 = vpop.permute.xlu1 %1979 }
 0x39d   : > { %2333 = vst.msk [vmem:[#allocation4 + $0xe8] sm:$0xff] %vm494_vm2, %v2300_v1  ;;  %2569 = vperm.xlu0 %3534, %v3816_v59   ;;  %v3818_v22 = vpop.eup %3817  ;;  %v2013_v15 = vmul.f32 %v1980_v38, %v1821_v21  ;;  %v2446_v1 = vld [vmem:[#allocation4 + $0x58] sm:$0xff]  ;;  %v2445_v59 = vld [vmem:[#allocation4 + $0x50] sm:$0xff] }
 0x39e   : > { %v2449_v38 = vld [vmem:[#allocation4 + $0x70] sm:$0xff] }
 0x3a0   : > { %v3820_v2 = vpop.eup %3819  ;;  %v3406_v13 = vpop.f32.mrf.mxu1  ;;  %2614 = vperm.xlu1 %3535, %v3818_v22  }
 0x3a1   : > { %2579 = vperm.xlu0 %3534, %v3820_v2   ;;  %v3822_v12 = vpop.eup %3821 }
 0x3a2   : > { %v3407_v37 = vpop.f32.mrf.mxu1  ;;  %v3824_v57 = vpop.eup %3823 }
 0x3a3   : > { %v3408_v48 = vadd.f32 %v3407_v37, %v3406_v13  ;;  %v3826_v56 = vpop.eup %3825  ;;  %v2447_v13 = vld [vmem:[#allocation4 + $0x60] sm:$0xff] }
 0x3a4   : > { %v3409_v18 = vpop.f32.mrf.mxu1  ;;  %2624 = vperm.xlu1 %3535, %v3822_v12   ;;  %v3828_v55 = vpop.eup %3827 }
 0x3a5   : > { %v2301_v23 = vadd.f32 %v3408_v48, %v2012_v25  ;;  %2589 = vperm.xlu0 %3534, %v3824_v57   ;;  %v3830_v9 = vpop.eup %3829  ;;  %v2450_v57 = vld [vmem:[#allocation4 + $0x78] sm:$0xff] }
 0x3a6   : > { %v3410_v0 = vpop.f32.mrf.mxu1 }
 0x3a7   : > { %2334 = vst.msk [vmem:[#allocation4 + $0xf0] sm:$0xff] %vm494_vm2, %v2301_v23  ;;  %v3411_v43 = vadd.f32 %v3410_v0, %v3409_v18 }
 0x3a9   : > { %v2302_v27 = vadd.f32 %v3411_v43, %v2013_v15  ;;  %2599 = vperm.xlu0 %3534, %v3826_v56   ;;  %v2452_v43 = vld [vmem:[#allocation4 + $0x88] sm:$0xff]  ;;  %v2451_v56 = vld [vmem:[#allocation4 + $0x80] sm:$0xff] }
 0x3ab   : > { %2335 = vst.msk [vmem:[#allocation4 + $0xf8] sm:$0xff] %vm494_vm2, %v2302_v27 }
 0x3ad   : > { %2609 = vperm.xlu0 %3534, %v3828_v55  }
 0x3b1   : > { %2619 = vperm.xlu0 %3534, %v3830_v9  }
 0x3b2   : > { %v2470_v52 = vpop.permute.xlu0 %2469 }
 0x3b3   : > { %v2627_v35 = vmul.f32 %v2470_v52, %v2435_v44 }
 0x3b7   : > { %v2475_v17 = vpop.permute.xlu1 %2474 }
 0x3b8   : > { %v2628_v16 = vmul.f32 %v2475_v17, %v2436_v30  ;;  %v2454_v17 = vld [vmem:[#allocation4 + $0x98] sm:$0xff]  ;;  %v2453_v30 = vld [vmem:[#allocation4 + $0x90] sm:$0xff] }
 0x3ba   : > { %v2659_v19 = vpack.c.bf16 %v2628_v16, %v2627_v35  ;;  %v2480_v32 = vpop.permute.xlu0 %2479 }
 0x3bb   : > { %v2629_v40 = vmul.f32 %v2480_v32, %v2437_v49  ;;  %v2456_v49 = vld [vmem:[#allocation4 + $0xa8] sm:$0xff] }
 0x3bc   : > { %3440 = vmatprep.mubr.msk.bf16.mxu0 %vm494_vm2, %v2659_v19 }
 0x3be   : > { %v2485_v34 = vpop.permute.xlu1 %2484 }
 0x3bf   : > { %v2630_v31 = vmul.f32 %v2485_v34, %v2438_v10  ;;  %v2490_v53 = vpop.permute.xlu0 %2489  ;;  %v2455_v34 = vld [vmem:[#allocation4 + $0xa0] sm:$0xff] }
 0x3c0   : > { %v2631_v4 = vmul.f32 %v2490_v53, %v2439_v54  ;;  %v2458_v54 = vld [vmem:[#allocation4 + $0xb8] sm:$0xff] }
 0x3c1   : > { %v2660_v14 = vpack.c.bf16 %v2630_v31, %v2629_v40 }
 0x3c3   : > { %3441 = vmatmul.mubr.msk.bf16.vlgmr.msra.gmra.mxu0 %vm494_vm2, %v2660_v14 }
 0x3c6   : > { %v2495_v47 = vpop.permute.xlu1 %2494 }
 0x3c7   : > { %v2632_v26 = vmul.f32 %v2495_v47, %v2440_v3  ;;  %v2500_v36 = vpop.permute.xlu0 %2499  ;;  %v2457_v3 = vld [vmem:[#allocation4 + $0xb0] sm:$0xff] }
 0x3c8   : > { %v2633_v6 = vmul.f32 %v2500_v36, %v2441_v46  ;;  %v2460_v46 = vld [vmem:[#allocation4 + $0xc8] sm:$0xff] }
 0x3c9   : > { %v2661_v11 = vpack.c.bf16 %v2632_v26, %v2631_v4 }
 0x3cb   : > { %3444 = vmatprep.mubr.msk.bf16.mxu0 %vm494_vm2, %v2661_v11 }
 0x3ce   : > { %v2505_v51 = vpop.permute.xlu1 %2504 }
 0x3cf   : > { %v2634_v50 = vmul.f32 %v2505_v51, %v2442_v20  ;;  %v2459_v20 = vld [vmem:[#allocation4 + $0xc0] sm:$0xff] }
 0x3d1   : > { %v2662_v33 = vpack.c.bf16 %v2634_v50, %v2633_v6 }
 0x3d3   : > { %3445 = vmatmul.mubr.msk.bf16.gmra.mxu0 %vm494_vm2, %v2662_v33 }
 0x3f3   : > { %v2515_v61 = vpop.permute.xlu1 %2514 }
 0x3f4   : > { %v2636_v24 = vmul.f32 %v2515_v61, %v2444_v42  ;;  %v2462_v61 = vld [vmem:[#allocation4 + $0xd8] sm:$0xff] }
 0x3f7   : > { %v2525_v8 = vpop.permute.xlu1 %2524 }
 0x3f8   : > { %v2638_v22 = vmul.f32 %v2525_v8, %v2446_v1 }
 0x3fb   : > { %v2535_v45 = vpop.permute.xlu1 %2534 }
 0x3fc   : > { %v2640_v12 = vmul.f32 %v2535_v45, %v2448_v39  ;;  %v2461_v45 = vld [vmem:[#allocation4 + $0xd0] sm:$0xff] }
 0x3ff   : > { %v2545_v63 = vpop.permute.xlu1 %2544 }
 0x400   : > { %v2510_v29 = vpop.permute.xlu0 %2509  ;;  %v2642_v23 = vmul.f32 %v2545_v63, %v2450_v57  ;;  %v2959_v57 = vld [vmem:[%s5266_s17 + $0x10] sm:$0xff] }
 0x401   : > { %v2635_v5 = vmul.f32 %v2510_v29, %v2443_v7 }
 0x403   : > { %v2663_v62 = vpack.c.bf16 %v2636_v24, %v2635_v5  ;;  %v2555_v58 = vpop.permute.xlu1 %2554  ;;  %v2464_v24 = vld [vmem:[#allocation4 + $0xe8] sm:$0xff]  ;;  %v2463_v5 = vld [vmem:[#allocation4 + $0xe0] sm:$0xff] }
 0x404   : > { %v2520_v60 = vpop.permute.xlu0 %2519  ;;  %v2644_v55 = vmul.f32 %v2555_v58, %v2452_v43 }
 0x405   : > { %v2637_v2 = vmul.f32 %v2520_v60, %v2445_v59  ;;  %3448 = vmatprep.mubr.msk.bf16.mxu0 %vm494_vm2, %v2663_v62 }
 0x407   : > { %v2664_v28 = vpack.c.bf16 %v2638_v22, %v2637_v2  ;;  %v2565_v41 = vpop.permute.xlu1 %2564  ;;  %v2466_v22 = vld [vmem:[#allocation4 + $0xf8] sm:$0xff]  ;;  %v2465_v2 = vld [vmem:[#allocation4 + $0xf0] sm:$0xff] }
 0x408   : > { %v2530_v37 = vpop.permute.xlu0 %2529  ;;  %v2646_v16 = vmul.f32 %v2565_v41, %v2454_v17  ;;  %v2958_v17 = vld [vmem:[%s5266_s17 + $0x8] sm:$0xff] }
 0x409   : > { %v2639_v25 = vmul.f32 %v2530_v37, %v2447_v13  ;;  %3449 = vmatmul.mubr.msk.bf16.gmra.mxu0 %vm494_vm2, %v2664_v28  ;;  %v5261_v37 = vld [vmem:[%s5463_s5] ss:$0 sm:$0xff] }
 0x40b   : > { %v2665_v48 = vpack.c.bf16 %v2640_v12, %v2639_v25  ;;  %v2575_v21 = vpop.permute.xlu1 %2574  ;;  %v5268_v25 = vstv %s2923_s23  ;;  %s5405_s23 = scalar_lea.hbm %s5465_s7, %s3299_s19 }
 0x40c   : > { %v2540_v18 = vpop.permute.xlu0 %2539  ;;  %v2648_v31 = vmul.f32 %v2575_v21, %v2456_v49  ;;  %v2963_v49 = vld [vmem:[%s5266_s17 + $0x30] sm:$0xff] }
 0x40d   : > { %v2641_v0 = vmul.f32 %v2540_v18, %v2449_v38  ;;  %3452 = vmatprep.mubr.msk.bf16.mxu0 %vm494_vm2, %v2665_v48 }
 0x40f   : > { %v2666_v15 = vpack.c.bf16 %v2642_v23, %v2641_v0  ;;  %v2585_v52 = vpop.permute.xlu1 %2584  ;;  %v2957_v23 = vld [vmem:[%s5266_s17] sm:$0xff] }
 0x410   : > { %v2550_v27 = vpop.permute.xlu0 %2549  ;;  %v2650_v4 = vmul.f32 %v2585_v52, %v2458_v54 }
 0x411   : > { %v2643_v9 = vmul.f32 %v2550_v27, %v2451_v56  ;;  %3453 = vmatmul.mubr.msk.bf16.gmra.mxu0 %vm494_vm2, %v2666_v15  ;;  %v2960_v27 = vld [vmem:[%s5266_s17 + $0x18] sm:$0xff] }
 0x413   : > { %v2667_v44 = vpack.c.bf16 %v2644_v55, %v2643_v9  ;;  %v2595_v10 = vpop.permute.xlu1 %2594 }
 0x414   : > { %v2560_v35 = vpop.permute.xlu0 %2559  ;;  %v2652_v6 = vmul.f32 %v2595_v10, %v2460_v46  ;;  %v2962_v46 = vld [vmem:[%s5266_s17 + $0x28] sm:$0xff] }
 0x415   : > { %v2645_v19 = vmul.f32 %v2560_v35, %v2453_v30  ;;  %3456 = vmatprep.mubr.msk.bf16.mxu0 %vm494_vm2, %v2667_v44 }
 0x417   : > { %v2668_v32 = vpack.c.bf16 %v2646_v16, %v2645_v19  ;;  %v2605_v11 = vpop.permute.xlu1 %2604 }
 0x418   : > { %v2570_v40 = vpop.permute.xlu0 %2569  ;;  %v2654_v42 = vmul.f32 %v2605_v11, %v2462_v61  ;;  %v2967_v61 = vld [vmem:[%s5266_s17 + $0x50] sm:$0xff] }
 0x419   : > { %v2647_v14 = vmul.f32 %v2570_v40, %v2455_v34  ;;  %3457 = vmatmul.mubr.msk.bf16.gmra.mxu0 %vm494_vm2, %v2668_v32 }
 0x41b   : > { %v2669_v53 = vpack.c.bf16 %v2648_v31, %v2647_v14  ;;  %v2615_v8 = vpop.permute.xlu1 %2614  ;;  %v2961_v31 = vld [vmem:[%s5266_s17 + $0x20] sm:$0xff] }
 0x41c   : > { %v2580_v47 = vpop.permute.xlu0 %2579  ;;  %v2656_v58 = vmul.f32 %v2615_v8, %v2464_v24 }
 0x41d   : > { %v2649_v26 = vmul.f32 %v2580_v47, %v2457_v3  ;;  %3460 = vmatprep.mubr.msk.bf16.mxu0 %vm494_vm2, %v2669_v53  ;;  %v2964_v47 = vld [vmem:[%s5266_s17 + $0x38] sm:$0xff] }
 0x41f   : > { %v2670_v36 = vpack.c.bf16 %v2650_v4, %v2649_v26  ;;  %v2625_v59 = vpop.permute.xlu1 %2624 }
 0x420   : > { %v2590_v51 = vpop.permute.xlu0 %2589  ;;  %v2658_v41 = vmul.f32 %v2625_v59, %v2466_v22  ;;  %v2966_v22 = vld [vmem:[%s5266_s17 + $0x48] sm:$0xff] }
 0x421   : > { %v2651_v50 = vmul.f32 %v2590_v51, %v2459_v20  ;;  %3461 = vmatmul.mubr.msk.bf16.gmra.mxu0 %vm494_vm2, %v2670_v36 }
 0x423   : > { %v2671_v33 = vpack.c.bf16 %v2652_v6, %v2651_v50 }
 0x424   : > { %v2600_v63 = vpop.permute.xlu0 %2599 }
 0x425   : > { %v2653_v7 = vmul.f32 %v2600_v63, %v2461_v45  ;;  %3464 = vmatprep.mubr.msk.bf16.mxu0 %vm494_vm2, %v2671_v33 }
 0x427   : > { %v2672_v29 = vpack.c.bf16 %v2654_v42, %v2653_v7  ;;  %v2965_v42 = vld [vmem:[%s5266_s17 + $0x40] sm:$0xff] }
 0x428   : > { %v2610_v62 = vpop.permute.xlu0 %2609 }
 0x429   : > { %v2655_v1 = vmul.f32 %v2610_v62, %v2463_v5  ;;  %3465 = vmatmul.mubr.msk.bf16.gmra.mxu0 %vm494_vm2, %v2672_v29  ;;  %v2968_v62 = vld [vmem:[%s5266_s17 + $0x58] sm:$0xff] }
 0x42b   : > { %v2673_v60 = vpack.c.bf16 %v2656_v58, %v2655_v1 }
 0x42c   : > { %v2620_v28 = vpop.permute.xlu0 %2619 }
 0x42d   : > { %v2657_v39 = vmul.f32 %v2620_v28, %v2465_v2  ;;  %3468 = vmatprep.mubr.msk.bf16.mxu0 %vm494_vm2, %v2673_v60 }
 0x42f   : > { %v2674_v13 = vpack.c.bf16 %v2658_v41, %v2657_v39 }
 0x431   : > { %3469 = vmatmul.mubr.msk.bf16.gmra.mxu0 %vm494_vm2, %v2674_v13  ;;  %v2971_v13 = vld [vmem:[%s5266_s17 + $0x70] sm:$0xff] }
 0x483   : > { %v3442_v12 = vpop.f32.mrf.mxu0 }
 0x484   : > { %v2805_v48 = vadd.f32 %v3442_v12, %v5261_v37 }
 0x485   : > { %v2796_v21 = vpop.f32.mrf.mxu0 }
 0x486   : > { %v2927_v38 = vmul.f32 %v5268_v25, %v2805_v48  ;;  %v2797_v18 = vadd.f32 %v5261_v37, %v2796_v21 }
 0x487   : > { %v3443_v0 = vpop.f32.mrf.mxu0 }
 0x488   : > { %v2991_v15 = vadd.f32 %v2959_v57, %v2927_v38  ;;  %v2925_v43 = vmul.f32 %v5268_v25, %v2797_v18  ;;  %v2808_v56 = vadd.f32 %v3443_v0, %v5261_v37  ;;  %v2969_v38 = vld [vmem:[%s5266_s17 + $0x60] sm:$0xff] }
 0x489   : > { %v2799_v55 = vpop.f32.mrf.mxu0 }
 0x48a   : > { %3023 = vst [vmem:[%s5280_s16 + $0x10] sm:$0xff] %v2991_v15  ;;  %v2989_v9 = vadd.f32 %v2957_v23, %v2925_v43  ;;  %v2928_v52 = vmul.f32 %v5268_v25, %v2808_v56  ;;  %v2800_v44 = vadd.f32 %v5261_v37, %v2799_v55  ;;  %v2972_v43 = vld [vmem:[%s5266_s17 + $0x78] sm:$0xff] }
 0x48c   : > { %3021 = vst [vmem:[%s5280_s16] sm:$0xff] %v2989_v9  ;;  %v2992_v30 = vadd.f32 %v2960_v27, %v2928_v52  ;;  %v2926_v35 = vmul.f32 %v5268_v25, %v2800_v44  ;;  %v2970_v52 = vld [vmem:[%s5266_s17 + $0x68] sm:$0xff] }
 0x48e   : > { %3024 = vst [vmem:[%s5280_s16 + $0x18] sm:$0xff] %v2992_v30  ;;  %v2990_v16 = vadd.f32 %v2958_v17, %v2926_v35 }
 0x490   : > { %3022 = vst [vmem:[%s5280_s16 + $0x8] sm:$0xff] %v2990_v16  ;;  %v2975_v16 = vld [vmem:[%s5266_s17 + $0x90] sm:$0xff] }
 0x493   : > { %v3446_v19 = vpop.f32.mrf.mxu0 }
 0x494   : > { %v2821_v32 = vadd.f32 %v3446_v19, %v5261_v37 }
 0x495   : > { %v2812_v10 = vpop.f32.mrf.mxu0 }
 0x496   : > { %v2931_v34 = vmul.f32 %v5268_v25, %v2821_v32  ;;  %v2813_v40 = vadd.f32 %v5261_v37, %v2812_v10 }
 0x497   : > { %v3447_v14 = vpop.f32.mrf.mxu0 }
 0x498   : > { %v2995_v53 = vadd.f32 %v2963_v49, %v2931_v34  ;;  %v2929_v54 = vmul.f32 %v5268_v25, %v2813_v40  ;;  %v2824_v3 = vadd.f32 %v3447_v14, %v5261_v37  ;;  %v2973_v34 = vld [vmem:[%s5266_s17 + $0x80] sm:$0xff] }
 0x499   : > { %v2815_v4 = vpop.f32.mrf.mxu0 }
 0x49a   : > { %3027 = vst [vmem:[%s5280_s16 + $0x30] sm:$0xff] %v2995_v53  ;;  %v2993_v26 = vadd.f32 %v2961_v31, %v2929_v54  ;;  %v2932_v11 = vmul.f32 %v5268_v25, %v2824_v3  ;;  %v2816_v36 = vadd.f32 %v5261_v37, %v2815_v4  ;;  %v2976_v54 = vld [vmem:[%s5266_s17 + $0x98] sm:$0xff] }
 0x49c   : > { %3025 = vst [vmem:[%s5280_s16 + $0x20] sm:$0xff] %v2993_v26  ;;  %v2996_v20 = vadd.f32 %v2964_v47, %v2932_v11  ;;  %v2930_v51 = vmul.f32 %v5268_v25, %v2816_v36  ;;  %v2974_v11 = vld [vmem:[%s5266_s17 + $0x88] sm:$0xff] }
 0x49e   : > { %3028 = vst [vmem:[%s5280_s16 + $0x38] sm:$0xff] %v2996_v20  ;;  %v2994_v6 = vadd.f32 %v2962_v46, %v2930_v51 }
 0x4a0   : > { %3026 = vst [vmem:[%s5280_s16 + $0x28] sm:$0xff] %v2994_v6  ;;  %v2979_v6 = vld [vmem:[%s5266_s17 + $0xb0] sm:$0xff] }
 0x4c9   : > { %v3450_v50 = vpop.f32.mrf.mxu0 }
 0x4ca   : > { %v2837_v33 = vadd.f32 %v3450_v50, %v5261_v37 }
 0x4cb   : > { %v2828_v8 = vpop.f32.mrf.mxu0 }
 0x4cc   : > { %v2935_v45 = vmul.f32 %v5268_v25, %v2837_v33  ;;  %v2829_v63 = vadd.f32 %v5261_v37, %v2828_v8 }
 0x4cd   : > { %v3451_v7 = vpop.f32.mrf.mxu0 }
 0x4ce   : > { %v2999_v29 = vadd.f32 %v2967_v61, %v2935_v45  ;;  %v2933_v24 = vmul.f32 %v5268_v25, %v2829_v63  ;;  %v2840_v5 = vadd.f32 %v3451_v7, %v5261_v37  ;;  %v2977_v45 = vld [vmem:[%s5266_s17 + $0xa0] sm:$0xff] }
 0x4cf   : > { %v2831_v58 = vpop.f32.mrf.mxu0 }
 0x4d0   : > { %3031 = vst [vmem:[%s5280_s16 + $0x50] sm:$0xff] %v2999_v29  ;;  %v2997_v1 = vadd.f32 %v2965_v42, %v2933_v24  ;;  %v2936_v59 = vmul.f32 %v5268_v25, %v2840_v5  ;;  %v2832_v60 = vadd.f32 %v5261_v37, %v2831_v58  ;;  %v2980_v24 = vld [vmem:[%s5266_s17 + $0xb8] sm:$0xff] }
 0x4d1   : > { %v3454_v2 = vpop.f32.mrf.mxu0 }
 0x4d2   : > { %3029 = vst [vmem:[%s5280_s16 + $0x40] sm:$0xff] %v2997_v1  ;;  %v3000_v28 = vadd.f32 %v2968_v62, %v2936_v59  ;;  %v2934_v41 = vmul.f32 %v5268_v25, %v2832_v60  ;;  %v2853_v39 = vadd.f32 %v3454_v2, %v5261_v37  ;;  %v2978_v59 = vld [vmem:[%s5266_s17 + $0xa8] sm:$0xff] }
 0x4d3   : > { %v2844_v12 = vpop.f32.mrf.mxu0 }
 0x4d4   : > { %3032 = vst [vmem:[%s5280_s16 + $0x58] sm:$0xff] %v3000_v28  ;;  %v2998_v48 = vadd.f32 %v2966_v22, %v2934_v41  ;;  %v2939_v57 = vmul.f32 %v5268_v25, %v2853_v39  ;;  %v2845_v21 = vadd.f32 %v5261_v37, %v2844_v12  ;;  %v2983_v41 = vld [vmem:[%s5266_s17 + $0xd0] sm:$0xff] }
 0x4d5   : > { %v3455_v18 = vpop.f32.mrf.mxu0 }
 0x4d6   : > { %3030 = vst [vmem:[%s5280_s16 + $0x48] sm:$0xff] %v2998_v48  ;;  %v3003_v23 = vadd.f32 %v2971_v13, %v2939_v57  ;;  %v2937_v0 = vmul.f32 %v5268_v25, %v2845_v21  ;;  %v2856_v15 = vadd.f32 %v3455_v18, %v5261_v37  ;;  %v2981_v57 = vld [vmem:[%s5266_s17 + $0xc0] sm:$0xff] }
 0x4d7   : > { %v2847_v56 = vpop.f32.mrf.mxu0 }
 0x4d8   : > { %3035 = vst [vmem:[%s5280_s16 + $0x70] sm:$0xff] %v3003_v23  ;;  %v3001_v27 = vadd.f32 %v2969_v38, %v2937_v0  ;;  %v2940_v55 = vmul.f32 %v5268_v25, %v2856_v15  ;;  %v2848_v9 = vadd.f32 %v5261_v37, %v2847_v56  ;;  %v2984_v0 = vld [vmem:[%s5266_s17 + $0xd8] sm:$0xff] }
 0x4d9   : > { %v3458_v44 = vpop.f32.mrf.mxu0 }
 0x4da   : > { %3033 = vst [vmem:[%s5280_s16 + $0x60] sm:$0xff] %v3001_v27  ;;  %v3004_v17 = vadd.f32 %v2972_v43, %v2940_v55  ;;  %v2938_v30 = vmul.f32 %v5268_v25, %v2848_v9  ;;  %v2869_v35 = vadd.f32 %v3458_v44, %v5261_v37  ;;  %v2982_v55 = vld [vmem:[%s5266_s17 + $0xc8] sm:$0xff] }
 0x4db   : > { %v2860_v19 = vpop.f32.mrf.mxu0 }
 0x4dc   : > { %3036 = vst [vmem:[%s5280_s16 + $0x78] sm:$0xff] %v3004_v17  ;;  %v3002_v32 = vadd.f32 %v2970_v52, %v2938_v30  ;;  %v2943_v49 = vmul.f32 %v5268_v25, %v2869_v35  ;;  %v2861_v10 = vadd.f32 %v5261_v37, %v2860_v19  ;;  %v2987_v30 = vld [vmem:[%s5266_s17 + $0xf0] sm:$0xff] }
 0x4dd   : > { %v3459_v40 = vpop.f32.mrf.mxu0 }
 0x4de   : > { %3034 = vst [vmem:[%s5280_s16 + $0x68] sm:$0xff] %v3002_v32  ;;  %v3007_v31 = vadd.f32 %v2975_v16, %v2943_v49  ;;  %v2941_v14 = vmul.f32 %v5268_v25, %v2861_v10  ;;  %v2872_v53 = vadd.f32 %v3459_v40, %v5261_v37  ;;  %v2985_v49 = vld [vmem:[%s5266_s17 + $0xe0] sm:$0xff] }
 0x4df   : > { %v2863_v3 = vpop.f32.mrf.mxu0 }
 0x4e0   : > { %3039 = vst [vmem:[%s5280_s16 + $0x90] sm:$0xff] %v3007_v31  ;;  %v3005_v47 = vadd.f32 %v2973_v34, %v2941_v14  ;;  %v2944_v4 = vmul.f32 %v5268_v25, %v2872_v53  ;;  %v2864_v26 = vadd.f32 %v5261_v37, %v2863_v3  ;;  %v2988_v14 = vld [vmem:[%s5266_s17 + $0xf8] sm:$0xff] }
 0x4e1   : > { %v3462_v36 = vpop.f32.mrf.mxu0 }
 0x4e2   : > { %3037 = vst [vmem:[%s5280_s16 + $0x80] sm:$0xff] %v3005_v47  ;;  %v3008_v46 = vadd.f32 %v2976_v54, %v2944_v4  ;;  %v2942_v20 = vmul.f32 %v5268_v25, %v2864_v26  ;;  %v2885_v51 = vadd.f32 %v3462_v36, %v5261_v37  ;;  %v2986_v4 = vld [vmem:[%s5266_s17 + $0xe8] sm:$0xff] }
 0x4e3   : > { %v2876_v50 = vpop.f32.mrf.mxu0 }
 0x4e4   : > { %3040 = vst [vmem:[%s5280_s16 + $0x98] sm:$0xff] %v3008_v46  ;;  %v3006_v33 = vadd.f32 %v2974_v11, %v2942_v20  ;;  %v2947_v61 = vmul.f32 %v5268_v25, %v2885_v51  ;;  %v2877_v8 = vadd.f32 %v5261_v37, %v2876_v50 }
 0x4e5   : > { %v3463_v63 = vpop.f32.mrf.mxu0 }
 0x4e6   : > { %3038 = vst [vmem:[%s5280_s16 + $0x88] sm:$0xff] %v3006_v33  ;;  %v3011_v42 = vadd.f32 %v2979_v6, %v2947_v61  ;;  %v2945_v7 = vmul.f32 %v5268_v25, %v2877_v8  ;;  %v2888_v29 = vadd.f32 %v3463_v63, %v5261_v37 }
 0x4e7   : > { %v2879_v5 = vpop.f32.mrf.mxu0 }
 0x4e8   : > { %3043 = vst [vmem:[%s5280_s16 + $0xb0] sm:$0xff] %v3011_v42  ;;  %v3009_v62 = vadd.f32 %v2977_v45, %v2945_v7  ;;  %v2948_v58 = vmul.f32 %v5268_v25, %v2888_v29  ;;  %v2880_v1 = vadd.f32 %v5261_v37, %v2879_v5 }
 0x4e9   : > { %v3466_v60 = vpop.f32.mrf.mxu0 }
 0x4ea   : > { %3041 = vst [vmem:[%s5280_s16 + $0xa0] sm:$0xff] %v3009_v62  ;;  %v3012_v22 = vadd.f32 %v2980_v24, %v2948_v58  ;;  %v2946_v2 = vmul.f32 %v5268_v25, %v2880_v1  ;;  %v2901_v28 = vadd.f32 %v3466_v60, %v5261_v37 }
 0x4eb   : > { %v2892_v39 = vpop.f32.mrf.mxu0 }
 0x4ec   : > { %3044 = vst [vmem:[%s5280_s16 + $0xb8] sm:$0xff] %v3012_v22  ;;  %v3010_v13 = vadd.f32 %v2978_v59, %v2946_v2  ;;  %v2951_v12 = vmul.f32 %v5268_v25, %v2901_v28  ;;  %v2893_v48 = vadd.f32 %v5261_v37, %v2892_v39 }
 0x4ed   : > { %v3467_v21 = vpop.f32.mrf.mxu0 }
 0x4ee   : > { %3042 = vst [vmem:[%s5280_s16 + $0xa8] sm:$0xff] %v3010_v13  ;;  %v3015_v38 = vadd.f32 %v2983_v41, %v2951_v12  ;;  %v2949_v18 = vmul.f32 %v5268_v25, %v2893_v48  ;;  %v2904_v23 = vadd.f32 %v3467_v21, %v5261_v37 }
 0x4ef   : > { %v2895_v15 = vpop.f32.mrf.mxu0 }
 0x4f0   : > { %3047 = vst [vmem:[%s5280_s16 + $0xd0] sm:$0xff] %v3015_v38  ;;  %v3013_v43 = vadd.f32 %v2981_v57, %v2949_v18  ;;  %v2952_v56 = vmul.f32 %v5268_v25, %v2904_v23  ;;  %v2896_v27 = vadd.f32 %v5261_v37, %v2895_v15 }
 0x4f1   : > { %v3470_v9 = vpop.f32.mrf.mxu0 }
 0x4f2   : > { %3045 = vst [vmem:[%s5280_s16 + $0xc0] sm:$0xff] %v3013_v43  ;;  %v3016_v52 = vadd.f32 %v2984_v0, %v2952_v56  ;;  %v2950_v44 = vmul.f32 %v5268_v25, %v2896_v27  ;;  %v2917_v17 = vadd.f32 %v3470_v9, %v5261_v37 }
 0x4f3   : > { %v2908_v35 = vpop.f32.mrf.mxu0 }
 0x4f4   : > { %3048 = vst [vmem:[%s5280_s16 + $0xd8] sm:$0xff] %v3016_v52  ;;  %v3014_v16 = vadd.f32 %v2982_v55, %v2950_v44  ;;  %v2955_v19 = vmul.f32 %v5268_v25, %v2917_v17  ;;  %v2909_v32 = vadd.f32 %v5261_v37, %v2908_v35 }
 0x4f5   : > { %v3471_v10 = vpop.f32.mrf.mxu0 }
 0x4f6   : > { %3046 = vst [vmem:[%s5280_s16 + $0xc8] sm:$0xff] %v3014_v16  ;;  %v3019_v34 = vadd.f32 %v2987_v30, %v2955_v19  ;;  %v2953_v40 = vmul.f32 %v5268_v25, %v2909_v32  ;;  %v2920_v31 = vadd.f32 %v3471_v10, %v5261_v37 }
 0x4f7   : > { %v2911_v53 = vpop.f32.mrf.mxu0 }
 0x4f8   : > { %3051 = vst [vmem:[%s5280_s16 + $0xf0] sm:$0xff] %v3019_v34  ;;  %v3017_v54 = vadd.f32 %v2985_v49, %v2953_v40  ;;  %v2956_v3 = vmul.f32 %v5268_v25, %v2920_v31  ;;  %v2912_v47 = vadd.f32 %v5261_v37, %v2911_v53 }
 0x4fa   : > { %3049 = vst [vmem:[%s5280_s16 + $0xe0] sm:$0xff] %v3017_v54  ;;  %v3020_v26 = vadd.f32 %v2988_v14, %v2956_v3  ;;  %v2954_v11 = vmul.f32 %v5268_v25, %v2912_v47 }
 0x4fc   : > { %3052 = vst [vmem:[%s5280_s16 + $0xf8] sm:$0xff] %v3020_v26  ;;  %v3018_v36 = vadd.f32 %v2986_v4, %v2954_v11 }
 0x4fe   : > { %3050 = vst [vmem:[%s5280_s16 + $0xe8] sm:$0xff] %v3018_v36 }
 0x4ff   : > { %3844 = shalt.err (!%p3841_p5)
}
 0x500   : > { %s3845_s25 = scalar_lea.hbm %s5405_s23, 4096  ;;  %s3849_s18 = scalar_lea.hbm %s5465_s7, 8192 }
 0x501   : > { %p3846_p6 = scmp.ne.s32.totalorder %s5405_s23, %s3845_s25  ;;  %p3850_p10 = scmp.lt.s32.totalorder %s5405_s23, %s5465_s7 }
 0x502   : > { %p3851_p11 = scmp.lt.s32.totalorder %s3849_s18, %s3845_s25 }
 0x503   : > { %p3847_p7 = pnand %p3846_p6, %p3998_p4 }
 0x504   : > { %p3852_p12 = por %p3851_p11, %p3850_p10 }
 0x505   : > { %p3848_p9 = pneg %p3847_p7 }
 0x507   : > { %p3853_p13 = pnand %p3852_p12, %p3848_p9 }
 0x509   : > { %3856 = shalt.err (!%p3853_p13)
}
 0x50a   : > { %s3913_s21 = smov 128   ;;  %s3914_s22 = smov 8  }
 0x50b   : > { %3474 = dma.vmem_to_hbm [thread:$0]  (%p3998_p4), %s5407_s20, 4096, %s5405_s23, %s5413_s29, %s3913_s21, %s3913_s21, %s3914_s22  }
 0x50c PF: > { %p3480_p0 = scmp.ge.s32.totalorder %s3907_s8, 2  ;;  %s3084_s24 = sand.u32 1, %s3887_s26  }
 0x50d   : > { %s3085_s6 = scalar_lea.sflag [#allocation7], %s3084_s24 }
 0x50e   : > { %p3477_p1 = pnand %p3480_p0, %p4005_p8 }
 0x510   : > { %p3478_p2 = pneg %p3477_p1 }
 0x512   : > { %3882 = dma.done.wait (%p3478_p2), %s3085_s6, 4096  }
 0x513   : > { %3884 = vsyncadd (%p3478_p2), %s3085_s6, 4294963200  ;;  %s21_s8 = sadd.s32 1, %s3907_s8   ;;  %s5761_s26 = smov %s3891_s27 }
 0x514   : > { %p18_p3 = scmp.ge.s32.totalorder %s21_s8, 4   ;;  %s5762_s27 = smov %s3895_s28 }
 0x515   : > { %s5763_s28 = smov %s4011_s15  ;;  %s5764_s29 = smov %s3903_s30 }
 0x516   : > { %s5765_s30 = smov %s5767_s10  ;;  %20 = sbr.rel (!%p18_p3) target bundleno = 6 (0x6), region = 100 }
 0x51b   :  { %3090 = vsyncpa [#allocation7], 1 }
 0x51c   :  { %3092 = vsyncpa [#allocation7 + $0x1], 1 }

</bundles_post_ra>
